<compile_context>
chip_gen: v5e
topology: v5e:2x2
jax: 0.10.0
libtpu: 0.0.40
codegen_flags: <defaults>
</compile_context>

<pallas_src>
import functools
import math

import jax
import jax.numpy as jnp
from jax.experimental import pallas as pl
from jax.experimental.pallas import tpu as pltpu


def _vmem_limit_bytes():
    try:
        phys = int(pltpu.get_tpu_info().vmem_capacity_bytes)
        return max(32 * 1024 * 1024, min(int(phys * 3 // 4), 100 * 1024 * 1024))
    except Exception:
        return 32 * 1024 * 1024


_VMEM_LIMIT = _vmem_limit_bytes()


# ----------------------------- small helpers -----------------------------

def _gelu(x):
    # tanh-approximate GELU (EUP tanh). |err| vs exact erf GELU < ~1e-3.
    c = 0.7978845608028654  # sqrt(2/pi)
    return 0.5 * x * (1.0 + jnp.tanh(c * (x + 0.044715 * x * x * x)))


def _bn_affine(gamma, beta, mean, var, eps=1e-5):
    # eval-mode BatchNorm folded into per-channel scale/shift
    scale = gamma / jnp.sqrt(var + eps)
    shift = beta - mean * scale
    return scale, shift


def _row_tile(m, cap=1024):
    # largest power-of-two row tile <= min(m, cap); pairs with a pl.cdiv grid.
    if m <= 8:
        return m
    t = 8
    while t * 2 <= min(m, cap):
        t *= 2
    return t


def _zero_pad_border(pad_ref, H, W, C):
    # zero only the 1-pixel halo (the center is fully overwritten every step)
    z_row = jnp.zeros((1, W + 2, C), jnp.float32)
    pad_ref[0:1, :, :] = z_row
    pad_ref[H + 1:H + 2, :, :] = z_row
    z_col = jnp.zeros((H, 1, C), jnp.float32)
    pad_ref[1:H + 1, 0:1, :] = z_col
    pad_ref[1:H + 1, W + 1:W + 2, :] = z_col


# --------------- K1: LPU (depthwise 3x3 + residual) fused with GroupNorm(1,C) ---------------

def _lpu_gn1_kernel(x_ref, w_ref, b_ref, g_ref, bb_ref, x1_ref, y_ref, pad_ref,
                    *, H, W, eps):
    C = x_ref.shape[-1]
    x = x_ref[0]                                           # (H, W, C) f32
    _zero_pad_border(pad_ref, H, W, C)
    pad_ref[1:H + 1, 1:W + 1, :] = x                       # in-kernel halo, no host pad

    acc = x * w_ref[4] + b_ref[...]                        # center tap + bias (reuse x)
    for t in range(9):
        if t == 4:
            continue
        dy, dx = divmod(t, 3)
        acc = acc + pad_ref[dy:dy + H, dx:dx + W, :] * w_ref[t]
    x1 = acc + x                                           # LPU residual
    x1_ref[0] = x1.astype(x1_ref.dtype)

    # GroupNorm(1, C): per-sample stats over all H*W*C elements (biased variance).
    mean = jnp.mean(x1)
    var = jnp.mean(jnp.square(x1 - mean))
    inv = jax.lax.rsqrt(var + eps)
    y_ref[0] = ((x1 - mean) * inv * g_ref[...] + bb_ref[...]).astype(y_ref.dtype)


def lpu_gn1(x, w, bias, gamma, beta, eps=1e-5):
    B, H, W, C = x.shape
    kern = functools.partial(_lpu_gn1_kernel, H=H, W=W, eps=eps)
    return pl.pallas_call(
        kern,
        out_shape=(jax.ShapeDtypeStruct((B, H, W, C), jnp.bfloat16),
                   jax.ShapeDtypeStruct((B, H, W, C), jnp.bfloat16)),
        grid=(B,),
        in_specs=[
            pl.BlockSpec((1, H, W, C), lambda b: (b, 0, 0, 0)),
            pl.BlockSpec((9, 1, 1, C), lambda b: (0, 0, 0, 0)),
            pl.BlockSpec((1, 1, C), lambda b: (0, 0, 0)),
            pl.BlockSpec((1, 1, C), lambda b: (0, 0, 0)),
            pl.BlockSpec((1, 1, C), lambda b: (0, 0, 0)),
        ],
        out_specs=(pl.BlockSpec((1, H, W, C), lambda b: (b, 0, 0, 0)),
                   pl.BlockSpec((1, H, W, C), lambda b: (b, 0, 0, 0))),
        scratch_shapes=[pltpu.VMEM((H + 2, W + 2, C), jnp.float32)],
        compiler_params=pltpu.CompilerParams(
            dimension_semantics=("parallel",), vmem_limit_bytes=_VMEM_LIMIT),
    )(x, w.reshape(9, 1, 1, C), bias.reshape(1, 1, C),
      gamma.reshape(1, 1, C), beta.reshape(1, 1, C))


# --------------- K3: fused LMHSA (kxk pooling, QKV, attention, Wo) + residual + GroupNorm ---------------

def _lmhsa_gn2_kernel(y_ref, y5_ref, x1_ref, kvw_ref, kvb_ref,
                      wq_ref, bq_ref, wkv_ref, bkv_ref, wo_ref, bo_ref,
                      g2_ref, b2_ref, x2_ref, z_ref, att_sc, kv_sc,
                      *, heads, k, scale, eps):
    Lq, C = y_ref.shape[1], y_ref.shape[2]
    Ho, Wo = y5_ref.shape[1], y5_ref.shape[3]
    dh = C // heads

    # --- fused key/value spatial pooling: depthwise kxk, stride k, over y ---
    # y5 is a free host reshape of y: (Ho, k, Wo, k*C); tap (i, j) is a leading-dim
    # index + static lane slice (no strided loads, no host transpose).
    kv_acc = jnp.zeros((Ho, Wo, C), jnp.float32)
    for i in range(k):
        plane = y5_ref[0, :, i, :, :].astype(jnp.float32)          # (Ho, Wo, k*C)
        for j in range(k):
            kv_acc = kv_acc + plane[:, :, j * C:(j + 1) * C] * kvw_ref[i * k + j]
    for oh in range(Ho):  # flatten (Ho, Wo) -> Lk via row stores (no value reshape)
        kv_sc[oh * Wo:(oh + 1) * Wo, :] = kv_acc[oh] + kvb_ref[...]
    kv = kv_sc[...].astype(jnp.bfloat16)                           # (Lk, C)

    # --- projections (bf16 MXU operands, f32 accumulation) ---
    y = y_ref[0]                                                   # (Lq, C) bf16
    q = jnp.dot(y, wq_ref[...], preferred_element_type=jnp.float32) + bq_ref[...]
    kvp = jnp.dot(kv, wkv_ref[...], preferred_element_type=jnp.float32) + bkv_ref[...]

    # --- per-head softmax attention; head outputs staged into att_sc ---
    for h in range(heads):
        lo, hi = h * dh, (h + 1) * dh
        qh = q[:, lo:hi].astype(jnp.bfloat16)
        kh = kvp[:, lo:hi].astype(jnp.bfloat16)
        vh = kvp[:, C + lo:C + hi].astype(jnp.bfloat16)
        s = jax.lax.dot_general(qh, kh, (((1,), (1,)), ((), ())),
                                preferred_element_type=jnp.float32) * scale
        m = jnp.max(s, axis=-1, keepdims=True)
        p = jnp.exp(s - m)
        p = p * pl.reciprocal(jnp.sum(p, axis=-1, keepdims=True), approx=True)
        att_sc[:, lo:hi] = jnp.dot(p.astype(jnp.bfloat16), vh,
                                   preferred_element_type=jnp.float32)

    # single full-contraction (K = C) Wo matmul instead of `heads` skinny matmuls
    o = jnp.dot(att_sc[...].astype(jnp.bfloat16), wo_ref[...],
                preferred_element_type=jnp.float32) + bo_ref[...]

    x2 = o + x1_ref[0].astype(jnp.float32)                         # residual with x1
    x2_ref[0] = x2.astype(x2_ref.dtype)

    # GroupNorm(1, C) on x2 (ln2)
    mean = jnp.mean(x2)
    var = jnp.mean(jnp.square(x2 - mean))
    inv = jax.lax.rsqrt(var + eps)
    z_ref[0] = ((x2 - mean) * inv * g2_ref[...] + b2_ref[...]).astype(z_ref.dtype)


def lmhsa_gn2(y_tok, y_pool, x1_tok, kv_w, kv_b, wq, bq, wkv, bkv, wo, bo, g2, b2,
              *, heads, k, eps=1e-5):
    B, Lq, C = y_tok.shape
    Ho, Wo = y_pool.shape[1], y_pool.shape[3]
    Lk = Ho * Wo
    dh = C // heads
    kern = functools.partial(_lmhsa_gn2_kernel, heads=heads, k=k,
                             scale=1.0 / math.sqrt(dh), eps=eps)

    def const(shape):
        return pl.BlockSpec(shape, lambda b: (0,) * len(shape))

    return pl.pallas_call(
        kern,
        out_shape=(jax.ShapeDtypeStruct((B, Lq, C), jnp.bfloat16),
                   jax.ShapeDtypeStruct((B, Lq, C), jnp.bfloat16)),
        grid=(B,),
        in_specs=[
            pl.BlockSpec((1, Lq, C), lambda b: (b, 0, 0)),
            pl.BlockSpec((1, Ho, k, Wo, k * C), lambda b: (b, 0, 0, 0, 0)),
            pl.BlockSpec((1, Lq, C), lambda b: (b, 0, 0)),
            const((k * k, 1, C)), const((1, C)),
            const((C, C)), const((1, C)),
            const((C, 2 * C)), const((1, 2 * C)),
            const((C, C)), const((1, C)),
            const((1, C)), const((1, C)),
        ],
        out_specs=(pl.BlockSpec((1, Lq, C), lambda b: (b, 0, 0)),
                   pl.BlockSpec((1, Lq, C), lambda b: (b, 0, 0))),
        scratch_shapes=[pltpu.VMEM((Lq, C), jnp.float32),
                        pltpu.VMEM((Lk, C), jnp.float32)],
        compiler_params=pltpu.CompilerParams(
            dimension_semantics=("parallel",), vmem_limit_bytes=_VMEM_LIMIT),
    )(y_tok, y_pool, x1_tok,
      kv_w.reshape(k * k, 1, C), kv_b.reshape(1, C),
      wq.astype(jnp.bfloat16), bq.reshape(1, C),
      wkv.astype(jnp.bfloat16), bkv.reshape(1, 2 * C),
      wo.astype(jnp.bfloat16), bo.reshape(1, C),
      g2.reshape(1, C), b2.reshape(1, C))


# --------------- K45: IRFFN conv1 (1x1 + GELU + BN) fused with conv2 (dw3x3 + residual) ---------------

def _irffn12_kernel(z_ref, w1_ref, b1_ref, s1_ref, t1_ref, wdw_ref, bdw_ref,
                    o_ref, pad_ref, *, H, W):
    Cb = pad_ref.shape[-1]

    # conv1: 1x1 (C -> Cb) over H*W token rows, + GELU + folded BatchNorm
    h1 = jnp.dot(z_ref[0], w1_ref[...], preferred_element_type=jnp.float32) + b1_ref[...]
    h1 = _gelu(h1) * s1_ref[...] + t1_ref[...]                     # (H*W, Cb) f32

    # stage h1 into the zero-bordered scratch (h1 never round-trips HBM)
    _zero_pad_border(pad_ref, H, W, Cb)
    for hh in range(H):
        pad_ref[hh + 1, 1:W + 1, :] = h1[hh * W:(hh + 1) * W, :]
    # TODO(synk): tile over H rows (with a 1-row halo) for large feature maps / v7x VMEM.

    # conv2: depthwise 3x3 + bias + residual (h1)
    center = pad_ref[1:H + 1, 1:W + 1, :]                          # == h1, (H, W, Cb)
    acc = center * wdw_ref[4] + bdw_ref[...] + center
    for t in range(9):
        if t == 4:
            continue
        dy, dx = divmod(t, 3)
        acc = acc + pad_ref[dy:dy + H, dx:dx + W, :] * wdw_ref[t]
    o_ref[0] = acc.astype(o_ref.dtype)


def irffn_conv12(z_tok, w1, b1, s1, t1, dw_w, dw_b, *, H, W):
    B, Lq, C = z_tok.shape
    Cb = w1.shape[1]
    kern = functools.partial(_irffn12_kernel, H=H, W=W)
    return pl.pallas_call(
        kern,
        out_shape=jax.ShapeDtypeStruct((B, H, W, Cb), jnp.bfloat16),
        grid=(B,),
        in_specs=[
            pl.BlockSpec((1, Lq, C), lambda b: (b, 0, 0)),
            pl.BlockSpec((C, Cb), lambda b: (0, 0)),
            pl.BlockSpec((1, Cb), lambda b: (0, 0)),
            pl.BlockSpec((1, Cb), lambda b: (0, 0)),
            pl.BlockSpec((1, Cb), lambda b: (0, 0)),
            pl.BlockSpec((9, 1, 1, Cb), lambda b: (0, 0, 0, 0)),
            pl.BlockSpec((1, 1, Cb), lambda b: (0, 0, 0)),
        ],
        out_specs=pl.BlockSpec((1, H, W, Cb), lambda b: (b, 0, 0, 0)),
        scratch_shapes=[pltpu.VMEM((H + 2, W + 2, Cb), jnp.float32)],
        compiler_params=pltpu.CompilerParams(
            dimension_semantics=("parallel",), vmem_limit_bytes=_VMEM_LIMIT),
    )(z_tok, w1.astype(jnp.bfloat16), b1.reshape(1, Cb),
      s1.reshape(1, Cb), t1.reshape(1, Cb),
      dw_w.reshape(9, 1, 1, Cb), dw_b.reshape(1, 1, Cb))


# --------------- K6: IRFFN conv3 (GELU + BN + 1x1 + BN) + final residual, row-tiled ---------------

def _irffn3_kernel(x_ref, s1_ref, t1_ref, w_ref, b_ref, s2_ref, t2_ref, r_ref, o_ref):
    h = _gelu(x_ref[...].astype(jnp.float32)) * s1_ref[...] + t1_ref[...]
    y = jnp.dot(h.astype(jnp.bfloat16), w_ref[...],
                preferred_element_type=jnp.float32) + b_ref[...]
    o_ref[...] = y * s2_ref[...] + t2_ref[...] + r_ref[...].astype(jnp.float32)


def irffn_conv3(h21, s1, t1, w, bias, s2, t2, res):
    M, K = h21.shape
    N = w.shape[1]
    tm = _row_tile(M)
    return pl.pallas_call(
        _irffn3_kernel,
        out_shape=jax.ShapeDtypeStruct((M, N), jnp.float32),
        grid=(pl.cdiv(M, tm),),
        in_specs=[
            pl.BlockSpec((tm, K), lambda i: (i, 0)),
            pl.BlockSpec((1, K), lambda i: (0, 0)),
            pl.BlockSpec((1, K), lambda i: (0, 0)),
            pl.BlockSpec((K, N), lambda i: (0, 0)),
            pl.BlockSpec((1, N), lambda i: (0, 0)),
            pl.BlockSpec((1, N), lambda i: (0, 0)),
            pl.BlockSpec((1, N), lambda i: (0, 0)),
            pl.BlockSpec((tm, N), lambda i: (i, 0)),
        ],
        out_specs=pl.BlockSpec((tm, N), lambda i: (i, 0)),
        compiler_params=pltpu.CompilerParams(
            dimension_semantics=("parallel",), vmem_limit_bytes=_VMEM_LIMIT),
    )(h21, s1.reshape(1, K), t1.reshape(1, K), w.astype(jnp.bfloat16),
      bias.reshape(1, N), s2.reshape(1, N), t2.reshape(1, N), res)


# ------------------------------- full CMTBlock forward -------------------------------

def cmt_block_forward(x_nchw, p, *, heads, k, b_expand):
    x = jnp.transpose(x_nchw, (0, 2, 3, 1)).astype(jnp.float32)    # NHWC
    B, H, W, C = x.shape
    assert C % heads == 0 and H % k == 0 and W % k == 0
    Ho, Wo = H // k, W // k
    Lq = H * W
    Cb = C * b_expand

    # --- K1: LocalPerceptionUnit + residual + GroupNorm(1,C); bf16 outputs ---
    x1_img, y_img = lpu_gn1(x, p["lpu_w"], p["lpu_b"], p["ln1_g"], p["ln1_b"])

    # free host reshapes (row-major compatible, no copies)
    y_tok = y_img.reshape(B, Lq, C)
    y_pool = y_img.reshape(B, Ho, k, Wo, k * C)                    # pooling view of y
    x1_tok = x1_img.reshape(B, Lq, C)

    # --- K3: LMHSA (pooling + QKV + attention + Wo) + residual + GroupNorm(1,C) ---
    wkv = jnp.concatenate([p["wk"], p["wv"]], axis=1)              # (C, 2C)
    bkv = jnp.concatenate([p["bk"], p["bv"]], axis=0)              # (2C,)
    x2, z = lmhsa_gn2(y_tok, y_pool, x1_tok, p["kv_w"], p["kv_b"],
                      p["wq"], p["bq"], wkv, bkv, p["wo"], p["bo"],
                      p["ln2_g"], p["ln2_b"], heads=heads, k=k)

    # --- K45: IRFFN conv1 + conv2 (+internal residual), h1 stays in VMEM ---
    s1, t1 = _bn_affine(p["bn1_g"], p["bn1_b"], p["bn1_m"], p["bn1_v"])
    h21 = irffn_conv12(z, p["w1"], p["b1"], s1, t1, p["dw2_w"], p["dw2_b"], H=H, W=W)

    # --- K6: IRFFN conv3 + final block residual (x2) ---
    s3a, t3a = _bn_affine(p["bn3a_g"], p["bn3a_b"], p["bn3a_m"], p["bn3a_v"])
    s3b, t3b = _bn_affine(p["bn3b_g"], p["bn3b_b"], p["bn3b_m"], p["bn3b_v"])
    x3 = irffn_conv3(h21.reshape(B * Lq, Cb), s3a, t3a,
                     p["w3"], p["b3"], s3b, t3b,
                     x2.reshape(B * Lq, C))
    return jnp.transpose(x3.reshape(B, H, W, C), (0, 3, 1, 2))     # back to NCHW, f32


# ------------------------------- deterministic param init -------------------------------

def init_params(key, dim, heads, k, b_expand):
    assert dim % heads == 0
    Cb = dim * b_expand
    keys = iter(jax.random.split(key, 64))

    def nrm(shape, scale=0.1):
        return scale * jax.random.normal(next(keys), shape, dtype=jnp.float32)

    def pos(shape):
        return 1.0 + 0.1 * jnp.abs(jax.random.normal(next(keys), shape, dtype=jnp.float32))

    return {
        "lpu_w": nrm((3, 3, dim)), "lpu_b": nrm((dim,)),
        "ln1_g": 1.0 + nrm((dim,)), "ln1_b": nrm((dim,)),
        "kv_w": nrm((k, k, dim)), "kv_b": nrm((dim,)),
        "wq": nrm((dim, dim)), "bq": nrm((dim,)),
        "wk": nrm((dim, dim)), "bk": nrm((dim,)),
        "wv": nrm((dim, dim)), "bv": nrm((dim,)),
        "wo": nrm((dim, dim)), "bo": nrm((dim,)),
        "ln2_g": 1.0 + nrm((dim,)), "ln2_b": nrm((dim,)),
        "w1": nrm((dim, Cb)), "b1": nrm((Cb,)),
        "bn1_g": 1.0 + nrm((Cb,)), "bn1_b": nrm((Cb,)),
        "bn1_m": nrm((Cb,)), "bn1_v": pos((Cb,)),
        "dw2_w": nrm((3, 3, Cb)), "dw2_b": nrm((Cb,)),
        "bn3a_g": 1.0 + nrm((Cb,)), "bn3a_b": nrm((Cb,)),
        "bn3a_m": nrm((Cb,)), "bn3a_v": pos((Cb,)),
        "w3": nrm((Cb, dim)), "b3": nrm((dim,)),
        "bn3b_g": 1.0 + nrm((dim,)), "bn3b_b": nrm((dim,)),
        "bn3b_m": nrm((dim,)), "bn3b_v": pos((dim,)),
    }


if __name__ == "__main__":
    dim, heads, k, b_expand = 32, 4, 2, 2
    B, H, W = 2, 8, 8

    root = jax.random.PRNGKey(0)
    kx, kp = jax.random.split(root)
    x = jax.random.normal(kx, (B, dim, H, W), dtype=jnp.float32)   # NCHW, like PyTorch
    params = init_params(kp, dim, heads, k, b_expand)

    fwd = jax.jit(functools.partial(cmt_block_forward, heads=heads, k=k, b_expand=b_expand))
    out = fwd(x, params)
    out = jax.block_until_ready(out)

    assert out.shape == (B, dim, H, W), out.shape
    assert bool(jnp.all(jnp.isfinite(out)))
    print("KERNEL_OK")
</pallas_src>

<mosaic_0001>
module attributes {stable_mosaic.version = 11 : i64} {
  func.func @_lpu_gn1_kernel(%arg0: i32, %arg1: memref<1x8x8x32xf32, #tpu.memory_space<vmem>>, %arg2: memref<9x1x1x32xf32, #tpu.memory_space<vmem>>, %arg3: memref<1x1x32xf32, #tpu.memory_space<vmem>>, %arg4: memref<1x1x32xf32, #tpu.memory_space<vmem>>, %arg5: memref<1x1x32xf32, #tpu.memory_space<vmem>>, %arg6: memref<1x8x8x32xbf16, #tpu.memory_space<vmem>>, %arg7: memref<1x8x8x32xbf16, #tpu.memory_space<vmem>>, %arg8: memref<10x10x32xf32, #tpu.memory_space<vmem>>) attributes {dimension_semantics = [#tpu.dimension_semantics<parallel>], iteration_bounds = array<i64: 2>, scalar_prefetch = 0 : i64, scratch_operands = 1 : i64, tpu.core_type = #tpu.core_type<tc>, window_params = [{transform_indices = @transform_0, window_bounds = array<i64: 1, 8, 8, 32>}, {pipeline_mode = #tpu.pipeline_mode<synchronous>, transform_indices = @transform_1, window_bounds = array<i64: 9, 1, 1, 32>}, {pipeline_mode = #tpu.pipeline_mode<synchronous>, transform_indices = @transform_2, window_bounds = array<i64: 1, 1, 32>}, {pipeline_mode = #tpu.pipeline_mode<synchronous>, transform_indices = @transform_3, window_bounds = array<i64: 1, 1, 32>}, {pipeline_mode = #tpu.pipeline_mode<synchronous>, transform_indices = @transform_4, window_bounds = array<i64: 1, 1, 32>}, {transform_indices = @transform_5, window_bounds = array<i64: 1, 8, 8, 32>}, {transform_indices = @transform_6, window_bounds = array<i64: 1, 8, 8, 32>}]} {
    %c0 = arith.constant 0 : index
    %c0_0 = arith.constant 0 : index
    %c0_1 = arith.constant 0 : index
    %c0_2 = arith.constant 0 : index
    %0 = vector.load %arg1[%c0, %c0_0, %c0_1, %c0_2] : memref<1x8x8x32xf32, #tpu.memory_space<vmem>>, vector<1x8x8x32xf32>
    %1 = vector.shape_cast %0 : vector<1x8x8x32xf32> to vector<8x8x32xf32>
    %cst = arith.constant 0.000000e+00 : f32
    %2 = vector.broadcast %cst : f32 to vector<1x10x32xf32>
    %c0_3 = arith.constant 0 : index
    %c0_4 = arith.constant 0 : index
    %c0_5 = arith.constant 0 : index
    %3 = vector.load %arg8[%c0_3, %c0_4, %c0_5] : memref<10x10x32xf32, #tpu.memory_space<vmem>>, vector<1x10x32xf32>
    tpu.vector_store %arg8[%c0_3, %c0_4, %c0_5], %2 {strides = array<i32>} : memref<10x10x32xf32, #tpu.memory_space<vmem>>, vector<1x10x32xf32>,
    %c9 = arith.constant 9 : index
    %c0_6 = arith.constant 0 : index
    %c0_7 = arith.constant 0 : index
    %4 = vector.load %arg8[%c9, %c0_6, %c0_7] : memref<10x10x32xf32, #tpu.memory_space<vmem>>, vector<1x10x32xf32>
    tpu.vector_store %arg8[%c9, %c0_6, %c0_7], %2 {strides = array<i32>} : memref<10x10x32xf32, #tpu.memory_space<vmem>>, vector<1x10x32xf32>,
    %cst_8 = arith.constant 0.000000e+00 : f32
    %5 = vector.broadcast %cst_8 : f32 to vector<8x1x32xf32>
    %c1 = arith.constant 1 : index
    %c0_9 = arith.constant 0 : index
    %c0_10 = arith.constant 0 : index
    %6 = vector.load %arg8[%c1, %c0_9, %c0_10] : memref<10x10x32xf32, #tpu.memory_space<vmem>>, vector<8x1x32xf32>
    tpu.vector_store %arg8[%c1, %c0_9, %c0_10], %5 {strides = array<i32>} : memref<10x10x32xf32, #tpu.memory_space<vmem>>, vector<8x1x32xf32>,
    %c1_11 = arith.constant 1 : index
    %c9_12 = arith.constant 9 : index
    %c0_13 = arith.constant 0 : index
    %7 = vector.load %arg8[%c1_11, %c9_12, %c0_13] : memref<10x10x32xf32, #tpu.memory_space<vmem>>, vector<8x1x32xf32>
    tpu.vector_store %arg8[%c1_11, %c9_12, %c0_13], %5 {strides = array<i32>} : memref<10x10x32xf32, #tpu.memory_space<vmem>>, vector<8x1x32xf32>,
    %c1_14 = arith.constant 1 : index
    %c1_15 = arith.constant 1 : index
    %c0_16 = arith.constant 0 : index
    %8 = vector.load %arg8[%c1_14, %c1_15, %c0_16] : memref<10x10x32xf32, #tpu.memory_space<vmem>>, vector<8x8x32xf32>
    tpu.vector_store %arg8[%c1_14, %c1_15, %c0_16], %1 {strides = array<i32>} : memref<10x10x32xf32, #tpu.memory_space<vmem>>, vector<8x8x32xf32>,
    %c4 = arith.constant 4 : index
    %c0_17 = arith.constant 0 : index
    %c0_18 = arith.constant 0 : index
    %c0_19 = arith.constant 0 : index
    %9 = vector.load %arg2[%c4, %c0_17, %c0_18, %c0_19] : memref<9x1x1x32xf32, #tpu.memory_space<vmem>>, vector<1x1x1x32xf32>
    %10 = vector.shape_cast %9 : vector<1x1x1x32xf32> to vector<1x1x32xf32>
    %11 = vector.broadcast %10 : vector<1x1x32xf32> to vector<8x8x32xf32>
    %12 = arith.mulf %1, %11 : vector<8x8x32xf32>
    %c0_20 = arith.constant 0 : index
    %c0_21 = arith.constant 0 : index
    %c0_22 = arith.constant 0 : index
    %13 = vector.load %arg3[%c0_20, %c0_21, %c0_22] : memref<1x1x32xf32, #tpu.memory_space<vmem>>, vector<1x1x32xf32>
    %14 = vector.broadcast %13 : vector<1x1x32xf32> to vector<8x8x32xf32>
    %15 = arith.addf %12, %14 : vector<8x8x32xf32>
    %c0_23 = arith.constant 0 : index
    %c0_24 = arith.constant 0 : index
    %c0_25 = arith.constant 0 : index
    %16 = vector.load %arg8[%c0_23, %c0_24, %c0_25] : memref<10x10x32xf32, #tpu.memory_space<vmem>>, vector<8x8x32xf32>
    %c0_26 = arith.constant 0 : index
    %c0_27 = arith.constant 0 : index
    %c0_28 = arith.constant 0 : index
    %c0_29 = arith.constant 0 : index
    %17 = vector.load %arg2[%c0_26, %c0_27, %c0_28, %c0_29] : memref<9x1x1x32xf32, #tpu.memory_space<vmem>>, vector<1x1x1x32xf32>
    %18 = vector.shape_cast %17 : vector<1x1x1x32xf32> to vector<1x1x32xf32>
    %19 = vector.broadcast %18 : vector<1x1x32xf32> to vector<8x8x32xf32>
    %20 = arith.mulf %16, %19 : vector<8x8x32xf32>
    %21 = arith.addf %15, %20 : vector<8x8x32xf32>
    %c0_30 = arith.constant 0 : index
    %c1_31 = arith.constant 1 : index
    %c0_32 = arith.constant 0 : index
    %22 = vector.load %arg8[%c0_30, %c1_31, %c0_32] : memref<10x10x32xf32, #tpu.memory_space<vmem>>, vector<8x8x32xf32>
    %c1_33 = arith.constant 1 : index
    %c0_34 = arith.constant 0 : index
    %c0_35 = arith.constant 0 : index
    %c0_36 = arith.constant 0 : index
    %23 = vector.load %arg2[%c1_33, %c0_34, %c0_35, %c0_36] : memref<9x1x1x32xf32, #tpu.memory_space<vmem>>, vector<1x1x1x32xf32>
    %24 = vector.shape_cast %23 : vector<1x1x1x32xf32> to vector<1x1x32xf32>
    %25 = vector.broadcast %24 : vector<1x1x32xf32> to vector<8x8x32xf32>
    %26 = arith.mulf %22, %25 : vector<8x8x32xf32>
    %27 = arith.addf %21, %26 : vector<8x8x32xf32>
    %c0_37 = arith.constant 0 : index
    %c2 = arith.constant 2 : index
    %c0_38 = arith.constant 0 : index
    %28 = vector.load %arg8[%c0_37, %c2, %c0_38] : memref<10x10x32xf32, #tpu.memory_space<vmem>>, vector<8x8x32xf32>
    %c2_39 = arith.constant 2 : index
    %c0_40 = arith.constant 0 : index
    %c0_41 = arith.constant 0 : index
    %c0_42 = arith.constant 0 : index
    %29 = vector.load %arg2[%c2_39, %c0_40, %c0_41, %c0_42] : memref<9x1x1x32xf32, #tpu.memory_space<vmem>>, vector<1x1x1x32xf32>
    %30 = vector.shape_cast %29 : vector<1x1x1x32xf32> to vector<1x1x32xf32>
    %31 = vector.broadcast %30 : vector<1x1x32xf32> to vector<8x8x32xf32>
    %32 = arith.mulf %28, %31 : vector<8x8x32xf32>
    %33 = arith.addf %27, %32 : vector<8x8x32xf32>
    %c1_43 = arith.constant 1 : index
    %c0_44 = arith.constant 0 : index
    %c0_45 = arith.constant 0 : index
    %34 = vector.load %arg8[%c1_43, %c0_44, %c0_45] : memref<10x10x32xf32, #tpu.memory_space<vmem>>, vector<8x8x32xf32>
    %c3 = arith.constant 3 : index
    %c0_46 = arith.constant 0 : index
    %c0_47 = arith.constant 0 : index
    %c0_48 = arith.constant 0 : index
    %35 = vector.load %arg2[%c3, %c0_46, %c0_47, %c0_48] : memref<9x1x1x32xf32, #tpu.memory_space<vmem>>, vector<1x1x1x32xf32>
    %36 = vector.shape_cast %35 : vector<1x1x1x32xf32> to vector<1x1x32xf32>
    %37 = vector.broadcast %36 : vector<1x1x32xf32> to vector<8x8x32xf32>
    %38 = arith.mulf %34, %37 : vector<8x8x32xf32>
    %39 = arith.addf %33, %38 : vector<8x8x32xf32>
    %c1_49 = arith.constant 1 : index
    %c2_50 = arith.constant 2 : index
    %c0_51 = arith.constant 0 : index
    %40 = vector.load %arg8[%c1_49, %c2_50, %c0_51] : memref<10x10x32xf32, #tpu.memory_space<vmem>>, vector<8x8x32xf32>
    %c5 = arith.constant 5 : index
    %c0_52 = arith.constant 0 : index
    %c0_53 = arith.constant 0 : index
    %c0_54 = arith.constant 0 : index
    %41 = vector.load %arg2[%c5, %c0_52, %c0_53, %c0_54] : memref<9x1x1x32xf32, #tpu.memory_space<vmem>>, vector<1x1x1x32xf32>
    %42 = vector.shape_cast %41 : vector<1x1x1x32xf32> to vector<1x1x32xf32>
    %43 = vector.broadcast %42 : vector<1x1x32xf32> to vector<8x8x32xf32>
    %44 = arith.mulf %40, %43 : vector<8x8x32xf32>
    %45 = arith.addf %39, %44 : vector<8x8x32xf32>
    %c2_55 = arith.constant 2 : index
    %c0_56 = arith.constant 0 : index
    %c0_57 = arith.constant 0 : index
    %46 = vector.load %arg8[%c2_55, %c0_56, %c0_57] : memref<10x10x32xf32, #tpu.memory_space<vmem>>, vector<8x8x32xf32>
    %c6 = arith.constant 6 : index
    %c0_58 = arith.constant 0 : index
    %c0_59 = arith.constant 0 : index
    %c0_60 = arith.constant 0 : index
    %47 = vector.load %arg2[%c6, %c0_58, %c0_59, %c0_60] : memref<9x1x1x32xf32, #tpu.memory_space<vmem>>, vector<1x1x1x32xf32>
    %48 = vector.shape_cast %47 : vector<1x1x1x32xf32> to vector<1x1x32xf32>
    %49 = vector.broadcast %48 : vector<1x1x32xf32> to vector<8x8x32xf32>
    %50 = arith.mulf %46, %49 : vector<8x8x32xf32>
    %51 = arith.addf %45, %50 : vector<8x8x32xf32>
    %c2_61 = arith.constant 2 : index
    %c1_62 = arith.constant 1 : index
    %c0_63 = arith.constant 0 : index
    %52 = vector.load %arg8[%c2_61, %c1_62, %c0_63] : memref<10x10x32xf32, #tpu.memory_space<vmem>>, vector<8x8x32xf32>
    %c7 = arith.constant 7 : index
    %c0_64 = arith.constant 0 : index
    %c0_65 = arith.constant 0 : index
    %c0_66 = arith.constant 0 : index
    %53 = vector.load %arg2[%c7, %c0_64, %c0_65, %c0_66] : memref<9x1x1x32xf32, #tpu.memory_space<vmem>>, vector<1x1x1x32xf32>
    %54 = vector.shape_cast %53 : vector<1x1x1x32xf32> to vector<1x1x32xf32>
    %55 = vector.broadcast %54 : vector<1x1x32xf32> to vector<8x8x32xf32>
    %56 = arith.mulf %52, %55 : vector<8x8x32xf32>
    %57 = arith.addf %51, %56 : vector<8x8x32xf32>
    %c2_67 = arith.constant 2 : index
    %c2_68 = arith.constant 2 : index
    %c0_69 = arith.constant 0 : index
    %58 = vector.load %arg8[%c2_67, %c2_68, %c0_69] : memref<10x10x32xf32, #tpu.memory_space<vmem>>, vector<8x8x32xf32>
    %c8 = arith.constant 8 : index
    %c0_70 = arith.constant 0 : index
    %c0_71 = arith.constant 0 : index
    %c0_72 = arith.constant 0 : index
    %59 = vector.load %arg2[%c8, %c0_70, %c0_71, %c0_72] : memref<9x1x1x32xf32, #tpu.memory_space<vmem>>, vector<1x1x1x32xf32>
    %60 = vector.shape_cast %59 : vector<1x1x1x32xf32> to vector<1x1x32xf32>
    %61 = vector.broadcast %60 : vector<1x1x32xf32> to vector<8x8x32xf32>
    %62 = arith.mulf %58, %61 : vector<8x8x32xf32>
    %63 = arith.addf %57, %62 : vector<8x8x32xf32>
    %64 = arith.addf %63, %1 : vector<8x8x32xf32>
    %65 = arith.truncf %64 : vector<8x8x32xf32> to vector<8x8x32xbf16>
    %c0_73 = arith.constant 0 : index
    %c0_74 = arith.constant 0 : index
    %c0_75 = arith.constant 0 : index
    %c0_76 = arith.constant 0 : index
    %66 = vector.load %arg6[%c0_73, %c0_74, %c0_75, %c0_76] : memref<1x8x8x32xbf16, #tpu.memory_space<vmem>>, vector<1x8x8x32xbf16>
    %67 = vector.shape_cast %66 : vector<1x8x8x32xbf16> to vector<8x8x32xbf16>
    %68 = vector.shape_cast %65 : vector<8x8x32xbf16> to vector<1x8x8x32xbf16>
    tpu.vector_store %arg6[%c0_73, %c0_74, %c0_75, %c0_76], %68 {strides = array<i32>} : memref<1x8x8x32xbf16, #tpu.memory_space<vmem>>, vector<1x8x8x32xbf16>,
    %69 = vector.shape_cast %64 : vector<8x8x32xf32> to vector<1x8x8x32xf32>
    %cst_77 = arith.constant dense<0.000000e+00> : vector<1xf32>
    %70 = vector.multi_reduction <add>, %69, %cst_77 [1, 2, 3] : vector<1x8x8x32xf32> to vector<1xf32>
    %71 = vector.shape_cast %70 : vector<1xf32> to vector<1x1x1x1xf32>
    %72 = vector.extract %71[0, 0, 0, 0] : f32 from vector<1x1x1x1xf32>
    %cst_78 = arith.constant 2.048000e+03 : f32
    %73 = arith.divf %72, %cst_78 : f32
    %74 = vector.broadcast %73 : f32 to vector<8x8x32xf32>
    %75 = arith.subf %64, %74 : vector<8x8x32xf32>
    %76 = arith.mulf %75, %75 : vector<8x8x32xf32>
    %77 = vector.shape_cast %76 : vector<8x8x32xf32> to vector<1x8x8x32xf32>
    %cst_79 = arith.constant dense<0.000000e+00> : vector<1xf32>
    %78 = vector.multi_reduction <add>, %77, %cst_79 [1, 2, 3] : vector<1x8x8x32xf32> to vector<1xf32>
    %79 = vector.shape_cast %78 : vector<1xf32> to vector<1x1x1x1xf32>
    %80 = vector.extract %79[0, 0, 0, 0] : f32 from vector<1x1x1x1xf32>
    %cst_80 = arith.constant 2.048000e+03 : f32
    %81 = arith.divf %80, %cst_80 : f32
    %cst_81 = arith.constant 9.99999974E-6 : f32
    %82 = arith.addf %81, %cst_81 : f32
    %83 = math.rsqrt %82 : f32
    %84 = vector.broadcast %73 : f32 to vector<8x8x32xf32>
    %85 = arith.subf %64, %84 : vector<8x8x32xf32>
    %86 = vector.broadcast %83 : f32 to vector<8x8x32xf32>
    %87 = arith.mulf %85, %86 : vector<8x8x32xf32>
    %c0_82 = arith.constant 0 : index
    %c0_83 = arith.constant 0 : index
    %c0_84 = arith.constant 0 : index
    %88 = vector.load %arg4[%c0_82, %c0_83, %c0_84] : memref<1x1x32xf32, #tpu.memory_space<vmem>>, vector<1x1x32xf32>
    %89 = vector.broadcast %88 : vector<1x1x32xf32> to vector<8x8x32xf32>
    %90 = arith.mulf %87, %89 : vector<8x8x32xf32>
    %c0_85 = arith.constant 0 : index
    %c0_86 = arith.constant 0 : index
    %c0_87 = arith.constant 0 : index
    %91 = vector.load %arg5[%c0_85, %c0_86, %c0_87] : memref<1x1x32xf32, #tpu.memory_space<vmem>>, vector<1x1x32xf32>
    %92 = vector.broadcast %91 : vector<1x1x32xf32> to vector<8x8x32xf32>
    %93 = arith.addf %90, %92 : vector<8x8x32xf32>
    %94 = arith.truncf %93 : vector<8x8x32xf32> to vector<8x8x32xbf16>
    %c0_88 = arith.constant 0 : index
    %c0_89 = arith.constant 0 : index
    %c0_90 = arith.constant 0 : index
    %c0_91 = arith.constant 0 : index
    %95 = vector.load %arg7[%c0_88, %c0_89, %c0_90, %c0_91] : memref<1x8x8x32xbf16, #tpu.memory_space<vmem>>, vector<1x8x8x32xbf16>
    %96 = vector.shape_cast %95 : vector<1x8x8x32xbf16> to vector<8x8x32xbf16>
    %97 = vector.shape_cast %94 : vector<8x8x32xbf16> to vector<1x8x8x32xbf16>
    tpu.vector_store %arg7[%c0_88, %c0_89, %c0_90, %c0_91], %97 {strides = array<i32>} : memref<1x8x8x32xbf16, #tpu.memory_space<vmem>>, vector<1x8x8x32xbf16>,
    return
  }
  func.func @transform_0(%arg0: i32) -> (i32, i32, i32, i32) {
    %c0_i32 = arith.constant 0 : i32
    %c0_i32_0 = arith.constant 0 : i32
    %c0_i32_1 = arith.constant 0 : i32
    %c0_i32_2 = arith.constant 0 : i32
    return %arg0, %c0_i32, %c0_i32_0, %c0_i32_1 : i32, i32, i32, i32
  }
  func.func @transform_1(%arg0: i32) -> (i32, i32, i32, i32) {
    %c0_i32 = arith.constant 0 : i32
    %c0_i32_0 = arith.constant 0 : i32
    %c0_i32_1 = arith.constant 0 : i32
    %c0_i32_2 = arith.constant 0 : i32
    %c0_i32_3 = arith.constant 0 : i32
    return %c0_i32, %c0_i32_0, %c0_i32_1, %c0_i32_2 : i32, i32, i32, i32
  }
  func.func @transform_2(%arg0: i32) -> (i32, i32, i32) {
    %c0_i32 = arith.constant 0 : i32
    %c0_i32_0 = arith.constant 0 : i32
    %c0_i32_1 = arith.constant 0 : i32
    %c0_i32_2 = arith.constant 0 : i32
    return %c0_i32, %c0_i32_0, %c0_i32_1 : i32, i32, i32
  }
  func.func @transform_3(%arg0: i32) -> (i32, i32, i32) {
    %c0_i32 = arith.constant 0 : i32
    %c0_i32_0 = arith.constant 0 : i32
    %c0_i32_1 = arith.constant 0 : i32
    %c0_i32_2 = arith.constant 0 : i32
    return %c0_i32, %c0_i32_0, %c0_i32_1 : i32, i32, i32
  }
  func.func @transform_4(%arg0: i32) -> (i32, i32, i32) {
    %c0_i32 = arith.constant 0 : i32
    %c0_i32_0 = arith.constant 0 : i32
    %c0_i32_1 = arith.constant 0 : i32
    %c0_i32_2 = arith.constant 0 : i32
    return %c0_i32, %c0_i32_0, %c0_i32_1 : i32, i32, i32
  }
  func.func @transform_5(%arg0: i32) -> (i32, i32, i32, i32) {
    %c0_i32 = arith.constant 0 : i32
    %c0_i32_0 = arith.constant 0 : i32
    %c0_i32_1 = arith.constant 0 : i32
    %c0_i32_2 = arith.constant 0 : i32
    return %arg0, %c0_i32, %c0_i32_0, %c0_i32_1 : i32, i32, i32, i32
  }
  func.func @transform_6(%arg0: i32) -> (i32, i32, i32, i32) {
    %c0_i32 = arith.constant 0 : i32
    %c0_i32_0 = arith.constant 0 : i32
    %c0_i32_1 = arith.constant 0 : i32
    %c0_i32_2 = arith.constant 0 : i32
    return %arg0, %c0_i32, %c0_i32_0, %c0_i32_1 : i32, i32, i32, i32
  }
}

module attributes {stable_mosaic.version = 11 : i64} {
  func.func @_lmhsa_gn2_kernel(%arg0: i32, %arg1: memref<1x64x32xbf16, #tpu.memory_space<vmem>>, %arg2: memref<1x4x2x4x64xbf16, #tpu.memory_space<vmem>>, %arg3: memref<1x64x32xbf16, #tpu.memory_space<vmem>>, %arg4: memref<4x1x32xf32, #tpu.memory_space<vmem>>, %arg5: memref<1x32xf32, #tpu.memory_space<vmem>>, %arg6: memref<32x32xbf16, #tpu.memory_space<vmem>>, %arg7: memref<1x32xf32, #tpu.memory_space<vmem>>, %arg8: memref<32x64xbf16, #tpu.memory_space<vmem>>, %arg9: memref<1x64xf32, #tpu.memory_space<vmem>>, %arg10: memref<32x32xbf16, #tpu.memory_space<vmem>>, %arg11: memref<1x32xf32, #tpu.memory_space<vmem>>, %arg12: memref<1x32xf32, #tpu.memory_space<vmem>>, %arg13: memref<1x32xf32, #tpu.memory_space<vmem>>, %arg14: memref<1x64x32xbf16, #tpu.memory_space<vmem>>, %arg15: memref<1x64x32xbf16, #tpu.memory_space<vmem>>, %arg16: memref<64x32xf32, #tpu.memory_space<vmem>>, %arg17: memref<16x32xf32, #tpu.memory_space<vmem>>) attributes {dimension_semantics = [#tpu.dimension_semantics<parallel>], iteration_bounds = array<i64: 2>, scalar_prefetch = 0 : i64, scratch_operands = 2 : i64, tpu.core_type = #tpu.core_type<tc>, window_params = [{transform_indices = @transform_0, window_bounds = array<i64: 1, 64, 32>}, {transform_indices = @transform_1, window_bounds = array<i64: 1, 4, 2, 4, 64>}, {transform_indices = @transform_2, window_bounds = array<i64: 1, 64, 32>}, {pipeline_mode = #tpu.pipeline_mode<synchronous>, transform_indices = @transform_3, window_bounds = array<i64: 4, 1, 32>}, {pipeline_mode = #tpu.pipeline_mode<synchronous>, transform_indices = @transform_4, window_bounds = array<i64: 1, 32>}, {pipeline_mode = #tpu.pipeline_mode<synchronous>, transform_indices = @transform_5, window_bounds = array<i64: 32, 32>}, {pipeline_mode = #tpu.pipeline_mode<synchronous>, transform_indices = @transform_6, window_bounds = array<i64: 1, 32>}, {pipeline_mode = #tpu.pipeline_mode<synchronous>, transform_indices = @transform_7, window_bounds = array<i64: 32, 64>}, {pipeline_mode = #tpu.pipeline_mode<synchronous>, transform_indices = @transform_8, window_bounds = array<i64: 1, 64>}, {pipeline_mode = #tpu.pipeline_mode<synchronous>, transform_indices = @transform_9, window_bounds = array<i64: 32, 32>}, {pipeline_mode = #tpu.pipeline_mode<synchronous>, transform_indices = @transform_10, window_bounds = array<i64: 1, 32>}, {pipeline_mode = #tpu.pipeline_mode<synchronous>, transform_indices = @transform_11, window_bounds = array<i64: 1, 32>}, {pipeline_mode = #tpu.pipeline_mode<synchronous>, transform_indices = @transform_12, window_bounds = array<i64: 1, 32>}, {transform_indices = @transform_13, window_bounds = array<i64: 1, 64, 32>}, {transform_indices = @transform_14, window_bounds = array<i64: 1, 64, 32>}]} {
    %cst = arith.constant 0.000000e+00 : f32
    %0 = vector.broadcast %cst : f32 to vector<4x4x32xf32>
    %c0 = arith.constant 0 : index
    %c0_0 = arith.constant 0 : index
    %c0_1 = arith.constant 0 : index
    %c0_2 = arith.constant 0 : index
    %c0_3 = arith.constant 0 : index
    %1 = vector.load %arg2[%c0, %c0_0, %c0_1, %c0_2, %c0_3] : memref<1x4x2x4x64xbf16, #tpu.memory_space<vmem>>, vector<1x4x1x4x64xbf16>
    %2 = vector.shape_cast %1 : vector<1x4x1x4x64xbf16> to vector<4x4x64xbf16>
    %3 = arith.extf %2 : vector<4x4x64xbf16> to vector<4x4x64xf32>
    %4 = vector.extract_strided_slice %3 {offsets = [0, 0, 0], sizes = [4, 4, 32], strides = [1, 1, 1]} : vector<4x4x64xf32> to vector<4x4x32xf32>
    %c0_4 = arith.constant 0 : index
    %c0_5 = arith.constant 0 : index
    %c0_6 = arith.constant 0 : index
    %5 = vector.load %arg4[%c0_4, %c0_5, %c0_6] : memref<4x1x32xf32, #tpu.memory_space<vmem>>, vector<1x1x32xf32>
    %6 = vector.shape_cast %5 : vector<1x1x32xf32> to vector<1x32xf32>
    %7 = vector.shape_cast %6 : vector<1x32xf32> to vector<1x1x32xf32>
    %8 = vector.broadcast %7 : vector<1x1x32xf32> to vector<4x4x32xf32>
    %9 = arith.mulf %4, %8 : vector<4x4x32xf32>
    %10 = arith.addf %0, %9 : vector<4x4x32xf32>
    %11 = vector.extract_strided_slice %3 {offsets = [0, 0, 32], sizes = [4, 4, 32], strides = [1, 1, 1]} : vector<4x4x64xf32> to vector<4x4x32xf32>
    %c1 = arith.constant 1 : index
    %c0_7 = arith.constant 0 : index
    %c0_8 = arith.constant 0 : index
    %12 = vector.load %arg4[%c1, %c0_7, %c0_8] : memref<4x1x32xf32, #tpu.memory_space<vmem>>, vector<1x1x32xf32>
    %13 = vector.shape_cast %12 : vector<1x1x32xf32> to vector<1x32xf32>
    %14 = vector.shape_cast %13 : vector<1x32xf32> to vector<1x1x32xf32>
    %15 = vector.broadcast %14 : vector<1x1x32xf32> to vector<4x4x32xf32>
    %16 = arith.mulf %11, %15 : vector<4x4x32xf32>
    %17 = arith.addf %10, %16 : vector<4x4x32xf32>
    %c0_9 = arith.constant 0 : index
    %c0_10 = arith.constant 0 : index
    %c1_11 = arith.constant 1 : index
    %c0_12 = arith.constant 0 : index
    %c0_13 = arith.constant 0 : index
    %18 = vector.load %arg2[%c0_9, %c0_10, %c1_11, %c0_12, %c0_13] : memref<1x4x2x4x64xbf16, #tpu.memory_space<vmem>>, vector<1x4x1x4x64xbf16>
    %19 = vector.shape_cast %18 : vector<1x4x1x4x64xbf16> to vector<4x4x64xbf16>
    %20 = arith.extf %19 : vector<4x4x64xbf16> to vector<4x4x64xf32>
    %21 = vector.extract_strided_slice %20 {offsets = [0, 0, 0], sizes = [4, 4, 32], strides = [1, 1, 1]} : vector<4x4x64xf32> to vector<4x4x32xf32>
    %c2 = arith.constant 2 : index
    %c0_14 = arith.constant 0 : index
    %c0_15 = arith.constant 0 : index
    %22 = vector.load %arg4[%c2, %c0_14, %c0_15] : memref<4x1x32xf32, #tpu.memory_space<vmem>>, vector<1x1x32xf32>
    %23 = vector.shape_cast %22 : vector<1x1x32xf32> to vector<1x32xf32>
    %24 = vector.shape_cast %23 : vector<1x32xf32> to vector<1x1x32xf32>
    %25 = vector.broadcast %24 : vector<1x1x32xf32> to vector<4x4x32xf32>
    %26 = arith.mulf %21, %25 : vector<4x4x32xf32>
    %27 = arith.addf %17, %26 : vector<4x4x32xf32>
    %28 = vector.extract_strided_slice %20 {offsets = [0, 0, 32], sizes = [4, 4, 32], strides = [1, 1, 1]} : vector<4x4x64xf32> to vector<4x4x32xf32>
    %c3 = arith.constant 3 : index
    %c0_16 = arith.constant 0 : index
    %c0_17 = arith.constant 0 : index
    %29 = vector.load %arg4[%c3, %c0_16, %c0_17] : memref<4x1x32xf32, #tpu.memory_space<vmem>>, vector<1x1x32xf32>
    %30 = vector.shape_cast %29 : vector<1x1x32xf32> to vector<1x32xf32>
    %31 = vector.shape_cast %30 : vector<1x32xf32> to vector<1x1x32xf32>
    %32 = vector.broadcast %31 : vector<1x1x32xf32> to vector<4x4x32xf32>
    %33 = arith.mulf %28, %32 : vector<4x4x32xf32>
    %34 = arith.addf %27, %33 : vector<4x4x32xf32>
    %35 = vector.extract_strided_slice %34 {offsets = [0, 0, 0], sizes = [1, 4, 32], strides = [1, 1, 1]} : vector<4x4x32xf32> to vector<1x4x32xf32>
    %36 = vector.shape_cast %35 : vector<1x4x32xf32> to vector<4x32xf32>
    %c0_18 = arith.constant 0 : index
    %c0_19 = arith.constant 0 : index
    %37 = vector.load %arg5[%c0_18, %c0_19] : memref<1x32xf32, #tpu.memory_space<vmem>>, vector<1x32xf32>
    %38 = vector.broadcast %37 : vector<1x32xf32> to vector<4x32xf32>
    %39 = arith.addf %36, %38 : vector<4x32xf32>
    %c0_20 = arith.constant 0 : index
    %c0_21 = arith.constant 0 : index
    %40 = vector.load %arg17[%c0_20, %c0_21] : memref<16x32xf32, #tpu.memory_space<vmem>>, vector<4x32xf32>
    tpu.vector_store %arg17[%c0_20, %c0_21], %39 {strides = array<i32>} : memref<16x32xf32, #tpu.memory_space<vmem>>, vector<4x32xf32>,
    %41 = vector.extract_strided_slice %34 {offsets = [1, 0, 0], sizes = [1, 4, 32], strides = [1, 1, 1]} : vector<4x4x32xf32> to vector<1x4x32xf32>
    %42 = vector.shape_cast %41 : vector<1x4x32xf32> to vector<4x32xf32>
    %c0_22 = arith.constant 0 : index
    %c0_23 = arith.constant 0 : index
    %43 = vector.load %arg5[%c0_22, %c0_23] : memref<1x32xf32, #tpu.memory_space<vmem>>, vector<1x32xf32>
    %44 = vector.broadcast %43 : vector<1x32xf32> to vector<4x32xf32>
    %45 = arith.addf %42, %44 : vector<4x32xf32>
    %c4 = arith.constant 4 : index
    %c0_24 = arith.constant 0 : index
    %46 = vector.load %arg17[%c4, %c0_24] : memref<16x32xf32, #tpu.memory_space<vmem>>, vector<4x32xf32>
    tpu.vector_store %arg17[%c4, %c0_24], %45 {strides = array<i32>} : memref<16x32xf32, #tpu.memory_space<vmem>>, vector<4x32xf32>,
    %47 = vector.extract_strided_slice %34 {offsets = [2, 0, 0], sizes = [1, 4, 32], strides = [1, 1, 1]} : vector<4x4x32xf32> to vector<1x4x32xf32>
    %48 = vector.shape_cast %47 : vector<1x4x32xf32> to vector<4x32xf32>
    %c0_25 = arith.constant 0 : index
    %c0_26 = arith.constant 0 : index
    %49 = vector.load %arg5[%c0_25, %c0_26] : memref<1x32xf32, #tpu.memory_space<vmem>>, vector<1x32xf32>
    %50 = vector.broadcast %49 : vector<1x32xf32> to vector<4x32xf32>
    %51 = arith.addf %48, %50 : vector<4x32xf32>
    %c8 = arith.constant 8 : index
    %c0_27 = arith.constant 0 : index
    %52 = vector.load %arg17[%c8, %c0_27] : memref<16x32xf32, #tpu.memory_space<vmem>>, vector<4x32xf32>
    tpu.vector_store %arg17[%c8, %c0_27], %51 {strides = array<i32>} : memref<16x32xf32, #tpu.memory_space<vmem>>, vector<4x32xf32>,
    %53 = vector.extract_strided_slice %34 {offsets = [3, 0, 0], sizes = [1, 4, 32], strides = [1, 1, 1]} : vector<4x4x32xf32> to vector<1x4x32xf32>
    %54 = vector.shape_cast %53 : vector<1x4x32xf32> to vector<4x32xf32>
    %c0_28 = arith.constant 0 : index
    %c0_29 = arith.constant 0 : index
    %55 = vector.load %arg5[%c0_28, %c0_29] : memref<1x32xf32, #tpu.memory_space<vmem>>, vector<1x32xf32>
    %56 = vector.broadcast %55 : vector<1x32xf32> to vector<4x32xf32>
    %57 = arith.addf %54, %56 : vector<4x32xf32>
    %c12 = arith.constant 12 : index
    %c0_30 = arith.constant 0 : index
    %58 = vector.load %arg17[%c12, %c0_30] : memref<16x32xf32, #tpu.memory_space<vmem>>, vector<4x32xf32>
    tpu.vector_store %arg17[%c12, %c0_30], %57 {strides = array<i32>} : memref<16x32xf32, #tpu.memory_space<vmem>>, vector<4x32xf32>,
    %c0_31 = arith.constant 0 : index
    %c0_32 = arith.constant 0 : index
    %59 = vector.load %arg17[%c0_31, %c0_32] : memref<16x32xf32, #tpu.memory_space<vmem>>, vector<16x32xf32>
    %60 = arith.truncf %59 : vector<16x32xf32> to vector<16x32xbf16>
    %c0_33 = arith.constant 0 : index
    %c0_34 = arith.constant 0 : index
    %c0_35 = arith.constant 0 : index
    %61 = vector.load %arg1[%c0_33, %c0_34, %c0_35] : memref<1x64x32xbf16, #tpu.memory_space<vmem>>, vector<1x64x32xbf16>
    %62 = vector.shape_cast %61 : vector<1x64x32xbf16> to vector<64x32xbf16>
    %c0_36 = arith.constant 0 : index
    %c0_37 = arith.constant 0 : index
    %63 = vector.load %arg6[%c0_36, %c0_37] : memref<32x32xbf16, #tpu.memory_space<vmem>>, vector<32x32xbf16>
    %cst_38 = arith.constant dense<0.000000e+00> : vector<64x32xf32>
    %64 = tpu.matmul %62, %63, %cst_38 {dimension_numbers = #tpu.dot_dimension_numbers<[1], [0], [0], [1], [0, 0, 1, 1], [], []>} : vector<64x32xbf16>, vector<32x32xbf16>, vector<64x32xf32> -> vector<64x32xf32>
    %c0_39 = arith.constant 0 : index
    %c0_40 = arith.constant 0 : index
    %65 = vector.load %arg7[%c0_39, %c0_40] : memref<1x32xf32, #tpu.memory_space<vmem>>, vector<1x32xf32>
    %66 = vector.broadcast %65 : vector<1x32xf32> to vector<64x32xf32>
    %67 = arith.addf %64, %66 : vector<64x32xf32>
    %c0_41 = arith.constant 0 : index
    %c0_42 = arith.constant 0 : index
    %68 = vector.load %arg8[%c0_41, %c0_42] : memref<32x64xbf16, #tpu.memory_space<vmem>>, vector<32x64xbf16>
    %cst_43 = arith.constant dense<0.000000e+00> : vector<16x64xf32>
    %69 = tpu.matmul %60, %68, %cst_43 {dimension_numbers = #tpu.dot_dimension_numbers<[1], [0], [0], [1], [0, 0, 1, 1], [], []>} : vector<16x32xbf16>, vector<32x64xbf16>, vector<16x64xf32> -> vector<16x64xf32>
    %c0_44 = arith.constant 0 : index
    %c0_45 = arith.constant 0 : index
    %70 = vector.load %arg9[%c0_44, %c0_45] : memref<1x64xf32, #tpu.memory_space<vmem>>, vector<1x64xf32>
    %71 = vector.broadcast %70 : vector<1x64xf32> to vector<16x64xf32>
    %72 = arith.addf %69, %71 : vector<16x64xf32>
    %73 = vector.extract_strided_slice %67 {offsets = [0, 0], sizes = [64, 8], strides = [1, 1]} : vector<64x32xf32> to vector<64x8xf32>
    %74 = arith.truncf %73 : vector<64x8xf32> to vector<64x8xbf16>
    %75 = vector.extract_strided_slice %72 {offsets = [0, 0], sizes = [16, 8], strides = [1, 1]} : vector<16x64xf32> to vector<16x8xf32>
    %76 = arith.truncf %75 : vector<16x8xf32> to vector<16x8xbf16>
    %77 = vector.extract_strided_slice %72 {offsets = [0, 32], sizes = [16, 8], strides = [1, 1]} : vector<16x64xf32> to vector<16x8xf32>
    %78 = arith.truncf %77 : vector<16x8xf32> to vector<16x8xbf16>
    %cst_46 = arith.constant dense<0.000000e+00> : vector<64x16xf32>
    %79 = tpu.matmul %74, %76, %cst_46 {dimension_numbers = #tpu.dot_dimension_numbers<[1], [1], [0], [0], [0, 0, 1, 0], [], []>} : vector<64x8xbf16>, vector<16x8xbf16>, vector<64x16xf32> -> vector<64x16xf32>
    %cst_47 = arith.constant 0.353553385 : f32
    %80 = vector.broadcast %cst_47 : f32 to vector<64x16xf32>
    %81 = arith.mulf %79, %80 : vector<64x16xf32>
    %cst_48 = arith.constant dense<0xFF800000> : vector<64xf32>
    %82 = vector.multi_reduction <maximumf>, %81, %cst_48 [1] : vector<64x16xf32> to vector<64xf32>
    %83 = vector.shape_cast %82 : vector<64xf32> to vector<64x1xf32>
    %84 = vector.broadcast %83 : vector<64x1xf32> to vector<64x16xf32>
    %85 = arith.subf %81, %84 : vector<64x16xf32>
    %86 = math.exp %85 : vector<64x16xf32>
    %cst_49 = arith.constant dense<0.000000e+00> : vector<64xf32>
    %87 = vector.multi_reduction <add>, %86, %cst_49 [1] : vector<64x16xf32> to vector<64xf32>
    %88 = vector.shape_cast %87 : vector<64xf32> to vector<64x1xf32>
    %89 = tpu.reciprocal %88 {approx = true} : vector<64x1xf32> -> vector<64x1xf32>
    %90 = vector.broadcast %89 : vector<64x1xf32> to vector<64x16xf32>
    %91 = arith.mulf %86, %90 : vector<64x16xf32>
    %92 = arith.truncf %91 : vector<64x16xf32> to vector<64x16xbf16>
    %cst_50 = arith.constant dense<0.000000e+00> : vector<64x8xf32>
    %93 = tpu.matmul %92, %78, %cst_50 {dimension_numbers = #tpu.dot_dimension_numbers<[1], [0], [0], [1], [0, 0, 1, 1], [], []>} : vector<64x16xbf16>, vector<16x8xbf16>, vector<64x8xf32> -> vector<64x8xf32>
    %c0_51 = arith.constant 0 : index
    %c0_52 = arith.constant 0 : index
    %94 = vector.load %arg16[%c0_51, %c0_52] : memref<64x32xf32, #tpu.memory_space<vmem>>, vector<64x8xf32>
    tpu.vector_store %arg16[%c0_51, %c0_52], %93 {strides = array<i32>} : memref<64x32xf32, #tpu.memory_space<vmem>>, vector<64x8xf32>,
    %95 = vector.extract_strided_slice %67 {offsets = [0, 8], sizes = [64, 8], strides = [1, 1]} : vector<64x32xf32> to vector<64x8xf32>
    %96 = arith.truncf %95 : vector<64x8xf32> to vector<64x8xbf16>
    %97 = vector.extract_strided_slice %72 {offsets = [0, 8], sizes = [16, 8], strides = [1, 1]} : vector<16x64xf32> to vector<16x8xf32>
    %98 = arith.truncf %97 : vector<16x8xf32> to vector<16x8xbf16>
    %99 = vector.extract_strided_slice %72 {offsets = [0, 40], sizes = [16, 8], strides = [1, 1]} : vector<16x64xf32> to vector<16x8xf32>
    %100 = arith.truncf %99 : vector<16x8xf32> to vector<16x8xbf16>
    %cst_53 = arith.constant dense<0.000000e+00> : vector<64x16xf32>
    %101 = tpu.matmul %96, %98, %cst_53 {dimension_numbers = #tpu.dot_dimension_numbers<[1], [1], [0], [0], [0, 0, 1, 0], [], []>} : vector<64x8xbf16>, vector<16x8xbf16>, vector<64x16xf32> -> vector<64x16xf32>
    %cst_54 = arith.constant 0.353553385 : f32
    %102 = vector.broadcast %cst_54 : f32 to vector<64x16xf32>
    %103 = arith.mulf %101, %102 : vector<64x16xf32>
    %cst_55 = arith.constant dense<0xFF800000> : vector<64xf32>
    %104 = vector.multi_reduction <maximumf>, %103, %cst_55 [1] : vector<64x16xf32> to vector<64xf32>
    %105 = vector.shape_cast %104 : vector<64xf32> to vector<64x1xf32>
    %106 = vector.broadcast %105 : vector<64x1xf32> to vector<64x16xf32>
    %107 = arith.subf %103, %106 : vector<64x16xf32>
    %108 = math.exp %107 : vector<64x16xf32>
    %cst_56 = arith.constant dense<0.000000e+00> : vector<64xf32>
    %109 = vector.multi_reduction <add>, %108, %cst_56 [1] : vector<64x16xf32> to vector<64xf32>
    %110 = vector.shape_cast %109 : vector<64xf32> to vector<64x1xf32>
    %111 = tpu.reciprocal %110 {approx = true} : vector<64x1xf32> -> vector<64x1xf32>
    %112 = vector.broadcast %111 : vector<64x1xf32> to vector<64x16xf32>
    %113 = arith.mulf %108, %112 : vector<64x16xf32>
    %114 = arith.truncf %113 : vector<64x16xf32> to vector<64x16xbf16>
    %cst_57 = arith.constant dense<0.000000e+00> : vector<64x8xf32>
    %115 = tpu.matmul %114, %100, %cst_57 {dimension_numbers = #tpu.dot_dimension_numbers<[1], [0], [0], [1], [0, 0, 1, 1], [], []>} : vector<64x16xbf16>, vector<16x8xbf16>, vector<64x8xf32> -> vector<64x8xf32>
    %c0_58 = arith.constant 0 : index
    %c8_59 = arith.constant 8 : index
    %116 = vector.load %arg16[%c0_58, %c8_59] : memref<64x32xf32, #tpu.memory_space<vmem>>, vector<64x8xf32>
    tpu.vector_store %arg16[%c0_58, %c8_59], %115 {strides = array<i32>} : memref<64x32xf32, #tpu.memory_space<vmem>>, vector<64x8xf32>,
    %117 = vector.extract_strided_slice %67 {offsets = [0, 16], sizes = [64, 8], strides = [1, 1]} : vector<64x32xf32> to vector<64x8xf32>
    %118 = arith.truncf %117 : vector<64x8xf32> to vector<64x8xbf16>
    %119 = vector.extract_strided_slice %72 {offsets = [0, 16], sizes = [16, 8], strides = [1, 1]} : vector<16x64xf32> to vector<16x8xf32>
    %120 = arith.truncf %119 : vector<16x8xf32> to vector<16x8xbf16>
    %121 = vector.extract_strided_slice %72 {offsets = [0, 48], sizes = [16, 8], strides = [1, 1]} : vector<16x64xf32> to vector<16x8xf32>
    %122 = arith.truncf %121 : vector<16x8xf32> to vector<16x8xbf16>
    %cst_60 = arith.constant dense<0.000000e+00> : vector<64x16xf32>
    %123 = tpu.matmul %118, %120, %cst_60 {dimension_numbers = #tpu.dot_dimension_numbers<[1], [1], [0], [0], [0, 0, 1, 0], [], []>} : vector<64x8xbf16>, vector<16x8xbf16>, vector<64x16xf32> -> vector<64x16xf32>
    %cst_61 = arith.constant 0.353553385 : f32
    %124 = vector.broadcast %cst_61 : f32 to vector<64x16xf32>
    %125 = arith.mulf %123, %124 : vector<64x16xf32>
    %cst_62 = arith.constant dense<0xFF800000> : vector<64xf32>
    %126 = vector.multi_reduction <maximumf>, %125, %cst_62 [1] : vector<64x16xf32> to vector<64xf32>
    %127 = vector.shape_cast %126 : vector<64xf32> to vector<64x1xf32>
    %128 = vector.broadcast %127 : vector<64x1xf32> to vector<64x16xf32>
    %129 = arith.subf %125, %128 : vector<64x16xf32>
    %130 = math.exp %129 : vector<64x16xf32>
    %cst_63 = arith.constant dense<0.000000e+00> : vector<64xf32>
    %131 = vector.multi_reduction <add>, %130, %cst_63 [1] : vector<64x16xf32> to vector<64xf32>
    %132 = vector.shape_cast %131 : vector<64xf32> to vector<64x1xf32>
    %133 = tpu.reciprocal %132 {approx = true} : vector<64x1xf32> -> vector<64x1xf32>
    %134 = vector.broadcast %133 : vector<64x1xf32> to vector<64x16xf32>
    %135 = arith.mulf %130, %134 : vector<64x16xf32>
    %136 = arith.truncf %135 : vector<64x16xf32> to vector<64x16xbf16>
    %cst_64 = arith.constant dense<0.000000e+00> : vector<64x8xf32>
    %137 = tpu.matmul %136, %122, %cst_64 {dimension_numbers = #tpu.dot_dimension_numbers<[1], [0], [0], [1], [0, 0, 1, 1], [], []>} : vector<64x16xbf16>, vector<16x8xbf16>, vector<64x8xf32> -> vector<64x8xf32>
    %c0_65 = arith.constant 0 : index
    %c16 = arith.constant 16 : index
    %138 = vector.load %arg16[%c0_65, %c16] : memref<64x32xf32, #tpu.memory_space<vmem>>, vector<64x8xf32>
    tpu.vector_store %arg16[%c0_65, %c16], %137 {strides = array<i32>} : memref<64x32xf32, #tpu.memory_space<vmem>>, vector<64x8xf32>,
    %139 = vector.extract_strided_slice %67 {offsets = [0, 24], sizes = [64, 8], strides = [1, 1]} : vector<64x32xf32> to vector<64x8xf32>
    %140 = arith.truncf %139 : vector<64x8xf32> to vector<64x8xbf16>
    %141 = vector.extract_strided_slice %72 {offsets = [0, 24], sizes = [16, 8], strides = [1, 1]} : vector<16x64xf32> to vector<16x8xf32>
    %142 = arith.truncf %141 : vector<16x8xf32> to vector<16x8xbf16>
    %143 = vector.extract_strided_slice %72 {offsets = [0, 56], sizes = [16, 8], strides = [1, 1]} : vector<16x64xf32> to vector<16x8xf32>
    %144 = arith.truncf %143 : vector<16x8xf32> to vector<16x8xbf16>
    %cst_66 = arith.constant dense<0.000000e+00> : vector<64x16xf32>
    %145 = tpu.matmul %140, %142, %cst_66 {dimension_numbers = #tpu.dot_dimension_numbers<[1], [1], [0], [0], [0, 0, 1, 0], [], []>} : vector<64x8xbf16>, vector<16x8xbf16>, vector<64x16xf32> -> vector<64x16xf32>
    %cst_67 = arith.constant 0.353553385 : f32
    %146 = vector.broadcast %cst_67 : f32 to vector<64x16xf32>
    %147 = arith.mulf %145, %146 : vector<64x16xf32>
    %cst_68 = arith.constant dense<0xFF800000> : vector<64xf32>
    %148 = vector.multi_reduction <maximumf>, %147, %cst_68 [1] : vector<64x16xf32> to vector<64xf32>
    %149 = vector.shape_cast %148 : vector<64xf32> to vector<64x1xf32>
    %150 = vector.broadcast %149 : vector<64x1xf32> to vector<64x16xf32>
    %151 = arith.subf %147, %150 : vector<64x16xf32>
    %152 = math.exp %151 : vector<64x16xf32>
    %cst_69 = arith.constant dense<0.000000e+00> : vector<64xf32>
    %153 = vector.multi_reduction <add>, %152, %cst_69 [1] : vector<64x16xf32> to vector<64xf32>
    %154 = vector.shape_cast %153 : vector<64xf32> to vector<64x1xf32>
    %155 = tpu.reciprocal %154 {approx = true} : vector<64x1xf32> -> vector<64x1xf32>
    %156 = vector.broadcast %155 : vector<64x1xf32> to vector<64x16xf32>
    %157 = arith.mulf %152, %156 : vector<64x16xf32>
    %158 = arith.truncf %157 : vector<64x16xf32> to vector<64x16xbf16>
    %cst_70 = arith.constant dense<0.000000e+00> : vector<64x8xf32>
    %159 = tpu.matmul %158, %144, %cst_70 {dimension_numbers = #tpu.dot_dimension_numbers<[1], [0], [0], [1], [0, 0, 1, 1], [], []>} : vector<64x16xbf16>, vector<16x8xbf16>, vector<64x8xf32> -> vector<64x8xf32>
    %c0_71 = arith.constant 0 : index
    %c24 = arith.constant 24 : index
    %160 = vector.load %arg16[%c0_71, %c24] : memref<64x32xf32, #tpu.memory_space<vmem>>, vector<64x8xf32>
    tpu.vector_store %arg16[%c0_71, %c24], %159 {strides = array<i32>} : memref<64x32xf32, #tpu.memory_space<vmem>>, vector<64x8xf32>,
    %c0_72 = arith.constant 0 : index
    %c0_73 = arith.constant 0 : index
    %161 = vector.load %arg16[%c0_72, %c0_73] : memref<64x32xf32, #tpu.memory_space<vmem>>, vector<64x32xf32>
    %162 = arith.truncf %161 : vector<64x32xf32> to vector<64x32xbf16>
    %c0_74 = arith.constant 0 : index
    %c0_75 = arith.constant 0 : index
    %163 = vector.load %arg10[%c0_74, %c0_75] : memref<32x32xbf16, #tpu.memory_space<vmem>>, vector<32x32xbf16>
    %cst_76 = arith.constant dense<0.000000e+00> : vector<64x32xf32>
    %164 = tpu.matmul %162, %163, %cst_76 {dimension_numbers = #tpu.dot_dimension_numbers<[1], [0], [0], [1], [0, 0, 1, 1], [], []>} : vector<64x32xbf16>, vector<32x32xbf16>, vector<64x32xf32> -> vector<64x32xf32>
    %c0_77 = arith.constant 0 : index
    %c0_78 = arith.constant 0 : index
    %165 = vector.load %arg11[%c0_77, %c0_78] : memref<1x32xf32, #tpu.memory_space<vmem>>, vector<1x32xf32>
    %166 = vector.broadcast %165 : vector<1x32xf32> to vector<64x32xf32>
    %167 = arith.addf %164, %166 : vector<64x32xf32>
    %c0_79 = arith.constant 0 : index
    %c0_80 = arith.constant 0 : index
    %c0_81 = arith.constant 0 : index
    %168 = vector.load %arg3[%c0_79, %c0_80, %c0_81] : memref<1x64x32xbf16, #tpu.memory_space<vmem>>, vector<1x64x32xbf16>
    %169 = vector.shape_cast %168 : vector<1x64x32xbf16> to vector<64x32xbf16>
    %170 = arith.extf %169 : vector<64x32xbf16> to vector<64x32xf32>
    %171 = arith.addf %167, %170 : vector<64x32xf32>
    %172 = arith.truncf %171 : vector<64x32xf32> to vector<64x32xbf16>
    %c0_82 = arith.constant 0 : index
    %c0_83 = arith.constant 0 : index
    %c0_84 = arith.constant 0 : index
    %173 = vector.load %arg14[%c0_82, %c0_83, %c0_84] : memref<1x64x32xbf16, #tpu.memory_space<vmem>>, vector<1x64x32xbf16>
    %174 = vector.shape_cast %173 : vector<1x64x32xbf16> to vector<64x32xbf16>
    %175 = vector.shape_cast %172 : vector<64x32xbf16> to vector<1x64x32xbf16>
    tpu.vector_store %arg14[%c0_82, %c0_83, %c0_84], %175 {strides = array<i32>} : memref<1x64x32xbf16, #tpu.memory_space<vmem>>, vector<1x64x32xbf16>,
    %176 = vector.shape_cast %171 : vector<64x32xf32> to vector<1x64x32xf32>
    %cst_85 = arith.constant dense<0.000000e+00> : vector<1xf32>
    %177 = vector.multi_reduction <add>, %176, %cst_85 [1, 2] : vector<1x64x32xf32> to vector<1xf32>
    %178 = vector.shape_cast %177 : vector<1xf32> to vector<1x1x1xf32>
    %179 = vector.extract %178[0, 0, 0] : f32 from vector<1x1x1xf32>
    %cst_86 = arith.constant 2.048000e+03 : f32
    %180 = arith.divf %179, %cst_86 : f32
    %181 = vector.broadcast %180 : f32 to vector<64x32xf32>
    %182 = arith.subf %171, %181 : vector<64x32xf32>
    %183 = arith.mulf %182, %182 : vector<64x32xf32>
    %184 = vector.shape_cast %183 : vector<64x32xf32> to vector<1x64x32xf32>
    %cst_87 = arith.constant dense<0.000000e+00> : vector<1xf32>
    %185 = vector.multi_reduction <add>, %184, %cst_87 [1, 2] : vector<1x64x32xf32> to vector<1xf32>
    %186 = vector.shape_cast %185 : vector<1xf32> to vector<1x1x1xf32>
    %187 = vector.extract %186[0, 0, 0] : f32 from vector<1x1x1xf32>
    %cst_88 = arith.constant 2.048000e+03 : f32
    %188 = arith.divf %187, %cst_88 : f32
    %cst_89 = arith.constant 9.99999974E-6 : f32
    %189 = arith.addf %188, %cst_89 : f32
    %190 = math.rsqrt %189 : f32
    %191 = vector.broadcast %180 : f32 to vector<64x32xf32>
    %192 = arith.subf %171, %191 : vector<64x32xf32>
    %193 = vector.broadcast %190 : f32 to vector<64x32xf32>
    %194 = arith.mulf %192, %193 : vector<64x32xf32>
    %c0_90 = arith.constant 0 : index
    %c0_91 = arith.constant 0 : index
    %195 = vector.load %arg12[%c0_90, %c0_91] : memref<1x32xf32, #tpu.memory_space<vmem>>, vector<1x32xf32>
    %196 = vector.broadcast %195 : vector<1x32xf32> to vector<64x32xf32>
    %197 = arith.mulf %194, %196 : vector<64x32xf32>
    %c0_92 = arith.constant 0 : index
    %c0_93 = arith.constant 0 : index
    %198 = vector.load %arg13[%c0_92, %c0_93] : memref<1x32xf32, #tpu.memory_space<vmem>>, vector<1x32xf32>
    %199 = vector.broadcast %198 : vector<1x32xf32> to vector<64x32xf32>
    %200 = arith.addf %197, %199 : vector<64x32xf32>
    %201 = arith.truncf %200 : vector<64x32xf32> to vector<64x32xbf16>
    %c0_94 = arith.constant 0 : index
    %c0_95 = arith.constant 0 : index
    %c0_96 = arith.constant 0 : index
    %202 = vector.load %arg15[%c0_94, %c0_95, %c0_96] : memref<1x64x32xbf16, #tpu.memory_space<vmem>>, vector<1x64x32xbf16>
    %203 = vector.shape_cast %202 : vector<1x64x32xbf16> to vector<64x32xbf16>
    %204 = vector.shape_cast %201 : vector<64x32xbf16> to vector<1x64x32xbf16>
    tpu.vector_store %arg15[%c0_94, %c0_95, %c0_96], %204 {strides = array<i32>} : memref<1x64x32xbf16, #tpu.memory_space<vmem>>, vector<1x64x32xbf16>,
    return
  }
  func.func @transform_0(%arg0: i32) -> (i32, i32, i32) {
    %c0_i32 = arith.constant 0 : i32
    %c0_i32_0 = arith.constant 0 : i32
    %c0_i32_1 = arith.constant 0 : i32
    return %arg0, %c0_i32, %c0_i32_0 : i32, i32, i32
  }
  func.func @transform_1(%arg0: i32) -> (i32, i32, i32, i32, i32) {
    %c0_i32 = arith.constant 0 : i32
    %c0_i32_0 = arith.constant 0 : i32
    %c0_i32_1 = arith.constant 0 : i32
    %c0_i32_2 = arith.constant 0 : i32
    %c0_i32_3 = arith.constant 0 : i32
    return %arg0, %c0_i32, %c0_i32_0, %c0_i32_1, %c0_i32_2 : i32, i32, i32, i32, i32
  }
  func.func @transform_2(%arg0: i32) -> (i32, i32, i32) {
    %c0_i32 = arith.constant 0 : i32
    %c0_i32_0 = arith.constant 0 : i32
    %c0_i32_1 = arith.constant 0 : i32
    return %arg0, %c0_i32, %c0_i32_0 : i32, i32, i32
  }
  func.func @transform_3(%arg0: i32) -> (i32, i32, i32) {
    %c0_i32 = arith.constant 0 : i32
    %c0_i32_0 = arith.constant 0 : i32
    %c0_i32_1 = arith.constant 0 : i32
    %c0_i32_2 = arith.constant 0 : i32
    return %c0_i32, %c0_i32_0, %c0_i32_1 : i32, i32, i32
  }
  func.func @transform_4(%arg0: i32) -> (i32, i32) {
    %c0_i32 = arith.constant 0 : i32
    %c0_i32_0 = arith.constant 0 : i32
    %c0_i32_1 = arith.constant 0 : i32
    return %c0_i32, %c0_i32_0 : i32, i32
  }
  func.func @transform_5(%arg0: i32) -> (i32, i32) {
    %c0_i32 = arith.constant 0 : i32
    %c0_i32_0 = arith.constant 0 : i32
    %c0_i32_1 = arith.constant 0 : i32
    return %c0_i32, %c0_i32_0 : i32, i32
  }
  func.func @transform_6(%arg0: i32) -> (i32, i32) {
    %c0_i32 = arith.constant 0 : i32
    %c0_i32_0 = arith.constant 0 : i32
    %c0_i32_1 = arith.constant 0 : i32
    return %c0_i32, %c0_i32_0 : i32, i32
  }
  func.func @transform_7(%arg0: i32) -> (i32, i32) {
    %c0_i32 = arith.constant 0 : i32
    %c0_i32_0 = arith.constant 0 : i32
    %c0_i32_1 = arith.constant 0 : i32
    return %c0_i32, %c0_i32_0 : i32, i32
  }
  func.func @transform_8(%arg0: i32) -> (i32, i32) {
    %c0_i32 = arith.constant 0 : i32
    %c0_i32_0 = arith.constant 0 : i32
    %c0_i32_1 = arith.constant 0 : i32
    return %c0_i32, %c0_i32_0 : i32, i32
  }
  func.func @transform_9(%arg0: i32) -> (i32, i32) {
    %c0_i32 = arith.constant 0 : i32
    %c0_i32_0 = arith.constant 0 : i32
    %c0_i32_1 = arith.constant 0 : i32
    return %c0_i32, %c0_i32_0 : i32, i32
  }
  func.func @transform_10(%arg0: i32) -> (i32, i32) {
    %c0_i32 = arith.constant 0 : i32
    %c0_i32_0 = arith.constant 0 : i32
    %c0_i32_1 = arith.constant 0 : i32
    return %c0_i32, %c0_i32_0 : i32, i32
  }
  func.func @transform_11(%arg0: i32) -> (i32, i32) {
    %c0_i32 = arith.constant 0 : i32
    %c0_i32_0 = arith.constant 0 : i32
    %c0_i32_1 = arith.constant 0 : i32
    return %c0_i32, %c0_i32_0 : i32, i32
  }
  func.func @transform_12(%arg0: i32) -> (i32, i32) {
    %c0_i32 = arith.constant 0 : i32
    %c0_i32_0 = arith.constant 0 : i32
    %c0_i32_1 = arith.constant 0 : i32
    return %c0_i32, %c0_i32_0 : i32, i32
  }
  func.func @transform_13(%arg0: i32) -> (i32, i32, i32) {
    %c0_i32 = arith.constant 0 : i32
    %c0_i32_0 = arith.constant 0 : i32
    %c0_i32_1 = arith.constant 0 : i32
    return %arg0, %c0_i32, %c0_i32_0 : i32, i32, i32
  }
  func.func @transform_14(%arg0: i32) -> (i32, i32, i32) {
    %c0_i32 = arith.constant 0 : i32
    %c0_i32_0 = arith.constant 0 : i32
    %c0_i32_1 = arith.constant 0 : i32
    return %arg0, %c0_i32, %c0_i32_0 : i32, i32, i32
  }
}

module attributes {stable_mosaic.version = 11 : i64} {
  func.func @_irffn12_kernel(%arg0: i32, %arg1: memref<1x64x32xbf16, #tpu.memory_space<vmem>>, %arg2: memref<32x64xbf16, #tpu.memory_space<vmem>>, %arg3: memref<1x64xf32, #tpu.memory_space<vmem>>, %arg4: memref<1x64xf32, #tpu.memory_space<vmem>>, %arg5: memref<1x64xf32, #tpu.memory_space<vmem>>, %arg6: memref<9x1x1x64xf32, #tpu.memory_space<vmem>>, %arg7: memref<1x1x64xf32, #tpu.memory_space<vmem>>, %arg8: memref<1x8x8x64xbf16, #tpu.memory_space<vmem>>, %arg9: memref<10x10x64xf32, #tpu.memory_space<vmem>>) attributes {dimension_semantics = [#tpu.dimension_semantics<parallel>], iteration_bounds = array<i64: 2>, scalar_prefetch = 0 : i64, scratch_operands = 1 : i64, tpu.core_type = #tpu.core_type<tc>, window_params = [{transform_indices = @transform_0, window_bounds = array<i64: 1, 64, 32>}, {pipeline_mode = #tpu.pipeline_mode<synchronous>, transform_indices = @transform_1, window_bounds = array<i64: 32, 64>}, {pipeline_mode = #tpu.pipeline_mode<synchronous>, transform_indices = @transform_2, window_bounds = array<i64: 1, 64>}, {pipeline_mode = #tpu.pipeline_mode<synchronous>, transform_indices = @transform_3, window_bounds = array<i64: 1, 64>}, {pipeline_mode = #tpu.pipeline_mode<synchronous>, transform_indices = @transform_4, window_bounds = array<i64: 1, 64>}, {pipeline_mode = #tpu.pipeline_mode<synchronous>, transform_indices = @transform_5, window_bounds = array<i64: 9, 1, 1, 64>}, {pipeline_mode = #tpu.pipeline_mode<synchronous>, transform_indices = @transform_6, window_bounds = array<i64: 1, 1, 64>}, {transform_indices = @transform_7, window_bounds = array<i64: 1, 8, 8, 64>}]} {
    %c0 = arith.constant 0 : index
    %c0_0 = arith.constant 0 : index
    %c0_1 = arith.constant 0 : index
    %0 = vector.load %arg1[%c0, %c0_0, %c0_1] : memref<1x64x32xbf16, #tpu.memory_space<vmem>>, vector<1x64x32xbf16>
    %1 = vector.shape_cast %0 : vector<1x64x32xbf16> to vector<64x32xbf16>
    %c0_2 = arith.constant 0 : index
    %c0_3 = arith.constant 0 : index
    %2 = vector.load %arg2[%c0_2, %c0_3] : memref<32x64xbf16, #tpu.memory_space<vmem>>, vector<32x64xbf16>
    %cst = arith.constant dense<0.000000e+00> : vector<64x64xf32>
    %3 = tpu.matmul %1, %2, %cst {dimension_numbers = #tpu.dot_dimension_numbers<[1], [0], [0], [1], [0, 0, 1, 1], [], []>} : vector<64x32xbf16>, vector<32x64xbf16>, vector<64x64xf32> -> vector<64x64xf32>
    %c0_4 = arith.constant 0 : index
    %c0_5 = arith.constant 0 : index
    %4 = vector.load %arg3[%c0_4, %c0_5] : memref<1x64xf32, #tpu.memory_space<vmem>>, vector<1x64xf32>
    %5 = vector.broadcast %4 : vector<1x64xf32> to vector<64x64xf32>
    %6 = arith.addf %3, %5 : vector<64x64xf32>
    %cst_6 = arith.constant 5.000000e-01 : f32
    %7 = vector.broadcast %cst_6 : f32 to vector<64x64xf32>
    %8 = arith.mulf %7, %6 : vector<64x64xf32>
    %cst_7 = arith.constant 4.471500e-02 : f32
    %9 = vector.broadcast %cst_7 : f32 to vector<64x64xf32>
    %10 = arith.mulf %9, %6 : vector<64x64xf32>
    %11 = arith.mulf %10, %6 : vector<64x64xf32>
    %12 = arith.mulf %11, %6 : vector<64x64xf32>
    %13 = arith.addf %6, %12 : vector<64x64xf32>
    %cst_8 = arith.constant 0.797884583 : f32
    %14 = vector.broadcast %cst_8 : f32 to vector<64x64xf32>
    %15 = arith.mulf %14, %13 : vector<64x64xf32>
    %16 = math.tanh %15 : vector<64x64xf32>
    %cst_9 = arith.constant 1.000000e+00 : f32
    %17 = vector.broadcast %cst_9 : f32 to vector<64x64xf32>
    %18 = arith.addf %17, %16 : vector<64x64xf32>
    %19 = arith.mulf %8, %18 : vector<64x64xf32>
    %c0_10 = arith.constant 0 : index
    %c0_11 = arith.constant 0 : index
    %20 = vector.load %arg4[%c0_10, %c0_11] : memref<1x64xf32, #tpu.memory_space<vmem>>, vector<1x64xf32>
    %21 = vector.broadcast %20 : vector<1x64xf32> to vector<64x64xf32>
    %22 = arith.mulf %19, %21 : vector<64x64xf32>
    %c0_12 = arith.constant 0 : index
    %c0_13 = arith.constant 0 : index
    %23 = vector.load %arg5[%c0_12, %c0_13] : memref<1x64xf32, #tpu.memory_space<vmem>>, vector<1x64xf32>
    %24 = vector.broadcast %23 : vector<1x64xf32> to vector<64x64xf32>
    %25 = arith.addf %22, %24 : vector<64x64xf32>
    %cst_14 = arith.constant 0.000000e+00 : f32
    %26 = vector.broadcast %cst_14 : f32 to vector<1x10x64xf32>
    %c0_15 = arith.constant 0 : index
    %c0_16 = arith.constant 0 : index
    %c0_17 = arith.constant 0 : index
    %27 = vector.load %arg9[%c0_15, %c0_16, %c0_17] : memref<10x10x64xf32, #tpu.memory_space<vmem>>, vector<1x10x64xf32>
    tpu.vector_store %arg9[%c0_15, %c0_16, %c0_17], %26 {strides = array<i32>} : memref<10x10x64xf32, #tpu.memory_space<vmem>>, vector<1x10x64xf32>,
    %c9 = arith.constant 9 : index
    %c0_18 = arith.constant 0 : index
    %c0_19 = arith.constant 0 : index
    %28 = vector.load %arg9[%c9, %c0_18, %c0_19] : memref<10x10x64xf32, #tpu.memory_space<vmem>>, vector<1x10x64xf32>
    tpu.vector_store %arg9[%c9, %c0_18, %c0_19], %26 {strides = array<i32>} : memref<10x10x64xf32, #tpu.memory_space<vmem>>, vector<1x10x64xf32>,
    %cst_20 = arith.constant 0.000000e+00 : f32
    %29 = vector.broadcast %cst_20 : f32 to vector<8x1x64xf32>
    %c1 = arith.constant 1 : index
    %c0_21 = arith.constant 0 : index
    %c0_22 = arith.constant 0 : index
    %30 = vector.load %arg9[%c1, %c0_21, %c0_22] : memref<10x10x64xf32, #tpu.memory_space<vmem>>, vector<8x1x64xf32>
    tpu.vector_store %arg9[%c1, %c0_21, %c0_22], %29 {strides = array<i32>} : memref<10x10x64xf32, #tpu.memory_space<vmem>>, vector<8x1x64xf32>,
    %c1_23 = arith.constant 1 : index
    %c9_24 = arith.constant 9 : index
    %c0_25 = arith.constant 0 : index
    %31 = vector.load %arg9[%c1_23, %c9_24, %c0_25] : memref<10x10x64xf32, #tpu.memory_space<vmem>>, vector<8x1x64xf32>
    tpu.vector_store %arg9[%c1_23, %c9_24, %c0_25], %29 {strides = array<i32>} : memref<10x10x64xf32, #tpu.memory_space<vmem>>, vector<8x1x64xf32>,
    %32 = vector.extract_strided_slice %25 {offsets = [0, 0], sizes = [8, 64], strides = [1, 1]} : vector<64x64xf32> to vector<8x64xf32>
    %c1_26 = arith.constant 1 : index
    %c1_27 = arith.constant 1 : index
    %c0_28 = arith.constant 0 : index
    %33 = vector.load %arg9[%c1_26, %c1_27, %c0_28] : memref<10x10x64xf32, #tpu.memory_space<vmem>>, vector<1x8x64xf32>
    %34 = vector.shape_cast %33 : vector<1x8x64xf32> to vector<8x64xf32>
    %35 = vector.shape_cast %32 : vector<8x64xf32> to vector<1x8x64xf32>
    tpu.vector_store %arg9[%c1_26, %c1_27, %c0_28], %35 {strides = array<i32>} : memref<10x10x64xf32, #tpu.memory_space<vmem>>, vector<1x8x64xf32>,
    %36 = vector.extract_strided_slice %25 {offsets = [8, 0], sizes = [8, 64], strides = [1, 1]} : vector<64x64xf32> to vector<8x64xf32>
    %c2 = arith.constant 2 : index
    %c1_29 = arith.constant 1 : index
    %c0_30 = arith.constant 0 : index
    %37 = vector.load %arg9[%c2, %c1_29, %c0_30] : memref<10x10x64xf32, #tpu.memory_space<vmem>>, vector<1x8x64xf32>
    %38 = vector.shape_cast %37 : vector<1x8x64xf32> to vector<8x64xf32>
    %39 = vector.shape_cast %36 : vector<8x64xf32> to vector<1x8x64xf32>
    tpu.vector_store %arg9[%c2, %c1_29, %c0_30], %39 {strides = array<i32>} : memref<10x10x64xf32, #tpu.memory_space<vmem>>, vector<1x8x64xf32>,
    %40 = vector.extract_strided_slice %25 {offsets = [16, 0], sizes = [8, 64], strides = [1, 1]} : vector<64x64xf32> to vector<8x64xf32>
    %c3 = arith.constant 3 : index
    %c1_31 = arith.constant 1 : index
    %c0_32 = arith.constant 0 : index
    %41 = vector.load %arg9[%c3, %c1_31, %c0_32] : memref<10x10x64xf32, #tpu.memory_space<vmem>>, vector<1x8x64xf32>
    %42 = vector.shape_cast %41 : vector<1x8x64xf32> to vector<8x64xf32>
    %43 = vector.shape_cast %40 : vector<8x64xf32> to vector<1x8x64xf32>
    tpu.vector_store %arg9[%c3, %c1_31, %c0_32], %43 {strides = array<i32>} : memref<10x10x64xf32, #tpu.memory_space<vmem>>, vector<1x8x64xf32>,
    %44 = vector.extract_strided_slice %25 {offsets = [24, 0], sizes = [8, 64], strides = [1, 1]} : vector<64x64xf32> to vector<8x64xf32>
    %c4 = arith.constant 4 : index
    %c1_33 = arith.constant 1 : index
    %c0_34 = arith.constant 0 : index
    %45 = vector.load %arg9[%c4, %c1_33, %c0_34] : memref<10x10x64xf32, #tpu.memory_space<vmem>>, vector<1x8x64xf32>
    %46 = vector.shape_cast %45 : vector<1x8x64xf32> to vector<8x64xf32>
    %47 = vector.shape_cast %44 : vector<8x64xf32> to vector<1x8x64xf32>
    tpu.vector_store %arg9[%c4, %c1_33, %c0_34], %47 {strides = array<i32>} : memref<10x10x64xf32, #tpu.memory_space<vmem>>, vector<1x8x64xf32>,
    %48 = vector.extract_strided_slice %25 {offsets = [32, 0], sizes = [8, 64], strides = [1, 1]} : vector<64x64xf32> to vector<8x64xf32>
    %c5 = arith.constant 5 : index
    %c1_35 = arith.constant 1 : index
    %c0_36 = arith.constant 0 : index
    %49 = vector.load %arg9[%c5, %c1_35, %c0_36] : memref<10x10x64xf32, #tpu.memory_space<vmem>>, vector<1x8x64xf32>
    %50 = vector.shape_cast %49 : vector<1x8x64xf32> to vector<8x64xf32>
    %51 = vector.shape_cast %48 : vector<8x64xf32> to vector<1x8x64xf32>
    tpu.vector_store %arg9[%c5, %c1_35, %c0_36], %51 {strides = array<i32>} : memref<10x10x64xf32, #tpu.memory_space<vmem>>, vector<1x8x64xf32>,
    %52 = vector.extract_strided_slice %25 {offsets = [40, 0], sizes = [8, 64], strides = [1, 1]} : vector<64x64xf32> to vector<8x64xf32>
    %c6 = arith.constant 6 : index
    %c1_37 = arith.constant 1 : index
    %c0_38 = arith.constant 0 : index
    %53 = vector.load %arg9[%c6, %c1_37, %c0_38] : memref<10x10x64xf32, #tpu.memory_space<vmem>>, vector<1x8x64xf32>
    %54 = vector.shape_cast %53 : vector<1x8x64xf32> to vector<8x64xf32>
    %55 = vector.shape_cast %52 : vector<8x64xf32> to vector<1x8x64xf32>
    tpu.vector_store %arg9[%c6, %c1_37, %c0_38], %55 {strides = array<i32>} : memref<10x10x64xf32, #tpu.memory_space<vmem>>, vector<1x8x64xf32>,
    %56 = vector.extract_strided_slice %25 {offsets = [48, 0], sizes = [8, 64], strides = [1, 1]} : vector<64x64xf32> to vector<8x64xf32>
    %c7 = arith.constant 7 : index
    %c1_39 = arith.constant 1 : index
    %c0_40 = arith.constant 0 : index
    %57 = vector.load %arg9[%c7, %c1_39, %c0_40] : memref<10x10x64xf32, #tpu.memory_space<vmem>>, vector<1x8x64xf32>
    %58 = vector.shape_cast %57 : vector<1x8x64xf32> to vector<8x64xf32>
    %59 = vector.shape_cast %56 : vector<8x64xf32> to vector<1x8x64xf32>
    tpu.vector_store %arg9[%c7, %c1_39, %c0_40], %59 {strides = array<i32>} : memref<10x10x64xf32, #tpu.memory_space<vmem>>, vector<1x8x64xf32>,
    %60 = vector.extract_strided_slice %25 {offsets = [56, 0], sizes = [8, 64], strides = [1, 1]} : vector<64x64xf32> to vector<8x64xf32>
    %c8 = arith.constant 8 : index
    %c1_41 = arith.constant 1 : index
    %c0_42 = arith.constant 0 : index
    %61 = vector.load %arg9[%c8, %c1_41, %c0_42] : memref<10x10x64xf32, #tpu.memory_space<vmem>>, vector<1x8x64xf32>
    %62 = vector.shape_cast %61 : vector<1x8x64xf32> to vector<8x64xf32>
    %63 = vector.shape_cast %60 : vector<8x64xf32> to vector<1x8x64xf32>
    tpu.vector_store %arg9[%c8, %c1_41, %c0_42], %63 {strides = array<i32>} : memref<10x10x64xf32, #tpu.memory_space<vmem>>, vector<1x8x64xf32>,
    %c1_43 = arith.constant 1 : index
    %c1_44 = arith.constant 1 : index
    %c0_45 = arith.constant 0 : index
    %64 = vector.load %arg9[%c1_43, %c1_44, %c0_45] : memref<10x10x64xf32, #tpu.memory_space<vmem>>, vector<8x8x64xf32>
    %c4_46 = arith.constant 4 : index
    %c0_47 = arith.constant 0 : index
    %c0_48 = arith.constant 0 : index
    %c0_49 = arith.constant 0 : index
    %65 = vector.load %arg6[%c4_46, %c0_47, %c0_48, %c0_49] : memref<9x1x1x64xf32, #tpu.memory_space<vmem>>, vector<1x1x1x64xf32>
    %66 = vector.shape_cast %65 : vector<1x1x1x64xf32> to vector<1x1x64xf32>
    %67 = vector.broadcast %66 : vector<1x1x64xf32> to vector<8x8x64xf32>
    %68 = arith.mulf %64, %67 : vector<8x8x64xf32>
    %c0_50 = arith.constant 0 : index
    %c0_51 = arith.constant 0 : index
    %c0_52 = arith.constant 0 : index
    %69 = vector.load %arg7[%c0_50, %c0_51, %c0_52] : memref<1x1x64xf32, #tpu.memory_space<vmem>>, vector<1x1x64xf32>
    %70 = vector.broadcast %69 : vector<1x1x64xf32> to vector<8x8x64xf32>
    %71 = arith.addf %68, %70 : vector<8x8x64xf32>
    %72 = arith.addf %71, %64 : vector<8x8x64xf32>
    %c0_53 = arith.constant 0 : index
    %c0_54 = arith.constant 0 : index
    %c0_55 = arith.constant 0 : index
    %73 = vector.load %arg9[%c0_53, %c0_54, %c0_55] : memref<10x10x64xf32, #tpu.memory_space<vmem>>, vector<8x8x64xf32>
    %c0_56 = arith.constant 0 : index
    %c0_57 = arith.constant 0 : index
    %c0_58 = arith.constant 0 : index
    %c0_59 = arith.constant 0 : index
    %74 = vector.load %arg6[%c0_56, %c0_57, %c0_58, %c0_59] : memref<9x1x1x64xf32, #tpu.memory_space<vmem>>, vector<1x1x1x64xf32>
    %75 = vector.shape_cast %74 : vector<1x1x1x64xf32> to vector<1x1x64xf32>
    %76 = vector.broadcast %75 : vector<1x1x64xf32> to vector<8x8x64xf32>
    %77 = arith.mulf %73, %76 : vector<8x8x64xf32>
    %78 = arith.addf %72, %77 : vector<8x8x64xf32>
    %c0_60 = arith.constant 0 : index
    %c1_61 = arith.constant 1 : index
    %c0_62 = arith.constant 0 : index
    %79 = vector.load %arg9[%c0_60, %c1_61, %c0_62] : memref<10x10x64xf32, #tpu.memory_space<vmem>>, vector<8x8x64xf32>
    %c1_63 = arith.constant 1 : index
    %c0_64 = arith.constant 0 : index
    %c0_65 = arith.constant 0 : index
    %c0_66 = arith.constant 0 : index
    %80 = vector.load %arg6[%c1_63, %c0_64, %c0_65, %c0_66] : memref<9x1x1x64xf32, #tpu.memory_space<vmem>>, vector<1x1x1x64xf32>
    %81 = vector.shape_cast %80 : vector<1x1x1x64xf32> to vector<1x1x64xf32>
    %82 = vector.broadcast %81 : vector<1x1x64xf32> to vector<8x8x64xf32>
    %83 = arith.mulf %79, %82 : vector<8x8x64xf32>
    %84 = arith.addf %78, %83 : vector<8x8x64xf32>
    %c0_67 = arith.constant 0 : index
    %c2_68 = arith.constant 2 : index
    %c0_69 = arith.constant 0 : index
    %85 = vector.load %arg9[%c0_67, %c2_68, %c0_69] : memref<10x10x64xf32, #tpu.memory_space<vmem>>, vector<8x8x64xf32>
    %c2_70 = arith.constant 2 : index
    %c0_71 = arith.constant 0 : index
    %c0_72 = arith.constant 0 : index
    %c0_73 = arith.constant 0 : index
    %86 = vector.load %arg6[%c2_70, %c0_71, %c0_72, %c0_73] : memref<9x1x1x64xf32, #tpu.memory_space<vmem>>, vector<1x1x1x64xf32>
    %87 = vector.shape_cast %86 : vector<1x1x1x64xf32> to vector<1x1x64xf32>
    %88 = vector.broadcast %87 : vector<1x1x64xf32> to vector<8x8x64xf32>
    %89 = arith.mulf %85, %88 : vector<8x8x64xf32>
    %90 = arith.addf %84, %89 : vector<8x8x64xf32>
    %c1_74 = arith.constant 1 : index
    %c0_75 = arith.constant 0 : index
    %c0_76 = arith.constant 0 : index
    %91 = vector.load %arg9[%c1_74, %c0_75, %c0_76] : memref<10x10x64xf32, #tpu.memory_space<vmem>>, vector<8x8x64xf32>
    %c3_77 = arith.constant 3 : index
    %c0_78 = arith.constant 0 : index
    %c0_79 = arith.constant 0 : index
    %c0_80 = arith.constant 0 : index
    %92 = vector.load %arg6[%c3_77, %c0_78, %c0_79, %c0_80] : memref<9x1x1x64xf32, #tpu.memory_space<vmem>>, vector<1x1x1x64xf32>
    %93 = vector.shape_cast %92 : vector<1x1x1x64xf32> to vector<1x1x64xf32>
    %94 = vector.broadcast %93 : vector<1x1x64xf32> to vector<8x8x64xf32>
    %95 = arith.mulf %91, %94 : vector<8x8x64xf32>
    %96 = arith.addf %90, %95 : vector<8x8x64xf32>
    %c1_81 = arith.constant 1 : index
    %c2_82 = arith.constant 2 : index
    %c0_83 = arith.constant 0 : index
    %97 = vector.load %arg9[%c1_81, %c2_82, %c0_83] : memref<10x10x64xf32, #tpu.memory_space<vmem>>, vector<8x8x64xf32>
    %c5_84 = arith.constant 5 : index
    %c0_85 = arith.constant 0 : index
    %c0_86 = arith.constant 0 : index
    %c0_87 = arith.constant 0 : index
    %98 = vector.load %arg6[%c5_84, %c0_85, %c0_86, %c0_87] : memref<9x1x1x64xf32, #tpu.memory_space<vmem>>, vector<1x1x1x64xf32>
    %99 = vector.shape_cast %98 : vector<1x1x1x64xf32> to vector<1x1x64xf32>
    %100 = vector.broadcast %99 : vector<1x1x64xf32> to vector<8x8x64xf32>
    %101 = arith.mulf %97, %100 : vector<8x8x64xf32>
    %102 = arith.addf %96, %101 : vector<8x8x64xf32>
    %c2_88 = arith.constant 2 : index
    %c0_89 = arith.constant 0 : index
    %c0_90 = arith.constant 0 : index
    %103 = vector.load %arg9[%c2_88, %c0_89, %c0_90] : memref<10x10x64xf32, #tpu.memory_space<vmem>>, vector<8x8x64xf32>
    %c6_91 = arith.constant 6 : index
    %c0_92 = arith.constant 0 : index
    %c0_93 = arith.constant 0 : index
    %c0_94 = arith.constant 0 : index
    %104 = vector.load %arg6[%c6_91, %c0_92, %c0_93, %c0_94] : memref<9x1x1x64xf32, #tpu.memory_space<vmem>>, vector<1x1x1x64xf32>
    %105 = vector.shape_cast %104 : vector<1x1x1x64xf32> to vector<1x1x64xf32>
    %106 = vector.broadcast %105 : vector<1x1x64xf32> to vector<8x8x64xf32>
    %107 = arith.mulf %103, %106 : vector<8x8x64xf32>
    %108 = arith.addf %102, %107 : vector<8x8x64xf32>
    %c2_95 = arith.constant 2 : index
    %c1_96 = arith.constant 1 : index
    %c0_97 = arith.constant 0 : index
    %109 = vector.load %arg9[%c2_95, %c1_96, %c0_97] : memref<10x10x64xf32, #tpu.memory_space<vmem>>, vector<8x8x64xf32>
    %c7_98 = arith.constant 7 : index
    %c0_99 = arith.constant 0 : index
    %c0_100 = arith.constant 0 : index
    %c0_101 = arith.constant 0 : index
    %110 = vector.load %arg6[%c7_98, %c0_99, %c0_100, %c0_101] : memref<9x1x1x64xf32, #tpu.memory_space<vmem>>, vector<1x1x1x64xf32>
    %111 = vector.shape_cast %110 : vector<1x1x1x64xf32> to vector<1x1x64xf32>
    %112 = vector.broadcast %111 : vector<1x1x64xf32> to vector<8x8x64xf32>
    %113 = arith.mulf %109, %112 : vector<8x8x64xf32>
    %114 = arith.addf %108, %113 : vector<8x8x64xf32>
    %c2_102 = arith.constant 2 : index
    %c2_103 = arith.constant 2 : index
    %c0_104 = arith.constant 0 : index
    %115 = vector.load %arg9[%c2_102, %c2_103, %c0_104] : memref<10x10x64xf32, #tpu.memory_space<vmem>>, vector<8x8x64xf32>
    %c8_105 = arith.constant 8 : index
    %c0_106 = arith.constant 0 : index
    %c0_107 = arith.constant 0 : index
    %c0_108 = arith.constant 0 : index
    %116 = vector.load %arg6[%c8_105, %c0_106, %c0_107, %c0_108] : memref<9x1x1x64xf32, #tpu.memory_space<vmem>>, vector<1x1x1x64xf32>
    %117 = vector.shape_cast %116 : vector<1x1x1x64xf32> to vector<1x1x64xf32>
    %118 = vector.broadcast %117 : vector<1x1x64xf32> to vector<8x8x64xf32>
    %119 = arith.mulf %115, %118 : vector<8x8x64xf32>
    %120 = arith.addf %114, %119 : vector<8x8x64xf32>
    %121 = arith.truncf %120 : vector<8x8x64xf32> to vector<8x8x64xbf16>
    %c0_109 = arith.constant 0 : index
    %c0_110 = arith.constant 0 : index
    %c0_111 = arith.constant 0 : index
    %c0_112 = arith.constant 0 : index
    %122 = vector.load %arg8[%c0_109, %c0_110, %c0_111, %c0_112] : memref<1x8x8x64xbf16, #tpu.memory_space<vmem>>, vector<1x8x8x64xbf16>
    %123 = vector.shape_cast %122 : vector<1x8x8x64xbf16> to vector<8x8x64xbf16>
    %124 = vector.shape_cast %121 : vector<8x8x64xbf16> to vector<1x8x8x64xbf16>
    tpu.vector_store %arg8[%c0_109, %c0_110, %c0_111, %c0_112], %124 {strides = array<i32>} : memref<1x8x8x64xbf16, #tpu.memory_space<vmem>>, vector<1x8x8x64xbf16>,
    return
  }
  func.func @transform_0(%arg0: i32) -> (i32, i32, i32) {
    %c0_i32 = arith.constant 0 : i32
    %c0_i32_0 = arith.constant 0 : i32
    %c0_i32_1 = arith.constant 0 : i32
    return %arg0, %c0_i32, %c0_i32_0 : i32, i32, i32
  }
  func.func @transform_1(%arg0: i32) -> (i32, i32) {
    %c0_i32 = arith.constant 0 : i32
    %c0_i32_0 = arith.constant 0 : i32
    %c0_i32_1 = arith.constant 0 : i32
    return %c0_i32, %c0_i32_0 : i32, i32
  }
  func.func @transform_2(%arg0: i32) -> (i32, i32) {
    %c0_i32 = arith.constant 0 : i32
    %c0_i32_0 = arith.constant 0 : i32
    %c0_i32_1 = arith.constant 0 : i32
    return %c0_i32, %c0_i32_0 : i32, i32
  }
  func.func @transform_3(%arg0: i32) -> (i32, i32) {
    %c0_i32 = arith.constant 0 : i32
    %c0_i32_0 = arith.constant 0 : i32
    %c0_i32_1 = arith.constant 0 : i32
    return %c0_i32, %c0_i32_0 : i32, i32
  }
  func.func @transform_4(%arg0: i32) -> (i32, i32) {
    %c0_i32 = arith.constant 0 : i32
    %c0_i32_0 = arith.constant 0 : i32
    %c0_i32_1 = arith.constant 0 : i32
    return %c0_i32, %c0_i32_0 : i32, i32
  }
  func.func @transform_5(%arg0: i32) -> (i32, i32, i32, i32) {
    %c0_i32 = arith.constant 0 : i32
    %c0_i32_0 = arith.constant 0 : i32
    %c0_i32_1 = arith.constant 0 : i32
    %c0_i32_2 = arith.constant 0 : i32
    %c0_i32_3 = arith.constant 0 : i32
    return %c0_i32, %c0_i32_0, %c0_i32_1, %c0_i32_2 : i32, i32, i32, i32
  }
  func.func @transform_6(%arg0: i32) -> (i32, i32, i32) {
    %c0_i32 = arith.constant 0 : i32
    %c0_i32_0 = arith.constant 0 : i32
    %c0_i32_1 = arith.constant 0 : i32
    %c0_i32_2 = arith.constant 0 : i32
    return %c0_i32, %c0_i32_0, %c0_i32_1 : i32, i32, i32
  }
  func.func @transform_7(%arg0: i32) -> (i32, i32, i32, i32) {
    %c0_i32 = arith.constant 0 : i32
    %c0_i32_0 = arith.constant 0 : i32
    %c0_i32_1 = arith.constant 0 : i32
    %c0_i32_2 = arith.constant 0 : i32
    return %arg0, %c0_i32, %c0_i32_0, %c0_i32_1 : i32, i32, i32, i32
  }
}

module attributes {stable_mosaic.version = 11 : i64} {
  func.func @_irffn3_kernel(%arg0: i32, %arg1: memref<128x64xbf16, #tpu.memory_space<vmem>>, %arg2: memref<1x64xf32, #tpu.memory_space<vmem>>, %arg3: memref<1x64xf32, #tpu.memory_space<vmem>>, %arg4: memref<64x32xbf16, #tpu.memory_space<vmem>>, %arg5: memref<1x32xf32, #tpu.memory_space<vmem>>, %arg6: memref<1x32xf32, #tpu.memory_space<vmem>>, %arg7: memref<1x32xf32, #tpu.memory_space<vmem>>, %arg8: memref<128x32xbf16, #tpu.memory_space<vmem>>, %arg9: memref<128x32xf32, #tpu.memory_space<vmem>>) attributes {dimension_semantics = [#tpu.dimension_semantics<parallel>], iteration_bounds = array<i64: 1>, scalar_prefetch = 0 : i64, scratch_operands = 0 : i64, tpu.core_type = #tpu.core_type<tc>, window_params = [{transform_indices = @transform_0, window_bounds = array<i64: 128, 64>}, {pipeline_mode = #tpu.pipeline_mode<synchronous>, transform_indices = @transform_1, window_bounds = array<i64: 1, 64>}, {pipeline_mode = #tpu.pipeline_mode<synchronous>, transform_indices = @transform_2, window_bounds = array<i64: 1, 64>}, {pipeline_mode = #tpu.pipeline_mode<synchronous>, transform_indices = @transform_3, window_bounds = array<i64: 64, 32>}, {pipeline_mode = #tpu.pipeline_mode<synchronous>, transform_indices = @transform_4, window_bounds = array<i64: 1, 32>}, {pipeline_mode = #tpu.pipeline_mode<synchronous>, transform_indices = @transform_5, window_bounds = array<i64: 1, 32>}, {pipeline_mode = #tpu.pipeline_mode<synchronous>, transform_indices = @transform_6, window_bounds = array<i64: 1, 32>}, {transform_indices = @transform_7, window_bounds = array<i64: 128, 32>}, {transform_indices = @transform_8, window_bounds = array<i64: 128, 32>}]} {
    %c0 = arith.constant 0 : index
    %c0_0 = arith.constant 0 : index
    %0 = vector.load %arg1[%c0, %c0_0] : memref<128x64xbf16, #tpu.memory_space<vmem>>, vector<128x64xbf16>
    %1 = arith.extf %0 : vector<128x64xbf16> to vector<128x64xf32>
    %cst = arith.constant 5.000000e-01 : f32
    %2 = vector.broadcast %cst : f32 to vector<128x64xf32>
    %3 = arith.mulf %2, %1 : vector<128x64xf32>
    %cst_1 = arith.constant 4.471500e-02 : f32
    %4 = vector.broadcast %cst_1 : f32 to vector<128x64xf32>
    %5 = arith.mulf %4, %1 : vector<128x64xf32>
    %6 = arith.mulf %5, %1 : vector<128x64xf32>
    %7 = arith.mulf %6, %1 : vector<128x64xf32>
    %8 = arith.addf %1, %7 : vector<128x64xf32>
    %cst_2 = arith.constant 0.797884583 : f32
    %9 = vector.broadcast %cst_2 : f32 to vector<128x64xf32>
    %10 = arith.mulf %9, %8 : vector<128x64xf32>
    %11 = math.tanh %10 : vector<128x64xf32>
    %cst_3 = arith.constant 1.000000e+00 : f32
    %12 = vector.broadcast %cst_3 : f32 to vector<128x64xf32>
    %13 = arith.addf %12, %11 : vector<128x64xf32>
    %14 = arith.mulf %3, %13 : vector<128x64xf32>
    %c0_4 = arith.constant 0 : index
    %c0_5 = arith.constant 0 : index
    %15 = vector.load %arg2[%c0_4, %c0_5] : memref<1x64xf32, #tpu.memory_space<vmem>>, vector<1x64xf32>
    %16 = vector.broadcast %15 : vector<1x64xf32> to vector<128x64xf32>
    %17 = arith.mulf %14, %16 : vector<128x64xf32>
    %c0_6 = arith.constant 0 : index
    %c0_7 = arith.constant 0 : index
    %18 = vector.load %arg3[%c0_6, %c0_7] : memref<1x64xf32, #tpu.memory_space<vmem>>, vector<1x64xf32>
    %19 = vector.broadcast %18 : vector<1x64xf32> to vector<128x64xf32>
    %20 = arith.addf %17, %19 : vector<128x64xf32>
    %21 = arith.truncf %20 : vector<128x64xf32> to vector<128x64xbf16>
    %c0_8 = arith.constant 0 : index
    %c0_9 = arith.constant 0 : index
    %22 = vector.load %arg4[%c0_8, %c0_9] : memref<64x32xbf16, #tpu.memory_space<vmem>>, vector<64x32xbf16>
    %cst_10 = arith.constant dense<0.000000e+00> : vector<128x32xf32>
    %23 = tpu.matmul %21, %22, %cst_10 {dimension_numbers = #tpu.dot_dimension_numbers<[1], [0], [0], [1], [0, 0, 1, 1], [], []>} : vector<128x64xbf16>, vector<64x32xbf16>, vector<128x32xf32> -> vector<128x32xf32>
    %c0_11 = arith.constant 0 : index
    %c0_12 = arith.constant 0 : index
    %24 = vector.load %arg5[%c0_11, %c0_12] : memref<1x32xf32, #tpu.memory_space<vmem>>, vector<1x32xf32>
    %25 = vector.broadcast %24 : vector<1x32xf32> to vector<128x32xf32>
    %26 = arith.addf %23, %25 : vector<128x32xf32>
    %c0_13 = arith.constant 0 : index
    %c0_14 = arith.constant 0 : index
    %27 = vector.load %arg6[%c0_13, %c0_14] : memref<1x32xf32, #tpu.memory_space<vmem>>, vector<1x32xf32>
    %28 = vector.broadcast %27 : vector<1x32xf32> to vector<128x32xf32>
    %29 = arith.mulf %26, %28 : vector<128x32xf32>
    %c0_15 = arith.constant 0 : index
    %c0_16 = arith.constant 0 : index
    %30 = vector.load %arg7[%c0_15, %c0_16] : memref<1x32xf32, #tpu.memory_space<vmem>>, vector<1x32xf32>
    %31 = vector.broadcast %30 : vector<1x32xf32> to vector<128x32xf32>
    %32 = arith.addf %29, %31 : vector<128x32xf32>
    %c0_17 = arith.constant 0 : index
    %c0_18 = arith.constant 0 : index
    %33 = vector.load %arg8[%c0_17, %c0_18] : memref<128x32xbf16, #tpu.memory_space<vmem>>, vector<128x32xbf16>
    %34 = arith.extf %33 : vector<128x32xbf16> to vector<128x32xf32>
    %35 = arith.addf %32, %34 : vector<128x32xf32>
    %c0_19 = arith.constant 0 : index
    %c0_20 = arith.constant 0 : index
    %36 = vector.load %arg9[%c0_19, %c0_20] : memref<128x32xf32, #tpu.memory_space<vmem>>, vector<128x32xf32>
    tpu.vector_store %arg9[%c0_19, %c0_20], %35 {strides = array<i32>} : memref<128x32xf32, #tpu.memory_space<vmem>>, vector<128x32xf32>,
    return
  }
  func.func @transform_0(%arg0: i32) -> (i32, i32) {
    %c0_i32 = arith.constant 0 : i32
    %c0_i32_0 = arith.constant 0 : i32
    return %arg0, %c0_i32 : i32, i32
  }
  func.func @transform_1(%arg0: i32) -> (i32, i32) {
    %c0_i32 = arith.constant 0 : i32
    %c0_i32_0 = arith.constant 0 : i32
    %c0_i32_1 = arith.constant 0 : i32
    return %c0_i32, %c0_i32_0 : i32, i32
  }
  func.func @transform_2(%arg0: i32) -> (i32, i32) {
    %c0_i32 = arith.constant 0 : i32
    %c0_i32_0 = arith.constant 0 : i32
    %c0_i32_1 = arith.constant 0 : i32
    return %c0_i32, %c0_i32_0 : i32, i32
  }
  func.func @transform_3(%arg0: i32) -> (i32, i32) {
    %c0_i32 = arith.constant 0 : i32
    %c0_i32_0 = arith.constant 0 : i32
    %c0_i32_1 = arith.constant 0 : i32
    return %c0_i32, %c0_i32_0 : i32, i32
  }
  func.func @transform_4(%arg0: i32) -> (i32, i32) {
    %c0_i32 = arith.constant 0 : i32
    %c0_i32_0 = arith.constant 0 : i32
    %c0_i32_1 = arith.constant 0 : i32
    return %c0_i32, %c0_i32_0 : i32, i32
  }
  func.func @transform_5(%arg0: i32) -> (i32, i32) {
    %c0_i32 = arith.constant 0 : i32
    %c0_i32_0 = arith.constant 0 : i32
    %c0_i32_1 = arith.constant 0 : i32
    return %c0_i32, %c0_i32_0 : i32, i32
  }
  func.func @transform_6(%arg0: i32) -> (i32, i32) {
    %c0_i32 = arith.constant 0 : i32
    %c0_i32_0 = arith.constant 0 : i32
    %c0_i32_1 = arith.constant 0 : i32
    return %c0_i32, %c0_i32_0 : i32, i32
  }
  func.func @transform_7(%arg0: i32) -> (i32, i32) {
    %c0_i32 = arith.constant 0 : i32
    %c0_i32_0 = arith.constant 0 : i32
    return %arg0, %c0_i32 : i32, i32
  }
  func.func @transform_8(%arg0: i32) -> (i32, i32) {
    %c0_i32 = arith.constant 0 : i32
    %c0_i32_0 = arith.constant 0 : i32
    return %arg0, %c0_i32 : i32, i32
  }
}

</mosaic_0001>

<bundles_post_ra>
// kernel: cmt_block_forward.6
= control target key start
LH: loop header
LB: loop body
LE: loop exit
PB: predicated region body
PF: predicated region fallthrough
CT: control target
= control target key end

     0   :  { %s998_s24 = smov 0   ;;  %s1303_s0 = inlined_call_operand.vmem [shape: bf16[2,64,32], index: 0, kind: input, shape index: {}]   ;;  %s1304_s1 = inlined_call_operand.vmem [shape: bf16[32,64], index: 1, kind: input, shape index: {}]   ;;  %s1305_s2 = inlined_call_operand.vmem [shape: f32[1,64], index: 2, kind: input, shape index: {}]   ;;  %s1306_s3 = inlined_call_operand.vmem [shape: f32[1,64], index: 3, kind: input, shape index: {}]   ;;  %s1307_s4 = inlined_call_operand.vmem [shape: f32[1,64], index: 4, kind: input, shape index: {}]   ;;  %s1308_s5 = inlined_call_operand.vmem [shape: f32[9,1,1,64], index: 5, kind: input, shape index: {}]   ;;  %s1309_s6 = inlined_call_operand.vmem [shape: f32[1,1,64], index: 6, kind: input, shape index: {}]   ;;  %s1310_s7 = inlined_call_operand.vmem [shape: bf16[2,8,8,64], index: 7, kind: output, shape index: {}]  }
   0x1 LB: > { %s850_s25 = sadd.s32 4294967295, %s955_s24   ;;  %p854_p0 = scmp.ge.s32.totalorder %s955_s24, 1  ;;  %s955_s24 = sphi %s998_s24, %s17_s24  }
   0x2   : > { %p237_p1 = scmp.lt.s32.totalorder %s955_s24, 3 }
   0x4   : > { %p238_p2 = pnand %p854_p0, %p237_p1 }
   0x5   : > { %p269_p3 = scmp.lt.s32.totalorder (!%p238_p2), %s850_s25, 1 }
   0x6   : > { %241 = sbr.rel (%p238_p2) target bundleno = 234 (0xea), region = 48 }
   0xb   : > { %v904_v0 = vld [vmem:[%s1304_s1 + $0x8] sm:$0xff]  ;;  %v903_v1 = vld [vmem:[%s1304_s1] sm:$0xff]  ;;  %s1312_s25 = smov (!%p269_p3, %s850_s25), 1  ;;  %vm328_vm0 = vcmask 261120   ;;  %vm466_vm1 = vcmask 523264   ;;  %vm468_vm2 = vcmask 517120  }
   0xc   : > { %347 = vmatpush.bf16.msra.mxu0 %v904_v0  ;;  %905 = vmatpush.bf16.msra.mxu1 %v904_v0  ;;  %s897_s30 = sshll.u32 %s1312_s25, 5  ;;  %v957_v6 = vmov 0.0   ;;  %vm474_vm3 = vcmask 516096   ;;  %v920_v7 = vld [vmem:[%s1305_s2] ss:$0 sm:$0xff]  ;;  %vm786_vm4 = vcmask 519168  }
   0xd   : > { %906 = vmatpush.bf16.msra.mxu2 %v904_v0  ;;  %907 = vmatpush.bf16.msra.mxu3 %v904_v0  ;;  %s273_s10 = scalar_lea.vmem %s1303_s0, %s897_s30  ;;  %467 = vst.msk [vmem:[#allocation2] sm:$0xff] %vm466_vm1, %v957_v6  ;;  %v1080_v56 = vld [vmem:[%s1306_s3] ss:$0 sm:$0xff]  ;;  %s1222_s19 = scalar_lea.vmem %s1310_s7, %s897_s30 }
   0xe   : > { %v899_v2 = vld [vmem:[%s273_s10] sm:$0xff]  ;;  %v900_v3 = vld [vmem:[%s273_s10 + $0x8] sm:$0xff]  ;;  %v901_v4 = vld [vmem:[%s273_s10 + $0x10] sm:$0xff]  ;;  %469 = vst.msk [vmem:[#allocation2 + $0x8] sm:$0x3] %vm468_vm2, %v957_v6 }
   0xf   : > { %v902_v5 = vld [vmem:[%s273_s10 + $0x18] sm:$0xff]  ;;  %471 = vst.msk [vmem:[#allocation2 + $0x90] sm:$0xff] %vm466_vm1, %v957_v6  ;;  %v1086_v63 = vld [vmem:[%s1307_s4] ss:$0 sm:$0xff] }
  0x10   : > { %348 = vmatpush.bf16.msra.mxu0 %v903_v1  ;;  %908 = vmatpush.bf16.msra.mxu1 %v903_v1  ;;  %475 = vst.msk [vmem:[#allocation2 + $0x10] sm:$0x1] %vm474_vm3, %v957_v6 }
  0x11   : > { %909 = vmatpush.bf16.msra.mxu2 %v903_v1  ;;  %910 = vmatpush.bf16.msra.mxu3 %v903_v1  ;;  %483 = vst.msk [vmem:[#allocation2 + $0x19] sm:$0x1] %vm474_vm3, %v957_v6 }
  0x12   : > { %472 = vst.msk [vmem:[#allocation2 + $0x98] sm:$0x3] %vm468_vm2, %v957_v6 }
  0x13   : > { %883 = vmatmul.msk.bf16.vlgmr.msra.gmra.mxu0 %vm328_vm0, %v899_v2  ;;  %884 = vmatmul.msk.bf16.vlgmr.msra.gmra.mxu1 %vm328_vm0, %v900_v3  ;;  %476 = vst.msk [vmem:[#allocation2 + $0x20] sm:$0x1] %vm474_vm3, %v957_v6 }
  0x14   : > { %885 = vmatmul.msk.bf16.vlgmr.msra.gmra.mxu2 %vm328_vm0, %v901_v4  ;;  %886 = vmatmul.msk.bf16.vlgmr.msra.gmra.mxu3 %vm328_vm0, %v902_v5  ;;  %477 = vst.msk [vmem:[#allocation2 + $0x30] sm:$0x1] %vm474_vm3, %v957_v6 }
  0x15   : > { %478 = vst.msk [vmem:[#allocation2 + $0x40] sm:$0x1] %vm474_vm3, %v957_v6 }
  0x16   : > { %479 = vst.msk [vmem:[#allocation2 + $0x50] sm:$0x1] %vm474_vm3, %v957_v6 }
  0x17   : > { %480 = vst.msk [vmem:[#allocation2 + $0x60] sm:$0x1] %vm474_vm3, %v957_v6 }
  0x18   : > { %481 = vst.msk [vmem:[#allocation2 + $0x70] sm:$0x1] %vm474_vm3, %v957_v6 }
  0x19   : > { %482 = vst.msk [vmem:[#allocation2 + $0x80] sm:$0x1] %vm474_vm3, %v957_v6 }
  0x1a   : > { %484 = vst.msk [vmem:[#allocation2 + $0x29] sm:$0x1] %vm474_vm3, %v957_v6 }
  0x1b   : > { %485 = vst.msk [vmem:[#allocation2 + $0x39] sm:$0x1] %vm474_vm3, %v957_v6 }
  0x1c   : > { %486 = vst.msk [vmem:[#allocation2 + $0x49] sm:$0x1] %vm474_vm3, %v957_v6 }
  0x1d   : > { %487 = vst.msk [vmem:[#allocation2 + $0x59] sm:$0x1] %vm474_vm3, %v957_v6 }
  0x1e   : > { %488 = vst.msk [vmem:[#allocation2 + $0x69] sm:$0x1] %vm474_vm3, %v957_v6 }
  0x1f   : > { %489 = vst.msk [vmem:[#allocation2 + $0x79] sm:$0x1] %vm474_vm3, %v957_v6 }
  0x20   : > { %490 = vst.msk [vmem:[#allocation2 + $0x89] sm:$0x1] %vm474_vm3, %v957_v6 }
  0x90   : > { %v350_v8 = vpop.f32.mrf.mxu0  ;;  %v355_v9 = vpop.f32.mrf.mxu1 }
  0x91   : > { %v351_v10 = vadd.f32 %v920_v7, %v350_v8  ;;  %v1029_v11 = vadd.f32 %v920_v7, %v355_v9 }
  0x93   : > { %v378_v12 = vmul.f32 0.044715, %v351_v10  ;;  %v380_v14 = vmul.f32 0.044715, %v1029_v11  ;;  %v370_v51 = vmul.f32 0.5, %v351_v10  ;;  %v372_v1 = vmul.f32 0.5, %v1029_v11 }
  0x95   : > { %v386_v13 = vmul.f32 %v378_v12, %v351_v10  ;;  %v388_v18 = vmul.f32 %v380_v14, %v1029_v11 }
  0x97   : > { %v394_v15 = vmul.f32 %v386_v13, %v351_v10  ;;  %v360_v16 = vpop.f32.mrf.mxu2  ;;  %v365_v17 = vpop.f32.mrf.mxu3  ;;  %v396_v26 = vmul.f32 %v388_v18, %v1029_v11 }
  0x98   : > { %v1036_v19 = vadd.f32 %v920_v7, %v360_v16  ;;  %v1038_v20 = vadd.f32 %v920_v7, %v365_v17  ;;  %v352_v21 = vpop.f32.mrf.mxu0  ;;  %v357_v22 = vpop.f32.mrf.mxu1 }
  0x99   : > { %v402_v23 = vadd.f32 %v394_v15, %v351_v10  ;;  %v1041_v24 = vadd.f32 %v920_v7, %v352_v21  ;;  %v1043_v25 = vadd.f32 %v920_v7, %v357_v22  ;;  %v404_v29 = vadd.f32 %v396_v26, %v1029_v11 }
  0x9a   : > { %v382_v27 = vmul.f32 0.044715, %v1036_v19  ;;  %v384_v31 = vmul.f32 0.044715, %v1038_v20  ;;  %v374_v10 = vmul.f32 0.5, %v1036_v19  ;;  %v376_v17 = vmul.f32 0.5, %v1038_v20 }
  0x9b   : > { %v410_v28 = vmul.f32 0.7978846, %v402_v23  ;;  %v379_v32 = vmul.f32 0.044715, %v1041_v24  ;;  %v381_v33 = vmul.f32 0.044715, %v1043_v25 }
  0x9c   : > { %v390_v30 = vmul.f32 %v382_v27, %v1036_v19  ;;  %v412_v34 = vmul.f32 0.7978846, %v404_v29  ;;  %v392_v36 = vmul.f32 %v384_v31, %v1038_v20  ;;  %v371_v22 = vmul.f32 0.5, %v1041_v24 }
  0x9d   : > { %933 = vtanh.f32 %v410_v28  ;;  %v387_v37 = vmul.f32 %v379_v32, %v1041_v24  ;;  %v389_v38 = vmul.f32 %v381_v33, %v1043_v25  ;;  %v373_v26 = vmul.f32 0.5, %v1043_v25  ;;  %v1115_v33 = vld [vmem:[%s1309_s6] ss:$0 sm:$0xff] }
  0x9e   : > { %v398_v35 = vmul.f32 %v390_v30, %v1036_v19  ;;  %935 = vtanh.f32 %v412_v34  ;;  %v400_v42 = vmul.f32 %v392_v36, %v1038_v20  ;;  %v547_v36 = vld [vmem:[#allocation2] sm:$0xff] }
  0x9f   : > { %v362_v39 = vpop.f32.mrf.mxu2  ;;  %v367_v40 = vpop.f32.mrf.mxu3  ;;  %v395_v44 = vmul.f32 %v387_v37, %v1041_v24  ;;  %v397_v45 = vmul.f32 %v389_v38, %v1043_v25 }
  0xa0   : > { %v406_v41 = vadd.f32 %v398_v35, %v1036_v19  ;;  %v1065_v43 = vadd.f32 %v920_v7, %v362_v39  ;;  %v1070_v46 = vadd.f32 %v920_v7, %v367_v40  ;;  %v408_v48 = vadd.f32 %v400_v42, %v1038_v20  ;;  %v1108_v20 = vld [vmem:[%s1308_s5 + $0x4] ss:$0 sm:$0xff] }
  0xa1   : > { %v403_v52 = vadd.f32 %v395_v44, %v1041_v24  ;;  %v405_v53 = vadd.f32 %v397_v45, %v1043_v25  ;;  %v575_v42 = vld [vmem:[#allocation2 + $0x1] sm:$0xff] }
  0xa2   : > { %v414_v47 = vmul.f32 0.7978846, %v406_v41  ;;  %v383_v49 = vmul.f32 0.044715, %v1065_v43  ;;  %v385_v54 = vmul.f32 0.044715, %v1070_v46 }
  0xa3   : > { %v934_v50 = vpop.eup %933  ;;  %v416_v57 = vmul.f32 0.7978846, %v408_v48  ;;  %v411_v59 = vmul.f32 0.7978846, %v403_v52  ;;  %v413_v60 = vmul.f32 0.7978846, %v405_v53 }
  0xa4   : > { %v426_v55 = vadd.f32 1.0, %v934_v50  ;;  %937 = vtanh.f32 %v414_v47  ;;  %v391_v58 = vmul.f32 %v383_v49, %v1065_v43  ;;  %v936_v61 = vpop.eup %935  ;;  %v393_v0 = vmul.f32 %v385_v54, %v1070_v46  ;;  %v1125_v41 = vld [vmem:[%s1308_s5] ss:$0 sm:$0xff]  ;;  %v1135_v49 = vld [vmem:[%s1308_s5 + $0x1] ss:$0 sm:$0xff] }
  0xa5   : > { %939 = vtanh.f32 %v416_v57  ;;  %v428_v2 = vadd.f32 1.0, %v936_v61  ;;  %v559_v48 = vmul.f32 %v1125_v41, %v547_v36  ;;  %v588_v53 = vmul.f32 %v1135_v49, %v575_v42  ;;  %v1144_v54 = vld [vmem:[%s1308_s5 + $0x2] ss:$0 sm:$0xff] }
  0xa6   : > { %v434_v62 = vmul.f32 %v426_v55, %v370_v51  ;;  %941 = vtanh.f32 %v411_v59  ;;  %v399_v3 = vmul.f32 %v391_v58, %v1065_v43  ;;  %v401_v8 = vmul.f32 %v393_v0, %v1070_v46  ;;  %v604_v51 = vld [vmem:[#allocation2 + $0x2] sm:$0xff] }
  0xa7   : > { %943 = vtanh.f32 %v413_v60  ;;  %v436_v5 = vmul.f32 %v428_v2, %v372_v1  ;;  %v617_v59 = vmul.f32 %v1144_v54, %v604_v51  ;;  %v1153_v60 = vld [vmem:[%s1308_s5 + $0x3] ss:$0 sm:$0xff] }
  0xa8   : > { %v446_v4 = vmul.f32 %v1080_v56, %v434_v62  ;;  %v407_v11 = vadd.f32 %v399_v3, %v1065_v43  ;;  %v409_v19 = vadd.f32 %v401_v8, %v1070_v46  ;;  %v1162_v3 = vld [vmem:[%s1308_s5 + $0x5] ss:$0 sm:$0xff] }
  0xa9   : > { %v448_v9 = vmul.f32 %v1080_v56, %v436_v5 }
  0xaa   : > { %v938_v6 = vpop.eup %937  ;;  %v458_v7 = vadd.f32 %v1086_v63, %v446_v4  ;;  %v415_v30 = vmul.f32 0.7978846, %v407_v11  ;;  %v417_v39 = vmul.f32 0.7978846, %v409_v19 }
  0xab   : > { %v430_v12 = vadd.f32 1.0, %v938_v6  ;;  %v940_v13 = vpop.eup %939  ;;  %v460_v15 = vadd.f32 %v1086_v63, %v448_v9 }
  0xac   : > { %491 = vst.msk [vmem:[#allocation2 + $0x11] sm:$0xff] %vm466_vm1, %v458_v7  ;;  %v942_v14 = vpop.eup %941  ;;  %v432_v18 = vadd.f32 1.0, %v940_v13  ;;  %945 = vtanh.f32 %v415_v30  ;;  %v375_v13 = vmul.f32 0.5, %v1065_v43 }
  0xad   : > { %v438_v16 = vmul.f32 %v430_v12, %v374_v10  ;;  %v944_v21 = vpop.eup %943  ;;  %v427_v23 = vadd.f32 1.0, %v942_v14  ;;  %495 = vst.msk [vmem:[#allocation2 + $0x31] sm:$0xff] %vm466_vm1, %v460_v15  ;;  %947 = vtanh.f32 %v417_v39 }
  0xae   : > { %v440_v28 = vmul.f32 %v432_v18, %v376_v17  ;;  %v429_v29 = vadd.f32 1.0, %v944_v21  ;;  %v377_v17 = vmul.f32 0.5, %v1070_v46 }
  0xaf   : > { %v450_v27 = vmul.f32 %v1080_v56, %v438_v16  ;;  %v435_v31 = vmul.f32 %v427_v23, %v371_v22  ;;  %v1178_v22 = vld [vmem:[%s1308_s5 + $0x6] ss:$0 sm:$0xff] }
  0xb0   : > { %v452_v32 = vmul.f32 %v1080_v56, %v440_v28  ;;  %v437_v25 = vmul.f32 %v429_v29, %v373_v26 }
  0xb1   : > { %v462_v24 = vadd.f32 %v1086_v63, %v450_v27  ;;  %v447_v34 = vmul.f32 %v1080_v56, %v435_v31 }
  0xb2   : > { %v464_v37 = vadd.f32 %v1086_v63, %v452_v32  ;;  %v449_v38 = vmul.f32 %v1080_v56, %v437_v25  ;;  %v946_v55 = vpop.eup %945 }
  0xb3   : > { %v506_v35 = vld [vmem:[#allocation2 + $0x11] sm:$0xff]  ;;  %499 = vst.msk [vmem:[#allocation2 + $0x51] sm:$0xff] %vm466_vm1, %v462_v24  ;;  %v459_v44 = vadd.f32 %v1086_v63, %v447_v34  ;;  %v431_v4 = vadd.f32 1.0, %v946_v55  ;;  %v948_v5 = vpop.eup %947  ;;  %v1193_v34 = vld [vmem:[%s1308_s5 + $0x7] ss:$0 sm:$0xff] }
  0xb4   : > { %v519_v40 = vmul.f32 %v1108_v20, %v506_v35  ;;  %503 = vst.msk [vmem:[#allocation2 + $0x71] sm:$0xff] %vm466_vm1, %v464_v37  ;;  %v461_v45 = vadd.f32 %v1086_v63, %v449_v38  ;;  %v1137_v50 = vld [vmem:[#allocation2 + $0x31] sm:$0xff]  ;;  %v589_v15 = vmul.f32 %v1135_v49, %v506_v35  ;;  %v433_v26 = vadd.f32 1.0, %v948_v5 }
  0xb5   : > { %493 = vst.msk [vmem:[#allocation2 + $0x21] sm:$0xff] %vm466_vm1, %v459_v44  ;;  %v521_v57 = vmul.f32 %v1108_v20, %v1137_v50  ;;  %v548_v62 = vld [vmem:[#allocation2 + $0x10] sm:$0xff]  ;;  %v439_v23 = vmul.f32 %v431_v4, %v375_v13  ;;  %v591_v24 = vmul.f32 %v1135_v49, %v1137_v50 }
  0xb6   : > { %v531_v47 = vadd.f32 %v1115_v33, %v519_v40  ;;  %497 = vst.msk [vmem:[#allocation2 + $0x41] sm:$0xff] %vm466_vm1, %v461_v45  ;;  %v605_v2 = vld [vmem:[#allocation2 + $0x12] sm:$0xff]  ;;  %v646_v8 = vmul.f32 %v1153_v60, %v548_v62  ;;  %v560_v14 = vmul.f32 %v1125_v41, %v548_v62  ;;  %v441_v62 = vmul.f32 %v433_v26, %v377_v17 }
  0xb7   : > { %v533_v6 = vadd.f32 %v1115_v33, %v521_v57  ;;  %v1166_v9 = vld [vmem:[#allocation2 + $0x30] sm:$0xff]  ;;  %v618_v16 = vmul.f32 %v1144_v54, %v605_v2  ;;  %v675_v21 = vmul.f32 %v1162_v3, %v605_v2  ;;  %v451_v44 = vmul.f32 %v1080_v56, %v439_v23 }
  0xb8   : > { %v539_v52 = vadd.f32 %v531_v47, %v506_v35  ;;  %v562_v19 = vmul.f32 %v1125_v41, %v1166_v9  ;;  %v648_v32 = vmul.f32 %v1153_v60, %v1166_v9  ;;  %v607_v45 = vld [vmem:[#allocation2 + $0x32] sm:$0xff]  ;;  %v1205_v47 = vld [vmem:[%s1308_s5 + $0x8] ss:$0 sm:$0xff]  ;;  %v453_v26 = vmul.f32 %v1080_v56, %v441_v62 }
  0xb9   : > { %v541_v43 = vadd.f32 %v533_v6, %v1137_v50  ;;  %v677_v6 = vmul.f32 %v1162_v3, %v607_v45  ;;  %v463_v23 = vadd.f32 %v1086_v63, %v451_v44 }
  0xba   : > { %v567_v58 = vadd.f32 %v559_v48, %v539_v52  ;;  %v1155_v61 = vld [vmem:[#allocation2 + $0x51] sm:$0xff] }
  0xbb   : > { %v523_v0 = vmul.f32 %v1108_v20, %v1155_v61  ;;  %v1207_v48 = vld [vmem:[#allocation2 + $0x71] sm:$0xff]  ;;  %501 = vst.msk [vmem:[#allocation2 + $0x61] sm:$0xff] %vm466_vm1, %v463_v23  ;;  %v736_v62 = vmul.f32 %v1193_v34, %v1155_v61 }
  0xbc   : > { %v596_v1 = vadd.f32 %v588_v53, %v567_v58  ;;  %v507_v12 = vld [vmem:[#allocation2 + $0x21] sm:$0xff] }
  0xbd   : > { %v535_v10 = vadd.f32 %v1115_v33, %v523_v0  ;;  %v549_v11 = vld [vmem:[#allocation2 + $0x20] sm:$0xff]  ;;  %v520_v27 = vmul.f32 %v1108_v20, %v507_v12  ;;  %v590_v37 = vmul.f32 %v1135_v49, %v507_v12  ;;  %v733_v55 = vmul.f32 %v1193_v34, %v507_v12 }
  0xbe   : > { %v625_v7 = vadd.f32 %v617_v59, %v596_v1  ;;  %v561_v28 = vmul.f32 %v1125_v41, %v549_v11  ;;  %v606_v46 = vld [vmem:[#allocation2 + $0x22] sm:$0xff]  ;;  %v704_v38 = vmul.f32 %v1178_v22, %v549_v11  ;;  %v647_v13 = vmul.f32 %v1153_v60, %v549_v11 }
  0xbf   : > { %v509_v29 = vld [vmem:[#allocation2 + $0x41] sm:$0xff]  ;;  %v543_v25 = vadd.f32 %v535_v10, %v1155_v61  ;;  %v532_v35 = vadd.f32 %v1115_v33, %v520_v27  ;;  %v619_v39 = vmul.f32 %v1144_v54, %v606_v46  ;;  %v762_v4 = vmul.f32 %v1205_v47, %v606_v46 }
  0xc0   : > { %v654_v18 = vadd.f32 %v646_v8, %v625_v7  ;;  %v551_v30 = vld [vmem:[#allocation2 + $0x40] sm:$0xff]  ;;  %v569_v36 = vadd.f32 %v561_v28, %v541_v43  ;;  %v522_v40 = vmul.f32 %v1108_v20, %v509_v29  ;;  %v592_v59 = vmul.f32 %v1135_v49, %v509_v29  ;;  %v552_v43 = vld [vmem:[#allocation2 + $0x50] sm:$0xff] }
  0xc1   : > { %v563_v42 = vmul.f32 %v1125_v41, %v551_v30  ;;  %v540_v51 = vadd.f32 %v532_v35, %v507_v12  ;;  %v608_v5 = vld [vmem:[#allocation2 + $0x42] sm:$0xff]  ;;  %v525_v7 = vmul.f32 %v1108_v20, %v1207_v48  ;;  %v706_v28 = vmul.f32 %v1178_v22, %v551_v30 }
  0xc2   : > { %v683_v31 = vadd.f32 %v675_v21, %v654_v18  ;;  %v598_v52 = vadd.f32 %v590_v37, %v569_v36  ;;  %v534_v57 = vadd.f32 %v1115_v33, %v522_v40  ;;  %v621_v17 = vmul.f32 %v1144_v54, %v608_v5  ;;  %v609_v40 = vld [vmem:[#allocation2 + $0x52] sm:$0xff] }
  0xc3   : > { %v571_v58 = vadd.f32 %v563_v42, %v543_v25  ;;  %v568_v0 = vadd.f32 %v560_v14, %v540_v51  ;;  %v676_v36 = vmul.f32 %v1162_v3, %v606_v46  ;;  %v705_v37 = vmul.f32 %v1178_v22, %v1166_v9 }
  0xc4   : > { %v712_v53 = vadd.f32 %v704_v38, %v683_v31  ;;  %v627_v1 = vadd.f32 %v619_v39, %v598_v52  ;;  %v542_v8 = vadd.f32 %v534_v57, %v509_v29  ;;  %v620_v31 = vmul.f32 %v1144_v54, %v607_v45 }
  0xc5   : > { %v600_v10 = vadd.f32 %v592_v59, %v571_v58  ;;  %v597_v12 = vadd.f32 %v589_v15, %v568_v0  ;;  %v650_v38 = vmul.f32 %v1153_v60, %v552_v43  ;;  %v764_v44 = vmul.f32 %v1205_v47, %v608_v5 }
  0xc6   : > { %v741_v2 = vadd.f32 %v733_v55, %v712_v53  ;;  %v656_v18 = vadd.f32 %v648_v32, %v627_v1  ;;  %v570_v14 = vadd.f32 %v562_v19, %v542_v8  ;;  %v465_v19 = vadd.f32 %v1086_v63, %v453_v26 }
  0xc7   : > { %v626_v15 = vadd.f32 %v618_v16, %v597_v12  ;;  %v629_v25 = vadd.f32 %v621_v17, %v600_v10  ;;  %v735_v16 = vmul.f32 %v1193_v34, %v509_v29  ;;  %v537_v63 = vadd.f32 %v1115_v33, %v525_v7  ;;  %v610_v7 = vld [vmem:[#allocation2 + $0x62] sm:$0xff] }
  0xc8   : > { %v770_v21 = vadd.f32 %v762_v4, %v741_v2  ;;  %v685_v11 = vadd.f32 %v677_v6, %v656_v18  ;;  %v599_v32 = vadd.f32 %v591_v24, %v570_v14  ;;  %v649_v24 = vmul.f32 %v1153_v60, %v551_v30  ;;  %505 = vst.msk [vmem:[#allocation2 + $0x81] sm:$0xff] %vm466_vm1, %v465_v19  ;;  %v511_v4 = vld [vmem:[#allocation2 + $0x61] sm:$0xff]  ;;  %v554_v14 = vld [vmem:[#allocation2 + $0x70] sm:$0xff] }
  0xc9   : > { %v655_v35 = vadd.f32 %v647_v13, %v626_v15  ;;  %v658_v52 = vadd.f32 %v650_v38, %v629_v25  ;;  %v678_v29 = vmul.f32 %v1162_v3, %v608_v5  ;;  %v734_v9 = vmul.f32 %v1193_v34, %v1137_v50  ;;  %v553_v5 = vld [vmem:[#allocation2 + $0x60] sm:$0xff] }
  0xca   : > { %v778_v27 = vpack.c.bf16 %v770_v21, %v770_v21  ;;  %v714_v56 = vadd.f32 %v706_v28, %v685_v11  ;;  %v628_v39 = vadd.f32 %v620_v31, %v599_v32  ;;  %v763_v30 = vmul.f32 %v1205_v47, %v607_v45 }
  0xcb   : > { %v684_v42 = vadd.f32 %v676_v36, %v655_v35  ;;  %v679_v57 = vmul.f32 %v1162_v3, %v609_v40  ;;  %v707_v58 = vmul.f32 %v1178_v22, %v552_v43  ;;  %v545_v0 = vadd.f32 %v537_v63, %v1207_v48  ;;  %v611_v36 = vld [vmem:[#allocation2 + $0x72] sm:$0xff] }
  0xcc   : > { %787 = vst.msk [vmem:[%s1222_s19] sm:$0xf] %vm786_vm4, %v778_v27  ;;  %v743_v46 = vadd.f32 %v735_v16, %v714_v56  ;;  %v657_v51 = vadd.f32 %v649_v24, %v628_v39  ;;  %v524_v6 = vmul.f32 %v1108_v20, %v511_v4  ;;  %v565_v45 = vmul.f32 %v1125_v41, %v553_v5 }
  0xcd   : > { %v713_v53 = vadd.f32 %v705_v37, %v684_v42  ;;  %v687_v8 = vadd.f32 %v679_v57, %v658_v52  ;;  %v564_v10 = vmul.f32 %v1125_v41, %v552_v43  ;;  %v765_v12 = vmul.f32 %v1205_v47, %v609_v40 }
  0xce   : > { %v772_v55 = vadd.f32 %v764_v44, %v743_v46  ;;  %v686_v59 = vadd.f32 %v678_v29, %v657_v51  ;;  %v594_v18 = vmul.f32 %v1135_v49, %v511_v4  ;;  %v536_v23 = vadd.f32 %v1115_v33, %v524_v6 }
  0xcf   : > { %v742_v1 = vadd.f32 %v734_v9, %v713_v53  ;;  %v513_v21 = vld [vmem:[#allocation2 + $0x81] sm:$0xff]  ;;  %v573_v26 = vadd.f32 %v565_v45, %v545_v0  ;;  %v708_v15 = vmul.f32 %v1178_v22, %v553_v5  ;;  %v623_v11 = vmul.f32 %v1144_v54, %v610_v7  ;;  %v727_v45 = vld [vmem:[#allocation2 + $0x91] sm:$0xff] }
  0xd0   : > { %v780_v2 = vpack.c.bf16 %v772_v55, %v772_v55  ;;  %v715_v50 = vadd.f32 %v707_v58, %v686_v59  ;;  %v737_v43 = vmul.f32 %v1193_v34, %v511_v4  ;;  %v526_v28 = vmul.f32 %v1108_v20, %v513_v21  ;;  %v640_v44 = vld [vmem:[#allocation2 + $0x80] sm:$0xff] }
  0xd1   : > { %v771_v13 = vadd.f32 %v763_v30, %v742_v1  ;;  %v544_v32 = vadd.f32 %v536_v23, %v511_v4  ;;  %v602_v25 = vadd.f32 %v594_v18, %v573_v26  ;;  %v716_v19 = vadd.f32 %v708_v15, %v687_v8  ;;  %v669_v59 = vld [vmem:[#allocation2 + $0x82] sm:$0xff]  ;;  %v698_v1 = vld [vmem:[#allocation2 + $0x90] sm:$0xff] }
  0xd2   : > { %789 = vst.msk [vmem:[%s1222_s19 + $0x8] sm:$0xf] %vm786_vm4, %v780_v2  ;;  %v744_v17 = vadd.f32 %v736_v62, %v715_v50  ;;  %v593_v35 = vmul.f32 %v1135_v49, %v1155_v61  ;;  %v652_v56 = vmul.f32 %v1153_v60, %v554_v14  ;;  %v766_v16 = vmul.f32 %v1205_v47, %v610_v7 }
  0xd3   : > { %v779_v27 = vpack.c.bf16 %v771_v13, %v771_v13  ;;  %v538_v37 = vadd.f32 %v1115_v33, %v526_v28  ;;  %v572_v39 = vadd.f32 %v564_v10, %v544_v32  ;;  %v631_v20 = vadd.f32 %v623_v11, %v602_v25 }
  0xd4   : > { %v773_v31 = vadd.f32 %v765_v12, %v744_v17  ;;  %v745_v24 = vadd.f32 %v737_v43, %v716_v19  ;;  %v622_v63 = vmul.f32 %v1144_v54, %v609_v40  ;;  %v566_v42 = vmul.f32 %v1125_v41, %v554_v14 }
  0xd5   : > { %788 = vst.msk [vmem:[%s1222_s19 + $0x4] sm:$0xf] %vm786_vm4, %v779_v27  ;;  %v546_v46 = vadd.f32 %v538_v37, %v513_v21  ;;  %v681_v61 = vmul.f32 %v1162_v3, %v611_v36  ;;  %v601_v51 = vadd.f32 %v593_v35, %v572_v39  ;;  %v660_v52 = vadd.f32 %v652_v56, %v631_v20 }
  0xd6   : > { %v781_v38 = vpack.c.bf16 %v773_v31, %v773_v31  ;;  %v774_v29 = vadd.f32 %v766_v16, %v745_v24  ;;  %v595_v33 = vmul.f32 %v1135_v49, %v1207_v48  ;;  %v651_v9 = vmul.f32 %v1153_v60, %v553_v5 }
  0xd7   : > { %v574_v53 = vadd.f32 %v566_v42, %v546_v46  ;;  %v630_v55 = vadd.f32 %v622_v63, %v601_v51  ;;  %v689_v30 = vadd.f32 %v681_v61, %v660_v52  ;;  %v710_v41 = vmul.f32 %v1178_v22, %v640_v44 }
  0xd8   : > { %790 = vst.msk [vmem:[%s1222_s19 + $0xc] sm:$0xf] %vm786_vm4, %v781_v38  ;;  %v782_v40 = vpack.c.bf16 %v774_v29, %v774_v29  ;;  %v624_v57 = vmul.f32 %v1144_v54, %v611_v36  ;;  %v680_v0 = vmul.f32 %v1162_v3, %v610_v7  ;;  %v739_v49 = vmul.f32 %v1193_v34, %v513_v21  ;;  %v756_v21 = vld [vmem:[#allocation2 + $0x92] sm:$0xff] }
  0xd9   : > { %v603_v58 = vadd.f32 %v595_v33, %v574_v53  ;;  %v659_v62 = vadd.f32 %v651_v9, %v630_v55  ;;  %v718_v2 = vadd.f32 %v710_v41, %v689_v30  ;;  %v653_v5 = vmul.f32 %v1153_v60, %v640_v44 }
  0xda   : > { %791 = vst.msk [vmem:[%s1222_s19 + $0x10] sm:$0xf] %vm786_vm4, %v782_v40  ;;  %v709_v50 = vmul.f32 %v1178_v22, %v554_v14  ;;  %v768_v54 = vmul.f32 %v1205_v47, %v669_v59  ;;  %v682_v7 = vmul.f32 %v1162_v3, %v669_v59  ;;  %v711_v12 = vmul.f32 %v1178_v22, %v698_v1 }
  0xdb   : > { %v632_v4 = vadd.f32 %v624_v57, %v603_v58  ;;  %v688_v6 = vadd.f32 %v680_v0, %v659_v62  ;;  %v747_v8 = vadd.f32 %v739_v49, %v718_v2  ;;  %v738_v13 = vmul.f32 %v1193_v34, %v1207_v48 }
  0xdc   : > { %v740_v17 = vmul.f32 %v1193_v34, %v727_v45  ;;  %v767_v23 = vmul.f32 %v1205_v47, %v611_v36  ;;  %v769_v3 = vmul.f32 %v1205_v47, %v756_v21 }
  0xdd   : > { %v661_v10 = vadd.f32 %v653_v5, %v632_v4  ;;  %v717_v18 = vadd.f32 %v709_v50, %v688_v6  ;;  %v776_v60 = vadd.f32 %v768_v54, %v747_v8 }
  0xdf   : > { %v690_v14 = vadd.f32 %v682_v7, %v661_v10  ;;  %v746_v26 = vadd.f32 %v738_v13, %v717_v18  ;;  %v784_v15 = vpack.c.bf16 %v776_v60, %v776_v60 }
  0xe1   : > { %v719_v27 = vadd.f32 %v711_v12, %v690_v14  ;;  %v775_v11 = vadd.f32 %v767_v23, %v746_v26  ;;  %793 = vst.msk [vmem:[%s1222_s19 + $0x18] sm:$0xf] %vm786_vm4, %v784_v15 }
  0xe3   : > { %v748_v22 = vadd.f32 %v740_v17, %v719_v27  ;;  %v783_v48 = vpack.c.bf16 %v775_v11, %v775_v11 }
  0xe5   : > { %v777_v43 = vadd.f32 %v769_v3, %v748_v22  ;;  %792 = vst.msk [vmem:[%s1222_s19 + $0x14] sm:$0xf] %vm786_vm4, %v783_v48 }
  0xe7   : > { %v785_v28 = vpack.c.bf16 %v777_v43, %v777_v43 }
  0xe9   : > { %794 = vst.msk [vmem:[%s1222_s19 + $0x1c] sm:$0xf] %vm786_vm4, %v785_v28 }
  0xea PF: > { %s17_s24 = sadd.s32 1, %s955_s24  }
  0xeb   : > { %p14_p4 = scmp.ge.s32.totalorder %s17_s24, 4  }
  0xed   :  { %16 = sbr.rel (!%p14_p4) target bundleno = 1 (0x1), region = 95 }

// kernel: cmt_block_forward.7
= control target key start
LH: loop header
LB: loop body
LE: loop exit
PB: predicated region body
PF: predicated region fallthrough
CT: control target
= control target key end

     0   :  { %s969_s0 = inlined_call_operand.vmem [shape: bf16[128,64], index: 0, kind: input, shape index: {}]   ;;  %s970_s1 = inlined_call_operand.vmem [shape: f32[1,64], index: 1, kind: input, shape index: {}]   ;;  %s971_s2 = inlined_call_operand.vmem [shape: f32[1,64], index: 2, kind: input, shape index: {}]   ;;  %s972_s3 = inlined_call_operand.vmem [shape: bf16[64,32], index: 3, kind: input, shape index: {}]   ;;  %s973_s4 = inlined_call_operand.vmem [shape: f32[1,32], index: 4, kind: input, shape index: {}]   ;;  %s974_s5 = inlined_call_operand.vmem [shape: f32[1,32], index: 5, kind: input, shape index: {}]   ;;  %s975_s6 = inlined_call_operand.vmem [shape: f32[1,32], index: 6, kind: input, shape index: {}]   ;;  %s976_s7 = inlined_call_operand.vmem [shape: bf16[128,32], index: 7, kind: input, shape index: {}]   ;;  %s977_s8 = inlined_call_operand.hbm [shape: f32[128,32], index: 8, kind: output, shape index: {}]  }
   0x1   :  { %v515_v0 = vld [vmem:[%s972_s3 + $0x18] sm:$0xff]  ;;  %v517_v1 = vld [vmem:[%s969_s0] sm:$0xff]   ;;  %v514_v2 = vld [vmem:[%s972_s3 + $0x10] sm:$0xff] }
   0x2   :  { %320 = vmatpush.bf16.msra.mxu0 %v515_v0  ;;  %594 = vmatpush.bf16.msra.mxu1 %v515_v0  ;;  %v518_v3 = vunpack.c.l.bf16 %v517_v1  ;;  %v519_v4 = vunpack.c.h.bf16 %v517_v1  ;;  %v581_v5 = vld [vmem:[%s969_s0 + $0x10] sm:$0xff]   ;;  %v583_v6 = vld [vmem:[%s969_s0 + $0x20] sm:$0xff]   ;;  %v513_v14 = vld [vmem:[%s972_s3 + $0x8] sm:$0xff] }
   0x3   :  { %595 = vmatpush.bf16.msra.mxu2 %v515_v0  ;;  %596 = vmatpush.bf16.msra.mxu3 %v515_v0  ;;  %v585_v9 = vld [vmem:[%s969_s0 + $0x30] sm:$0xff]   ;;  %v526_v10 = vunpack.c.l.bf16 %v581_v5  ;;  %v527_v11 = vunpack.c.h.bf16 %v581_v5  ;;  %v534_v12 = vunpack.c.l.bf16 %v583_v6  ;;  %v535_v13 = vunpack.c.h.bf16 %v583_v6 }
   0x4   :  { %v79_v7 = vmul.f32 0.044715, %v518_v3  ;;  %v80_v8 = vmul.f32 0.044715, %v519_v4  ;;  %v741_v15 = vmul.f32 0.5, %v518_v3  ;;  %v743_v18 = vmul.f32 0.5, %v519_v4 }
   0x5   :  { %v83_v19 = vmul.f32 0.044715, %v526_v10  ;;  %v84_v20 = vmul.f32 0.044715, %v527_v11  ;;  %v542_v21 = vunpack.c.l.bf16 %v585_v9  ;;  %v745_v24 = vmul.f32 0.5, %v526_v10 }
   0x6   :  { %321 = vmatpush.bf16.msra.mxu0 %v514_v2  ;;  %597 = vmatpush.bf16.msra.mxu1 %v514_v2  ;;  %v95_v16 = vmul.f32 %v518_v3, %v79_v7  ;;  %v96_v17 = vmul.f32 %v519_v4, %v80_v8  ;;  %v747_v25 = vunpack.c.h.bf16 %v585_v9 }
   0x7   :  { %598 = vmatpush.bf16.msra.mxu2 %v514_v2  ;;  %599 = vmatpush.bf16.msra.mxu3 %v514_v2 }
   0x8   :  { %v111_v22 = vmul.f32 %v518_v3, %v95_v16  ;;  %v112_v23 = vmul.f32 %v519_v4, %v96_v17 }
   0x9   :  { %13 = vsyncpa [#allocation3], 0  ;;  %v99_v26 = vmul.f32 %v526_v10, %v83_v19  ;;  %v100_v27 = vmul.f32 %v527_v11, %v84_v20  ;;  %v87_v28 = vmul.f32 0.044715, %v534_v12  ;;  %v88_v29 = vmul.f32 0.044715, %v535_v13 }
   0xa   :  { %322 = vmatpush.bf16.msra.mxu0 %v513_v14  ;;  %600 = vmatpush.bf16.msra.mxu1 %v513_v14  ;;  %v512_v30 = vld [vmem:[%s972_s3] sm:$0xff]  ;;  %v127_v31 = vadd.f32 %v518_v3, %v111_v22  ;;  %v128_v32 = vadd.f32 %v519_v4, %v112_v23  ;;  %v752_v33 = vmul.f32 0.5, %v527_v11  ;;  %v754_v34 = vmul.f32 0.5, %v534_v12  ;;  %v580_v39 = vld [vmem:[%s969_s0 + $0x8] sm:$0xff]   ;;  %v582_v61 = vld [vmem:[%s969_s0 + $0x18] sm:$0xff]   ;;  %s674_s28 = smov 8  }
   0xb   :  { %601 = vmatpush.bf16.msra.mxu2 %v513_v14  ;;  %602 = vmatpush.bf16.msra.mxu3 %v513_v14  ;;  %v115_v35 = vmul.f32 %v526_v10, %v99_v26  ;;  %v116_v36 = vmul.f32 %v527_v11, %v100_v27  ;;  %v103_v37 = vmul.f32 %v534_v12, %v87_v28  ;;  %v91_v38 = vmul.f32 0.044715, %v542_v21 }
   0xc   :  { %v143_v40 = vmul.f32 0.7978846, %v127_v31  ;;  %v144_v41 = vmul.f32 0.7978846, %v128_v32  ;;  %v104_v42 = vmul.f32 %v535_v13, %v88_v29  ;;  %v92_v43 = vmul.f32 0.044715, %v747_v25 }
   0xd   :  { %v131_v44 = vadd.f32 %v526_v10, %v115_v35  ;;  %v132_v45 = vadd.f32 %v527_v11, %v116_v36  ;;  %v119_v46 = vmul.f32 %v534_v12, %v103_v37  ;;  %v107_v47 = vmul.f32 %v542_v21, %v91_v38  ;;  %v774_v10 = vld [vmem:[%s970_s1] ss:$0 sm:$0xff]  ;;  %s476_s1 = sshll.u32 %s977_s8, 4  ;;  %s477_s1 = int_to_ptr.hbm [resolvable:$true] %s476_s1 }
   0xe   :  { %323 = vmatpush.bf16.msra.mxu0 %v512_v30  ;;  %603 = vmatpush.bf16.msra.mxu1 %v512_v30  ;;  %614 = vtanh.f32 %v143_v40  ;;  %v120_v48 = vmul.f32 %v535_v13, %v104_v42  ;;  %v108_v49 = vmul.f32 %v747_v25, %v92_v43  ;;  %v522_v50 = vunpack.c.l.bf16 %v580_v39 }
   0xf   :  { %604 = vmatpush.bf16.msra.mxu2 %v512_v30  ;;  %605 = vmatpush.bf16.msra.mxu3 %v512_v30  ;;  %616 = vtanh.f32 %v144_v41  ;;  %v147_v51 = vmul.f32 0.7978846, %v131_v44  ;;  %v148_v52 = vmul.f32 0.7978846, %v132_v45  ;;  %v135_v53 = vadd.f32 %v534_v12, %v119_v46 }
  0x10   :  { %v136_v54 = vadd.f32 %v535_v13, %v120_v48  ;;  %v123_v55 = vmul.f32 %v542_v21, %v107_v47  ;;  %v124_v56 = vmul.f32 %v747_v25, %v108_v49  ;;  %v762_v57 = vunpack.c.h.bf16 %v580_v39 }
  0x11   :  { %618 = vtanh.f32 %v147_v51  ;;  %v72_v58 = vmul.f32 0.5, %v535_v13  ;;  %v151_v59 = vmul.f32 0.7978846, %v135_v53  ;;  %v81_v60 = vmul.f32 0.044715, %v522_v50 }
  0x12   :  { %620 = vtanh.f32 %v148_v52  ;;  %v152_v62 = vmul.f32 0.7978846, %v136_v54  ;;  %v139_v63 = vadd.f32 %v542_v21, %v123_v55  ;;  %v140_v0 = vadd.f32 %v747_v25, %v124_v56 }
  0x13   :  { %622 = vtanh.f32 %v151_v59  ;;  %v75_v1 = vmul.f32 0.5, %v542_v21  ;;  %v82_v2 = vmul.f32 0.044715, %v762_v57  ;;  %v97_v3 = vmul.f32 %v522_v50, %v81_v60  ;;  %v785_v21 = vld [vmem:[%s971_s2] ss:$0 sm:$0xff]  ;;  %s673_s2 = smov 128  }
  0x14   :  { %v615_v4 = vpop.eup %614  ;;  %624 = vtanh.f32 %v152_v62  ;;  %v155_v5 = vmul.f32 0.7978846, %v139_v63  ;;  %v156_v6 = vmul.f32 0.7978846, %v140_v0  ;;  %v769_v7 = vunpack.c.l.bf16 %v582_v61 }
  0x15   :  { %v617_v8 = vpop.eup %616  ;;  %v175_v9 = vadd.f32 1.0, %v615_v4  ;;  %vm291_vm0 = vcmask 523264   ;;  %v98_v11 = vmul.f32 %v762_v57, %v82_v2  ;;  %v113_v12 = vmul.f32 %v522_v50, %v97_v3 }
  0x16   :  { %v777_v13 = vunpack.c.h.bf16 %v582_v61  ;;  %v176_v14 = vadd.f32 1.0, %v617_v8  ;;  %v76_v16 = vmul.f32 0.5, %v747_v25  ;;  %626 = vtanh.f32 %v155_v5 }
  0x17   :  { %v85_v17 = vmul.f32 0.044715, %v769_v7  ;;  %v619_v19 = vpop.eup %618  ;;  %v191_v20 = vmul.f32 %v175_v9, %v741_v15  ;;  %628 = vtanh.f32 %v156_v6  ;;  %v114_v22 = vmul.f32 %v762_v57, %v98_v11 }
  0x18   :  { %v129_v23 = vadd.f32 %v522_v50, %v113_v12  ;;  %v621_v26 = vpop.eup %620  ;;  %v192_v27 = vmul.f32 %v176_v14, %v743_v18  ;;  %v179_v28 = vadd.f32 1.0, %v619_v19  ;;  %v65_v25 = vmul.f32 0.5, %v522_v50 }
  0x19   :  { %v86_v29 = vmul.f32 0.044715, %v777_v13  ;;  %v623_v30 = vpop.eup %622  ;;  %v211_v31 = vmul.f32 %v774_v10, %v191_v20  ;;  %v180_v15 = vadd.f32 1.0, %v621_v26  ;;  %v130_v32 = vadd.f32 %v762_v57, %v114_v22 }
  0x1a   :  { %v145_v35 = vmul.f32 0.7978846, %v129_v23  ;;  %v625_v36 = vpop.eup %624  ;;  %v212_v37 = vmul.f32 %v774_v10, %v192_v27  ;;  %v195_v38 = vmul.f32 %v179_v28, %v745_v24  ;;  %v183_v39 = vadd.f32 1.0, %v623_v30 }
  0x1b   :  { %v101_v40 = vmul.f32 %v769_v7, %v85_v17  ;;  %v231_v18 = vadd.f32 %v785_v21, %v211_v31  ;;  %v196_v41 = vmul.f32 %v180_v15, %v752_v33  ;;  %v184_v42 = vadd.f32 1.0, %v625_v36  ;;  %v584_v33 = vld [vmem:[%s969_s0 + $0x28] sm:$0xff]   ;;  %v586_v17 = vld [vmem:[%s969_s0 + $0x38] sm:$0xff]  }
  0x1c   :  { %v146_v43 = vmul.f32 0.7978846, %v130_v32  ;;  %v627_v44 = vpop.eup %626  ;;  %v232_v45 = vadd.f32 %v785_v21, %v212_v37  ;;  %v215_v46 = vmul.f32 %v774_v10, %v195_v38  ;;  %v199_v47 = vmul.f32 %v183_v39, %v754_v34 }
  0x1d   :  { %630 = vtanh.f32 %v145_v35  ;;  %v629_v48 = vpop.eup %628  ;;  %v216_v24 = vmul.f32 %v774_v10, %v196_v41  ;;  %v200_v49 = vmul.f32 %v184_v42, %v72_v58  ;;  %v187_v50 = vadd.f32 1.0, %v627_v44 }
  0x1e   :  { %632 = vtanh.f32 %v146_v43  ;;  %v247_v51 = vpack.c.bf16 %v232_v45, %v231_v18  ;;  %v235_v52 = vadd.f32 %v785_v21, %v215_v46  ;;  %v219_v53 = vmul.f32 %v774_v10, %v199_v47 }
  0x1f   :  { %v188_v54 = vadd.f32 1.0, %v629_v48  ;;  %v236_v55 = vadd.f32 %v785_v21, %v216_v24  ;;  %v220_v34 = vmul.f32 %v774_v10, %v200_v49  ;;  %v203_v56 = vmul.f32 %v187_v50, %v75_v1 }
  0x20   :  { %v102_v59 = vmul.f32 %v777_v13, %v86_v29  ;;  %504 = vmatmul.msk.bf16.vlgmr.msra.gmra.mxu0 %vm291_vm0, %v247_v51  ;;  %v239_v58 = vadd.f32 %v785_v21, %v219_v53  ;;  %v117_v61 = vmul.f32 %v769_v7, %v101_v40  ;;  %v812_v62 = vunpack.c.l.bf16 %v584_v33 }
  0x21   :  { %v204_v60 = vmul.f32 %v188_v54, %v76_v16  ;;  %v249_v63 = vpack.c.bf16 %v236_v55, %v235_v52  ;;  %v240_v0 = vadd.f32 %v785_v21, %v220_v34  ;;  %v223_v2 = vmul.f32 %v774_v10, %v203_v56 }
  0x22   :  { %v118_v3 = vmul.f32 %v777_v13, %v102_v59  ;;  %v66_v5 = vmul.f32 0.5, %v762_v57  ;;  %v133_v6 = vadd.f32 %v769_v7, %v117_v61  ;;  %v820_v8 = vunpack.c.h.bf16 %v584_v33 }
  0x23   :  { %v631_v4 = vpop.eup %630  ;;  %v224_v1 = vmul.f32 %v774_v10, %v204_v60  ;;  %506 = vmatmul.msk.bf16.vlgmr.msra.gmra.mxu1 %vm291_vm0, %v249_v63  ;;  %v251_v11 = vpack.c.bf16 %v240_v0, %v239_v58  ;;  %v243_v12 = vadd.f32 %v785_v21, %v223_v2  ;;  %v89_v26 = vmul.f32 0.044715, %v812_v62 }
  0x24   :  { %v633_v9 = vpop.eup %632  ;;  %v177_v14 = vadd.f32 1.0, %v631_v4  ;;  %v134_v16 = vadd.f32 %v777_v13, %v118_v3  ;;  %v149_v20 = vmul.f32 0.7978846, %v133_v6  ;;  %v90_v27 = vmul.f32 0.044715, %v820_v8 }
  0x25   :  { %v244_v19 = vadd.f32 %v785_v21, %v224_v1  ;;  %v178_v57 = vadd.f32 1.0, %v633_v9  ;;  %508 = vmatmul.msk.bf16.vlgmr.msra.gmra.mxu2 %vm291_vm0, %v251_v11  ;;  %v546_v30 = vunpack.c.l.bf16 %v586_v17  ;;  %v105_v15 = vmul.f32 %v812_v62, %v89_v26 }
  0x26   :  { %v193_v22 = vmul.f32 %v177_v14, %v65_v25  ;;  %v150_v23 = vmul.f32 0.7978846, %v134_v16  ;;  %634 = vtanh.f32 %v149_v20  ;;  %v106_v32 = vmul.f32 %v820_v8, %v90_v27 }
  0x27   :  { %v253_v28 = vpack.c.bf16 %v244_v19, %v243_v12  ;;  %v194_v29 = vmul.f32 %v178_v57, %v66_v5  ;;  %v547_v35 = vunpack.c.h.bf16 %v586_v17  ;;  %v93_v36 = vmul.f32 0.044715, %v546_v30 }
  0x28   :  { %v213_v31 = vmul.f32 %v774_v10, %v193_v22  ;;  %636 = vtanh.f32 %v150_v23  ;;  %v121_v38 = vmul.f32 %v812_v62, %v105_v15  ;;  %v122_v39 = vmul.f32 %v820_v8, %v106_v32  ;;  %v866_v15 = vld [vmem:[%s973_s4] ss:$0 sm:$0xff] }
  0x29   :  { %510 = vmatmul.msk.bf16.vlgmr.msra.gmra.mxu3 %vm291_vm0, %v253_v28  ;;  %v214_v25 = vmul.f32 %v774_v10, %v194_v29  ;;  %v94_v18 = vmul.f32 0.044715, %v547_v35  ;;  %v109_v41 = vmul.f32 %v546_v30, %v93_v36  ;;  %v69_v42 = vmul.f32 0.5, %v769_v7  ;;  %v871_v32 = vld [vmem:[%s974_s5] ss:$0 sm:$0xff] }
  0x2a   :  { %v233_v37 = vadd.f32 %v785_v21, %v213_v31  ;;  %v137_v43 = vadd.f32 %v812_v62, %v121_v38  ;;  %v138_v44 = vadd.f32 %v820_v8, %v122_v39  ;;  %v70_v47 = vmul.f32 0.5, %v777_v13  ;;  %v588_v39 = vld [vmem:[%s976_s7 + $0x10] sm:$0xff]  }
  0x2b   :  { %v234_v40 = vadd.f32 %v785_v21, %v214_v25  ;;  %v110_v48 = vmul.f32 %v547_v35, %v94_v18  ;;  %v125_v24 = vmul.f32 %v546_v30, %v109_v41  ;;  %v73_v63 = vmul.f32 0.5, %v812_v62  ;;  %v549_v25 = vld [vmem:[%s976_s7] sm:$0xff]  }
  0x2c   :  { %v635_v45 = vpop.eup %634  ;;  %v153_v33 = vmul.f32 0.7978846, %v137_v43  ;;  %v154_v51 = vmul.f32 0.7978846, %v138_v44  ;;  %v74_v2 = vmul.f32 0.5, %v820_v8  ;;  %v77_v6 = vmul.f32 0.5, %v546_v30 }
  0x2d   :  { %v248_v46 = vpack.c.bf16 %v234_v40, %v233_v37  ;;  %v181_v50 = vadd.f32 1.0, %v635_v45  ;;  %v126_v53 = vmul.f32 %v547_v35, %v110_v48  ;;  %v141_v54 = vadd.f32 %v546_v30, %v125_v24  ;;  %v590_v24 = vld [vmem:[%s976_s7 + $0x20] sm:$0xff]  }
  0x2e   :  { %v637_v49 = vpop.eup %636  ;;  %638 = vtanh.f32 %v153_v33  ;;  %v78_v14 = vmul.f32 0.5, %v547_v35  ;;  %v550_v37 = vunpack.c.l.bf16 %v549_v25  ;;  %vm453_vm1 = vcmask 261120  }
  0x2f   :  { %v182_v52 = vadd.f32 1.0, %v637_v49  ;;  %v197_v55 = vmul.f32 %v181_v50, %v69_v42  ;;  %640 = vtanh.f32 %v154_v51  ;;  %v142_v34 = vadd.f32 %v547_v35, %v126_v53  ;;  %v880_v35 = vld [vmem:[%s975_s6] ss:$0 sm:$0xff] }
  0x30   :  { %505 = vmatmul.msk.bf16.gmra.mxu0 %vm291_vm0, %v248_v46  ;;  %v157_v56 = vmul.f32 0.7978846, %v141_v54  ;;  %v558_v42 = vunpack.c.l.bf16 %v588_v39  ;;  %v551_v50 = vunpack.c.h.bf16 %v549_v25 }
  0x31   :  { %v198_v7 = vmul.f32 %v182_v52, %v70_v47  ;;  %v217_v59 = vmul.f32 %v774_v10, %v197_v55  ;;  %v158_v58 = vmul.f32 0.7978846, %v142_v34  ;;  %v566_v55 = vunpack.c.l.bf16 %v590_v24  ;;  %v592_v34 = vld [vmem:[%s976_s7 + $0x30] sm:$0xff]  }
  0x32   :  { %642 = vtanh.f32 %v157_v56 }
  0x33   :  { %v218_v13 = vmul.f32 %v774_v10, %v198_v7  ;;  %v237_v60 = vadd.f32 %v785_v21, %v217_v59  ;;  %644 = vtanh.f32 %v158_v58  ;;  %v559_v59 = vunpack.c.h.bf16 %v588_v39 }
  0x34   :  { %v639_v0 = vpop.eup %638 }
  0x35   :  { %v238_v61 = vadd.f32 %v785_v21, %v218_v13  ;;  %v641_v3 = vpop.eup %640  ;;  %v185_v1 = vadd.f32 1.0, %v639_v0  ;;  %v587_v0 = vld [vmem:[%s976_s7 + $0x8] sm:$0xff]  }
  0x36   :  { %v186_v5 = vadd.f32 1.0, %v641_v3  ;;  %v574_v3 = vunpack.c.l.bf16 %v592_v34 }
  0x37   :  { %v250_v4 = vpack.c.bf16 %v238_v61, %v237_v60  ;;  %v201_v11 = vmul.f32 %v185_v1, %v73_v63 }
  0x38   :  { %v643_v9 = vpop.eup %642  ;;  %v202_v12 = vmul.f32 %v186_v5, %v74_v2 }
  0x39   :  { %507 = vmatmul.msk.bf16.gmra.mxu1 %vm291_vm0, %v250_v4  ;;  %v189_v16 = vadd.f32 1.0, %v643_v9  ;;  %v645_v17 = vpop.eup %644  ;;  %v221_v19 = vmul.f32 %v774_v10, %v201_v11 }
  0x3a   :  { %v222_v62 = vmul.f32 %v774_v10, %v202_v12  ;;  %v190_v57 = vadd.f32 1.0, %v645_v17  ;;  %v554_v12 = vunpack.c.l.bf16 %v587_v0 }
  0x3b   :  { %v205_v20 = vmul.f32 %v189_v16, %v77_v6  ;;  %v241_v8 = vadd.f32 %v785_v21, %v221_v19 }
  0x3c   :  { %v242_v22 = vadd.f32 %v785_v21, %v222_v62  ;;  %v206_v23 = vmul.f32 %v190_v57, %v78_v14  ;;  %v567_v62 = vunpack.c.h.bf16 %v590_v24  ;;  %v591_v24 = vld [vmem:[%s976_s7 + $0x28] sm:$0xff]  }
  0x3d   :  { %v225_v26 = vmul.f32 %v774_v10, %v205_v20 }
  0x3e   :  { %v252_v27 = vpack.c.bf16 %v242_v22, %v241_v8  ;;  %v226_v28 = vmul.f32 %v774_v10, %v206_v23  ;;  %v589_v22 = vld [vmem:[%s976_s7 + $0x18] sm:$0xff]  }
  0x3f   :  { %v245_v29 = vadd.f32 %v785_v21, %v225_v26  ;;  %v562_v25 = vunpack.c.l.bf16 %v589_v22 }
  0x40   :  { %509 = vmatmul.msk.bf16.gmra.mxu2 %vm291_vm0, %v252_v27  ;;  %v246_v30 = vadd.f32 %v785_v21, %v226_v28 }
  0x42   :  { %v254_v31 = vpack.c.bf16 %v246_v30, %v245_v29  ;;  %v575_v29 = vunpack.c.h.bf16 %v592_v34 }
  0x44   :  { %511 = vmatmul.msk.bf16.gmra.mxu3 %vm291_vm0, %v254_v31 }
  0x9d   :  { %v325_v10 = vpop.f32.mrf.mxu0 }
  0x9e   :  { %v326_v21 = vadd.f32 %v866_v15, %v325_v10 }
  0xa0   :  { %v369_v36 = vmul.f32 %v871_v32, %v326_v21  ;;  %v335_v38 = vpop.f32.mrf.mxu1 }
  0xa1   :  { %v336_v40 = vadd.f32 %v866_v15, %v335_v38  ;;  %v555_v38 = vunpack.c.h.bf16 %v587_v0 }
  0xa2   :  { %v389_v18 = vadd.f32 %v880_v35, %v369_v36 }
  0xa3   :  { %v373_v41 = vmul.f32 %v871_v32, %v336_v40 }
  0xa4   :  { %v437_v43 = vadd.f32 %v550_v37, %v389_v18 }
  0xa5   :  { %v393_v44 = vadd.f32 %v880_v35, %v373_v41  ;;  %v327_v45 = vpop.f32.mrf.mxu0 }
  0xa6   :  { %454 = vst.msk [vmem:[#allocation2] sm:$0xff] %vm453_vm1, %v437_v43  ;;  %v328_v46 = vadd.f32 %v866_v15, %v327_v45 }
  0xa7   :  { %v441_v47 = vadd.f32 %v558_v42, %v393_v44 }
  0xa8   :  { %v345_v48 = vpop.f32.mrf.mxu2  ;;  %v370_v49 = vmul.f32 %v871_v32, %v328_v46  ;;  %v337_v33 = vpop.f32.mrf.mxu1  ;;  %v563_v46 = vunpack.c.h.bf16 %v589_v22 }
  0xa9   :  { %458 = vst.msk [vmem:[#allocation2 + $0x20] sm:$0xff] %vm453_vm1, %v441_v47  ;;  %v346_v51 = vadd.f32 %v866_v15, %v345_v48  ;;  %v338_v52 = vadd.f32 %v866_v15, %v337_v33 }
  0xaa   :  { %v390_v53 = vadd.f32 %v880_v35, %v370_v49 }
  0xab   :  { %v377_v54 = vmul.f32 %v871_v32, %v346_v51  ;;  %v374_v56 = vmul.f32 %v871_v32, %v338_v52  ;;  %v570_v51 = vunpack.c.l.bf16 %v591_v24 }
  0xac   :  { %v355_v7 = vpop.f32.mrf.mxu3  ;;  %v438_v58 = vadd.f32 %v551_v50, %v390_v53  ;;  %v593_v53 = vld [vmem:[%s976_s7 + $0x38] sm:$0xff]   ;;  %s672_s7 = smov [#allocation2]  }
  0xad   :  { %v356_v13 = vadd.f32 %v866_v15, %v355_v7  ;;  %v397_v60 = vadd.f32 %v880_v35, %v377_v54  ;;  %v394_v61 = vadd.f32 %v880_v35, %v374_v56  ;;  %v330_v63 = vpop.f32.mrf.mxu0  ;;  %v578_v56 = vunpack.c.l.bf16 %v593_v53  ;;  %s474_s25 = sshll.u32 %s672_s7, 4  ;;  %s475_s25 = int_to_ptr.vmem [resolvable:$true] %s474_s25 }
  0xae   :  { %455 = vst.msk [vmem:[#allocation2 + $0x8] sm:$0xff] %vm453_vm1, %v438_v58  ;;  %v331_v4 = vadd.f32 %v866_v15, %v330_v63  ;;  %v571_v63 = vunpack.c.h.bf16 %v591_v24 }
  0xaf   :  { %v381_v2 = vmul.f32 %v871_v32, %v356_v13  ;;  %v445_v1 = vadd.f32 %v566_v55, %v397_v60  ;;  %v442_v5 = vadd.f32 %v559_v59, %v394_v61 }
  0xb0   :  { %v347_v9 = vpop.f32.mrf.mxu2  ;;  %v371_v11 = vmul.f32 %v871_v32, %v331_v4 }
  0xb1   :  { %v401_v6 = vadd.f32 %v880_v35, %v381_v2  ;;  %462 = vst.msk [vmem:[#allocation2 + $0x40] sm:$0xff] %vm453_vm1, %v445_v1  ;;  %v348_v14 = vadd.f32 %v866_v15, %v347_v9 }
  0xb2   :  { %459 = vst.msk [vmem:[#allocation2 + $0x28] sm:$0xff] %vm453_vm1, %v442_v5  ;;  %v391_v17 = vadd.f32 %v880_v35, %v371_v11  ;;  %v579_v5 = vunpack.c.h.bf16 %v593_v53 }
  0xb3   :  { %v449_v16 = vadd.f32 %v574_v3, %v401_v6  ;;  %v378_v19 = vmul.f32 %v871_v32, %v348_v14 }
  0xb4   :  { %v357_v57 = vpop.f32.mrf.mxu3  ;;  %v439_v8 = vadd.f32 %v554_v12, %v391_v17 }
  0xb5   :  { %466 = vst.msk [vmem:[#allocation2 + $0x60] sm:$0xff] %vm453_vm1, %v449_v16  ;;  %v358_v20 = vadd.f32 %v866_v15, %v357_v57  ;;  %v398_v23 = vadd.f32 %v880_v35, %v378_v19  ;;  %v332_v27 = vpop.f32.mrf.mxu0 }
  0xb6   :  { %v340_v26 = vpop.f32.mrf.mxu1  ;;  %456 = vst.msk [vmem:[#allocation2 + $0x10] sm:$0xff] %vm453_vm1, %v439_v8  ;;  %v333_v31 = vadd.f32 %v866_v15, %v332_v27 }
  0xb7   :  { %v382_v28 = vmul.f32 %v871_v32, %v358_v20  ;;  %v341_v30 = vadd.f32 %v866_v15, %v340_v26  ;;  %v446_v10 = vadd.f32 %v567_v62, %v398_v23 }
  0xb8   :  { %v372_v37 = vmul.f32 %v871_v32, %v333_v31 }
  0xb9   :  { %v402_v21 = vadd.f32 %v880_v35, %v382_v28  ;;  %v375_v36 = vmul.f32 %v871_v32, %v341_v30  ;;  %463 = vst.msk [vmem:[#allocation2 + $0x48] sm:$0xff] %vm453_vm1, %v446_v10 }
  0xba   :  { %v392_v18 = vadd.f32 %v880_v35, %v372_v37 }
  0xbb   :  { %v450_v39 = vadd.f32 %v575_v29, %v402_v21  ;;  %v395_v40 = vadd.f32 %v880_v35, %v375_v36 }
  0xbc   :  { %v440_v42 = vadd.f32 %v555_v38, %v392_v18 }
  0xbd   :  { %467 = vst.msk [vmem:[#allocation2 + $0x68] sm:$0xff] %vm453_vm1, %v450_v39  ;;  %v443_v41 = vadd.f32 %v562_v25, %v395_v40 }
  0xbe   :  { %v342_v43 = vpop.f32.mrf.mxu1  ;;  %457 = vst.msk [vmem:[#allocation2 + $0x18] sm:$0xff] %vm453_vm1, %v440_v42 }
  0xbf   :  { %460 = vst.msk [vmem:[#allocation2 + $0x30] sm:$0xff] %vm453_vm1, %v443_v41  ;;  %v343_v44 = vadd.f32 %v866_v15, %v342_v43 }
  0xc1   :  { %v376_v45 = vmul.f32 %v871_v32, %v343_v44 }
  0xc3   :  { %v396_v47 = vadd.f32 %v880_v35, %v376_v45  ;;  %v350_v48 = vpop.f32.mrf.mxu2 }
  0xc4   :  { %v351_v50 = vadd.f32 %v866_v15, %v350_v48 }
  0xc5   :  { %v444_v49 = vadd.f32 %v563_v46, %v396_v47 }
  0xc6   :  { %v379_v33 = vmul.f32 %v871_v32, %v351_v50 }
  0xc7   :  { %461 = vst.msk [vmem:[#allocation2 + $0x38] sm:$0xff] %vm453_vm1, %v444_v49  ;;  %v360_v52 = vpop.f32.mrf.mxu3 }
  0xc8   :  { %v399_v54 = vadd.f32 %v880_v35, %v379_v33  ;;  %v361_v55 = vadd.f32 %v866_v15, %v360_v52 }
  0xca   :  { %v447_v7 = vadd.f32 %v570_v51, %v399_v54  ;;  %v383_v34 = vmul.f32 %v871_v32, %v361_v55 }
  0xcb   :  { %v352_v59 = vpop.f32.mrf.mxu2 }
  0xcc   :  { %464 = vst.msk [vmem:[#allocation2 + $0x50] sm:$0xff] %vm453_vm1, %v447_v7  ;;  %v403_v13 = vadd.f32 %v880_v35, %v383_v34  ;;  %v353_v58 = vadd.f32 %v866_v15, %v352_v59 }
  0xce   :  { %v451_v60 = vadd.f32 %v578_v56, %v403_v13  ;;  %v380_v61 = vmul.f32 %v871_v32, %v353_v58 }
  0xcf   :  { %v362_v0 = vpop.f32.mrf.mxu3 }
  0xd0   :  { %468 = vst.msk [vmem:[#allocation2 + $0x70] sm:$0xff] %vm453_vm1, %v451_v60  ;;  %v400_v2 = vadd.f32 %v880_v35, %v380_v61  ;;  %v363_v3 = vadd.f32 %v866_v15, %v362_v0 }
  0xd2   :  { %v448_v4 = vadd.f32 %v571_v63, %v400_v2  ;;  %v384_v1 = vmul.f32 %v871_v32, %v363_v3 }
  0xd4   :  { %465 = vst.msk [vmem:[#allocation2 + $0x58] sm:$0xff] %vm453_vm1, %v448_v4  ;;  %v404_v6 = vadd.f32 %v880_v35, %v384_v1 }
  0xd6   :  { %v452_v9 = vadd.f32 %v579_v5, %v404_v6 }
  0xd8   :  { %469 = vst.msk [vmem:[#allocation2 + $0x78] sm:$0xff] %vm453_vm1, %v452_v9 }
  0xd9   :  { %482 = dma.vmem_to_hbm [thread:$0]  %s475_s25, 2048, %s477_s1, [#allocation3], %s673_s2, %s673_s2, %s674_s28  }
  0xda   :  { %670 = dma.done.wait [#allocation3], 2048  }
  0xdb   :  { %671 = vsyncadd [#allocation3], 4294965248 }
  0xdc   :  { %487 = vsyncpa [#allocation3], 1 }

// kernel: cmt_block_forward.4
= control target key start
LH: loop header
LB: loop body
LE: loop exit
PB: predicated region body
PF: predicated region fallthrough
CT: control target
= control target key end

     0   :  { %12 = vsyncpa [#allocation4], 0  ;;  %s1505_s0 = inlined_call_operand.hbm [shape: f32[2,8,8,32], index: 0, kind: input, shape index: {}]   ;;  %s1506_s1 = inlined_call_operand.vmem [shape: f32[9,1,1,32], index: 1, kind: input, shape index: {}]   ;;  %s1507_s2 = inlined_call_operand.vmem [shape: f32[1,1,32], index: 2, kind: input, shape index: {}]   ;;  %s1508_s3 = inlined_call_operand.vmem [shape: f32[1,1,32], index: 3, kind: input, shape index: {}]   ;;  %s1509_s4 = inlined_call_operand.vmem [shape: f32[1,1,32], index: 4, kind: input, shape index: {}]   ;;  %s1510_s5 = inlined_call_operand.vmem [shape: bf16[2,8,8,32], index: 5, kind: output, shape index: {0}]   ;;  %s1511_s6 = inlined_call_operand.vmem [shape: bf16[2,8,8,32], index: 6, kind: output, shape index: {1}]  }
   0x1   :  { %14 = vsyncpa [#allocation4 + $0x1], 0  ;;  %s1052_s21 = smov 0   ;;  %s1054_s22 = smov 0  }
   0x2   :  { %s1056_s23 = smov 0   ;;  %s1058_s24 = smov 0  }
   0x3 LB: > { %s1071_s25 = sadd.s32 4294967295, %s1011_s24   ;;  %s1074_s26 = sadd.s32 1, %s1011_s24   ;;  %s1011_s24 = sphi %s1058_s24, %s1536_s24   ;;  %s1007_s23 = sphi %s1056_s23, %s1535_s23   ;;  %s1003_s22 = sphi %s1054_s22, %s1534_s22   ;;  %s999_s21 = sphi %s1052_s21, %s1533_s21  }
   0x4   : > { %s24_s27 = ssub.s32 %s1011_s24, %s1074_s26  ;;  %s27_s28 = sadd.s32 1, %s1007_s23 }
   0x5   : > { %p25_p0 = scmp.eq.s32.totalorder %s24_s27, 0  ;;  %p34_p1 = scmp.ne.s32.totalorder %s1007_s23, %s1003_s22 }
   0x6   : > { %p35_p2 = scmp.eq.s32.totalorder %s1011_s24, 0  ;;  %p40_p3 = scmp.ne.s32.totalorder %s1003_s22, %s999_s21 }
   0x7   : > { %s1084_s29 = scalar_select %p25_p0, %s1007_s23, %s27_s28  }
   0x8   : > { %p1086_p4 = por %p35_p2, %p34_p1  ;;  %p41_p5 = scmp.eq.s32.totalorder %s1071_s25, 0 }
   0x9   : > { %p894_p6 = scmp.lt.s32.totalorder %s1011_s24, 2  ;;  %s212_s8 = sand.u32 1, %s1007_s23  }
   0xa   : > { %p1092_p7 = por %p41_p5, %p40_p3  ;;  %s858_s9 = sshll.u32 %s212_s8, 6 }
   0xb   : > { %s877_s10 = sshll.u32 %s1011_s24, 6  ;;  %s216_s14 = scalar_lea.vmem [#allocation3], %s858_s9 }
   0xc   : > { %s221_s13 = scalar_lea.hbm %s1505_s0, %s877_s10  ;;  %s224_s15 = sshll.u32 %s216_s14, 4  ;;  %s225_s15 = int_to_ptr.vmem [resolvable:$true] %s224_s15 }
   0xd   : > { %s222_s16 = sshll.u32 %s221_s13, 4  ;;  %p1103_p8 = pnand %p894_p6, %p1086_p4  ;;  %s223_s16 = int_to_ptr.hbm [resolvable:$true] %s222_s16 }
   0xe   : > { %p861_p9 = scmp.ge.s32.totalorder %s1011_s24, 1  ;;  %s213_s18 = scalar_lea.sflag [#allocation4], %s212_s8 }
   0xf   : > { %s947_s19 = sshra.s32 %s223_s16, 4  ;;  %p951_p11 = pneg %p1103_p8  ;;  %s948_s19 = int_to_ptr.hbm [resolvable:$true] %s947_s19 }
  0x10   : > { %s949_s20 = scalar_lea.hbm %s948_s19, 64  ;;  %s954_s28 = scalar_lea.hbm %s1505_s0, 128 }
  0x11   : > { %p950_p10 = scmp.ne.s32.totalorder %s948_s19, %s949_s20  ;;  %p955_p0 = scmp.lt.s32.totalorder %s948_s19, %s1505_s0 }
  0x12   : > { %p956_p1 = scmp.lt.s32.totalorder %s954_s28, %s949_s20 }
  0x13   : > { %p952_p12 = pnand %p951_p11, %p950_p10 }
  0x14   : > { %p957_p2 = por %p956_p1, %p955_p0 }
  0x15   : > { %p953_p13 = pneg %p952_p12 }
  0x17   : > { %p958_p3 = pnand %p957_p2, %p953_p13 }
  0x19   : > { %961 = shalt.err (!%p958_p3)
}
  0x1a   : > { %s1013_s8 = smov 128   ;;  %s1014_s10 = smov 8  }
  0x1b   : > { %893 = dma.hbm_to_vmem [thread:$0]  (!%p1103_p8), %s223_s16, 1024, %s225_s15, %s213_s18, %s1013_s8, %s1013_s8, %s1014_s10  }
  0x1c   : > { %p232_p4 = scmp.lt.s32.totalorder %s1011_s24, 3 }
  0x1e   : > { %p233_p5 = pnand %p861_p9, %p232_p4 }
  0x20   : > { %236 = sbr.rel (%p233_p5) target bundleno = 594 (0x252), region = 40 }
  0x25   : > { %s238_s11 = sand.u32 1, %s1003_s22  }
  0x26   : > { %s862_s12 = sshll.u32 %s238_s11, 6  ;;  %s239_s13 = scalar_lea.sflag [#allocation4], %s238_s11 }
  0x27   : > { %s1122_s14 = scalar_lea.vmem [#allocation3], %s862_s12 }
  0x28   : > { %994 = dma.done.wait (%p1092_p7), %s239_s13, 1024  }
  0x29   : > { %996 = vsyncadd (%p1092_p7), %s239_s13, 4294966272  ;;  %vm295_vm0 = vcmask 261120   ;;  %vm297_vm1 = vcmask 254976   ;;  %v1015_v0 = vmov 0.0   ;;  %vm303_vm2 = vcmask 253952   ;;  %v1140_v2 = vld [vmem:[%s1122_s14] sm:$0xff] }
  0x2a   : > { %296 = vst.msk [vmem:[#allocation2] sm:$0xff] %vm295_vm0, %v1015_v0  ;;  %v931_v1 = vld [vmem:[%s1506_s1 + $0x4] ss:$0 sm:$0xff]  ;;  %v932_v3 = vld [vmem:[%s1507_s2] ss:$0 sm:$0xff]  ;;  %v1165_v11 = vld [vmem:[%s1122_s14 + $0x8] sm:$0xff] }
  0x2b   : > { %298 = vst.msk [vmem:[#allocation2 + $0x8] sm:$0x3] %vm297_vm1, %v1015_v0  ;;  %v333_v4 = vmul.f32 %v931_v1, %v1140_v2  ;;  %v1151_v5 = vld [vmem:[%s1506_s1] ss:$0 sm:$0xff]  ;;  %v1161_v9 = vld [vmem:[%s1506_s1 + $0x1] ss:$0 sm:$0xff]  ;;  %v334_v22 = vmul.f32 %v931_v1, %v1165_v11 }
  0x2c   : > { %300 = vst.msk [vmem:[#allocation2 + $0x90] sm:$0xff] %vm295_vm0, %v1015_v0  ;;  %v1168_v12 = vld [vmem:[%s1122_s14 + $0x10] sm:$0xff]  ;;  %v1172_v13 = vld [vmem:[%s1122_s14 + $0x18] sm:$0xff]  ;;  %v1183_v17 = vld [vmem:[%s1506_s1 + $0x2] ss:$0 sm:$0xff]  ;;  %p277_p6 = scmp.lt.s32.totalorder %s1071_s25, 1 }
  0x2d   : > { %301 = vst.msk [vmem:[#allocation2 + $0x98] sm:$0x3] %vm297_vm1, %v1015_v0  ;;  %v345_v7 = vadd.f32 %v932_v3, %v333_v4  ;;  %v1175_v14 = vld [vmem:[%s1122_s14 + $0x38] sm:$0xff]  ;;  %v1186_v18 = vld [vmem:[%s1122_s14 + $0x20] sm:$0xff]  ;;  %v1191_v20 = vld [vmem:[%s1122_s14 + $0x28] sm:$0xff]  ;;  %v335_v23 = vmul.f32 %v931_v1, %v1168_v12  ;;  %v336_v24 = vmul.f32 %v931_v1, %v1172_v13  ;;  %v346_v36 = vadd.f32 %v932_v3, %v334_v22 }
  0x2e   : > { %304 = vst.msk [vmem:[#allocation2 + $0x10] sm:$0x1] %vm303_vm2, %v1015_v0  ;;  %v1194_v21 = vld [vmem:[%s1122_s14 + $0x30] sm:$0xff]  ;;  %v337_v25 = vmul.f32 %v931_v1, %v1186_v18  ;;  %v338_v26 = vmul.f32 %v931_v1, %v1191_v20  ;;  %v340_v28 = vmul.f32 %v931_v1, %v1175_v14  ;;  %v1213_v31 = vld [vmem:[%s1506_s1 + $0x3] ss:$0 sm:$0xff]  ;;  %s1538_s25 = smov (!%p277_p6, %s1071_s25), 1 }
  0x2f   : > { %305 = vst.msk [vmem:[#allocation2 + $0x20] sm:$0x1] %vm303_vm2, %v1015_v0  ;;  %v339_v27 = vmul.f32 %v931_v1, %v1194_v21  ;;  %v1220_v33 = vld [vmem:[%s1506_s1 + $0x6] ss:$0 sm:$0xff]  ;;  %v347_v37 = vadd.f32 %v932_v3, %v335_v23  ;;  %v348_v38 = vadd.f32 %v932_v3, %v336_v24  ;;  %v1227_v39 = vld [vmem:[%s1506_s1 + $0x7] ss:$0 sm:$0xff] }
  0x30   : > { %306 = vst.msk [vmem:[#allocation2 + $0x30] sm:$0x1] %vm303_vm2, %v1015_v0  ;;  %v1232_v40 = vld [vmem:[%s1506_s1 + $0x8] ss:$0 sm:$0xff]  ;;  %v349_v41 = vadd.f32 %v932_v3, %v337_v25  ;;  %v350_v42 = vadd.f32 %v932_v3, %v338_v26  ;;  %v352_v44 = vadd.f32 %v932_v3, %v340_v28  ;;  %s878_s7 = sshll.u32 %s1538_s25, 5  ;;  %vm601_vm3 = vcmask 257024  }
  0x31   : > { %307 = vst.msk [vmem:[#allocation2 + $0x40] sm:$0x1] %vm303_vm2, %v1015_v0  ;;  %v353_v6 = vld [vmem:[#allocation2] sm:$0xff]  ;;  %v351_v43 = vadd.f32 %v932_v3, %v339_v27  ;;  %s1412_s17 = scalar_lea.vmem %s1510_s5, %s878_s7  ;;  %s286_s14 = scalar_lea.vmem %s1511_s6, %s878_s7 }
  0x32   : > { %308 = vst.msk [vmem:[#allocation2 + $0x50] sm:$0x1] %vm303_vm2, %v1015_v0  ;;  %v365_v8 = vmul.f32 %v1151_v5, %v353_v6  ;;  %v381_v10 = vld [vmem:[#allocation2 + $0x1] sm:$0xff] }
  0x33   : > { %309 = vst.msk [vmem:[#allocation2 + $0x60] sm:$0x1] %vm303_vm2, %v1015_v0  ;;  %v394_v16 = vmul.f32 %v1161_v9, %v381_v10  ;;  %v410_v19 = vld [vmem:[#allocation2 + $0x2] sm:$0xff]  ;;  %v505_v32 = vld [vmem:[#allocation2 + $0x90] sm:$0xff] }
  0x34   : > { %310 = vst.msk [vmem:[#allocation2 + $0x70] sm:$0x1] %vm303_vm2, %v1015_v0  ;;  %v373_v15 = vadd.f32 %v365_v8, %v345_v7  ;;  %v423_v30 = vmul.f32 %v1183_v17, %v410_v19  ;;  %v534_v34 = vld [vmem:[#allocation2 + $0x91] sm:$0xff]  ;;  %v1243_v49 = vmul.f32 %v1220_v33, %v505_v32 }
  0x35   : > { %311 = vst.msk [vmem:[#allocation2 + $0x80] sm:$0x1] %vm303_vm2, %v1015_v0  ;;  %v563_v35 = vld [vmem:[#allocation2 + $0x92] sm:$0xff]  ;;  %v1246_v50 = vmul.f32 %v1227_v39, %v534_v34 }
  0x36   : > { %312 = vst.msk [vmem:[#allocation2 + $0x19] sm:$0x1] %vm303_vm2, %v1015_v0  ;;  %v402_v29 = vadd.f32 %v394_v16, %v373_v15  ;;  %v1249_v51 = vmul.f32 %v1232_v40, %v563_v35 }
  0x37   : > { %313 = vst.msk [vmem:[#allocation2 + $0x29] sm:$0x1] %vm303_vm2, %v1015_v0 }
  0x38   : > { %314 = vst.msk [vmem:[#allocation2 + $0x39] sm:$0x1] %vm303_vm2, %v1015_v0  ;;  %v1240_v48 = vadd.f32 %v423_v30, %v402_v29 }
  0x39   : > { %315 = vst.msk [vmem:[#allocation2 + $0x49] sm:$0x1] %vm303_vm2, %v1015_v0 }
  0x3a   : > { %316 = vst.msk [vmem:[#allocation2 + $0x59] sm:$0x1] %vm303_vm2, %v1015_v0 }
  0x3b   : > { %1521 = vst [vmem:[#allocation6_spill] sm:$0xff] %v1165_v11 }
  0x3c   : > { %1522 = vst [vmem:[#allocation7_spill] sm:$0xff] %v1168_v12 }
  0x3d   : > { %317 = vst.msk [vmem:[#allocation2 + $0x69] sm:$0x1] %vm303_vm2, %v1015_v0 }
  0x3e   : > { %1523 = vst [vmem:[#allocation8_spill] sm:$0xff] %v1172_v13 }
  0x3f   : > { %318 = vst.msk [vmem:[#allocation2 + $0x79] sm:$0x1] %vm303_vm2, %v1015_v0 }
  0x40   : > { %319 = vst.msk [vmem:[#allocation2 + $0x89] sm:$0x1] %vm303_vm2, %v1015_v0 }
  0x41   : > { %1524 = vst [vmem:[#allocation9_spill] sm:$0xff] %v1186_v18 }
  0x42   : > { %320 = vst.msk [vmem:[#allocation2 + $0x11] sm:$0xff] %vm295_vm0, %v1140_v2 }
  0x43   : > { %1525 = vst [vmem:[#allocation10_spill] sm:$0xff] %v1191_v20 }
  0x44   : > { %1526 = vst [vmem:[#allocation11_spill] sm:$0xff] %v1194_v21 }
  0x45   : > { %321 = vst.msk [vmem:[#allocation2 + $0x21] sm:$0xff] %vm295_vm0, %v1165_v11 }
  0x46   : > { %322 = vst.msk [vmem:[#allocation2 + $0x31] sm:$0xff] %vm295_vm0, %v1168_v12 }
  0x47   : > { %323 = vst.msk [vmem:[#allocation2 + $0x41] sm:$0xff] %vm295_vm0, %v1172_v13 }
  0x48   : > { %324 = vst.msk [vmem:[#allocation2 + $0x51] sm:$0xff] %vm295_vm0, %v1186_v18 }
  0x49   : > { %325 = vst.msk [vmem:[#allocation2 + $0x61] sm:$0xff] %vm295_vm0, %v1191_v20  ;;  %v354_v45 = vld [vmem:[#allocation2 + $0x10] sm:$0xff] }
  0x4a   : > { %326 = vst.msk [vmem:[#allocation2 + $0x71] sm:$0xff] %vm295_vm0, %v1194_v21  ;;  %v382_v46 = vld [vmem:[#allocation2 + $0x11] sm:$0xff]  ;;  %v366_v53 = vmul.f32 %v1151_v5, %v354_v45  ;;  %v1262_v58 = vmul.f32 %v1213_v31, %v354_v45 }
  0x4b   : > { %327 = vst.msk [vmem:[#allocation2 + $0x81] sm:$0xff] %vm295_vm0, %v1175_v14  ;;  %v1238_v47 = vld [vmem:[#allocation2 + $0x12] sm:$0xff]  ;;  %v395_v55 = vmul.f32 %v1161_v9, %v382_v46 }
  0x4c   : > { %v1251_v52 = vld [vmem:[#allocation2 + $0x20] sm:$0xff]  ;;  %v424_v57 = vmul.f32 %v1183_v17, %v1238_v47  ;;  %v374_v6 = vadd.f32 %v366_v53, %v346_v36 }
  0x4d   : > { %v1254_v54 = vld [vmem:[#allocation2 + $0x21] sm:$0xff]  ;;  %v1264_v59 = vld [vmem:[#allocation2 + $0x30] sm:$0xff]  ;;  %v367_v60 = vmul.f32 %v1151_v5, %v1251_v52  ;;  %v453_v1 = vmul.f32 %v1213_v31, %v1251_v52 }
  0x4e   : > { %v1257_v56 = vld [vmem:[#allocation2 + $0x22] sm:$0xff]  ;;  %v1268_v61 = vld [vmem:[#allocation2 + $0x31] sm:$0xff]  ;;  %v396_v62 = vmul.f32 %v1161_v9, %v1254_v54  ;;  %v368_v4 = vmul.f32 %v1151_v5, %v1264_v59  ;;  %v403_v34 = vadd.f32 %v395_v55, %v374_v6 }
  0x4f   : > { %v1272_v63 = vld [vmem:[#allocation2 + $0x32] sm:$0xff]  ;;  %v425_v0 = vmul.f32 %v1183_v17, %v1257_v56  ;;  %v1278_v3 = vld [vmem:[#allocation2 + $0x40] sm:$0xff]  ;;  %v397_v8 = vmul.f32 %v1161_v9, %v1268_v61  ;;  %v375_v22 = vadd.f32 %v367_v60, %v347_v37 }
  0x50   : > { %v1282_v7 = vld [vmem:[#allocation2 + $0x41] sm:$0xff]  ;;  %v426_v15 = vmul.f32 %v1183_v17, %v1272_v63  ;;  %v1290_v16 = vld [vmem:[#allocation2 + $0x50] sm:$0xff]  ;;  %v369_v19 = vmul.f32 %v1151_v5, %v1278_v3  ;;  %v376_v29 = vadd.f32 %v368_v4, %v348_v38  ;;  %v432_v12 = vadd.f32 %v424_v57, %v403_v34 }
  0x51   : > { %v1286_v10 = vld [vmem:[#allocation2 + $0x42] sm:$0xff]  ;;  %v1294_v23 = vld [vmem:[#allocation2 + $0x51] sm:$0xff]  ;;  %v398_v24 = vmul.f32 %v1161_v9, %v1282_v7  ;;  %v370_v28 = vmul.f32 %v1151_v5, %v1290_v16  ;;  %v404_v38 = vadd.f32 %v396_v62, %v375_v22  ;;  %v460_v57 = vadd.f32 %v1262_v58, %v1240_v48 }
  0x52   : > { %v1298_v25 = vld [vmem:[#allocation2 + $0x52] sm:$0xff]  ;;  %v427_v26 = vmul.f32 %v1183_v17, %v1286_v10  ;;  %v1302_v27 = vld [vmem:[#allocation2 + $0x60] sm:$0xff]  ;;  %v399_v32 = vmul.f32 %v1161_v9, %v1294_v23  ;;  %v377_v45 = vadd.f32 %v369_v19, %v349_v41  ;;  %v405_v21 = vadd.f32 %v397_v8, %v376_v29 }
  0x53   : > { %v1306_v30 = vld [vmem:[#allocation2 + $0x61] sm:$0xff]  ;;  %v1312_v36 = vld [vmem:[#allocation2 + $0x70] sm:$0xff]  ;;  %v371_v37 = vmul.f32 %v1151_v5, %v1302_v27  ;;  %v378_v55 = vadd.f32 %v370_v28, %v350_v42  ;;  %v428_v41 = vmul.f32 %v1183_v17, %v1298_v25  ;;  %v433_v42 = vadd.f32 %v425_v0, %v404_v38 }
  0x54   : > { %v1310_v35 = vld [vmem:[#allocation2 + $0x62] sm:$0xff]  ;;  %v1316_v46 = vld [vmem:[#allocation2 + $0x71] sm:$0xff]  ;;  %v400_v53 = vmul.f32 %v1161_v9, %v1306_v30  ;;  %v372_v4 = vmul.f32 %v1151_v5, %v1312_v36  ;;  %v406_v18 = vadd.f32 %v398_v24, %v377_v45  ;;  %v434_v28 = vadd.f32 %v426_v15, %v405_v21 }
  0x55   : > { %v1320_v60 = vld [vmem:[#allocation2 + $0x72] sm:$0xff]  ;;  %v401_v6 = vmul.f32 %v1161_v9, %v1316_v46  ;;  %v379_v20 = vadd.f32 %v371_v37, %v351_v43  ;;  %v429_v19 = vmul.f32 %v1183_v17, %v1310_v35  ;;  %v407_v62 = vadd.f32 %v399_v32, %v378_v55  ;;  %v446_v9 = vld [vmem:[#allocation2 + $0x80] sm:$0xff] }
  0x56   : > { %v380_v13 = vadd.f32 %v372_v4, %v352_v44  ;;  %v430_v22 = vmul.f32 %v1183_v17, %v1320_v60  ;;  %v435_v11 = vadd.f32 %v427_v26, %v406_v18  ;;  %v454_v24 = vmul.f32 %v1213_v31, %v1264_v59  ;;  %v937_v44 = vld [vmem:[%s1506_s1 + $0x5] ss:$0 sm:$0xff] }
  0x57   : > { %v408_v5 = vadd.f32 %v400_v53, %v379_v20  ;;  %v436_v43 = vadd.f32 %v428_v41, %v407_v62  ;;  %v455_v29 = vmul.f32 %v1213_v31, %v1278_v3  ;;  %v456_v17 = vmul.f32 %v1213_v31, %v1290_v16  ;;  %v475_v45 = vld [vmem:[#allocation2 + $0x82] sm:$0xff] }
  0x58   : > { %v409_v8 = vadd.f32 %v401_v6, %v380_v13  ;;  %v457_v18 = vmul.f32 %v1213_v31, %v1302_v27  ;;  %v458_v13 = vmul.f32 %v1213_v31, %v1312_v36  ;;  %v459_v21 = vmul.f32 %v1213_v31, %v446_v9 }
  0x59   : > { %v437_v32 = vadd.f32 %v429_v19, %v408_v5  ;;  %v461_v0 = vadd.f32 %v453_v1, %v432_v12  ;;  %v462_v15 = vadd.f32 %v454_v24, %v433_v42  ;;  %v463_v26 = vadd.f32 %v455_v29, %v434_v28 }
  0x5a   : > { %v438_v20 = vadd.f32 %v430_v22, %v409_v8  ;;  %v464_v34 = vadd.f32 %v456_v17, %v435_v11  ;;  %v465_v37 = vadd.f32 %v457_v18, %v436_v43  ;;  %v481_v4 = vmul.f32 %v937_v44, %v1238_v47  ;;  %v533_v18 = vld [vmem:[#allocation2 + $0x81] sm:$0xff] }
  0x5b   : > { %v466_v53 = vadd.f32 %v458_v13, %v437_v32  ;;  %v482_v55 = vmul.f32 %v937_v44, %v1257_v56  ;;  %v483_v6 = vmul.f32 %v937_v44, %v1272_v63  ;;  %v484_v31 = vmul.f32 %v937_v44, %v1286_v10 }
  0x5c   : > { %v467_v38 = vadd.f32 %v459_v21, %v438_v20  ;;  %v485_v41 = vmul.f32 %v937_v44, %v1298_v25  ;;  %v486_v12 = vmul.f32 %v937_v44, %v1310_v35  ;;  %v487_v48 = vmul.f32 %v937_v44, %v1320_v60 }
  0x5d   : > { %v488_v11 = vmul.f32 %v937_v44, %v475_v45  ;;  %v489_v58 = vadd.f32 %v481_v4, %v460_v57  ;;  %v490_v1 = vadd.f32 %v482_v55, %v461_v0  ;;  %v491_v19 = vadd.f32 %v483_v6, %v462_v15 }
  0x5e   : > { %v492_v62 = vadd.f32 %v484_v31, %v463_v26  ;;  %v493_v22 = vadd.f32 %v485_v41, %v464_v34  ;;  %v494_v47 = vadd.f32 %v486_v12, %v465_v37  ;;  %v495_v5 = vadd.f32 %v487_v48, %v466_v53  ;;  %v1529_v48 = vld [vmem:[#allocation8_spill] sm:$0xff] }
  0x5f   : > { %v496_v42 = vadd.f32 %v488_v11, %v467_v38  ;;  %v511_v28 = vmul.f32 %v1220_v33, %v1251_v52  ;;  %v512_v8 = vmul.f32 %v1220_v33, %v1264_v59  ;;  %v513_v43 = vmul.f32 %v1220_v33, %v1278_v3 }
  0x60   : > { %v514_v24 = vmul.f32 %v1220_v33, %v1290_v16  ;;  %v515_v29 = vmul.f32 %v1220_v33, %v1302_v27  ;;  %v516_v44 = vmul.f32 %v1220_v33, %v1312_v36  ;;  %v517_v52 = vmul.f32 %v1220_v33, %v446_v9 }
  0x61   : > { %v519_v32 = vadd.f32 %v511_v28, %v489_v58  ;;  %v520_v17 = vadd.f32 %v512_v8, %v490_v1  ;;  %v526_v59 = vadd.f32 %v1243_v49, %v496_v42  ;;  %v521_v13 = vadd.f32 %v513_v43, %v491_v19  ;;  %v1530_v58 = vld [vmem:[#allocation9_spill] sm:$0xff] }
  0x62   : > { %v522_v3 = vadd.f32 %v514_v24, %v492_v62  ;;  %v523_v20 = vadd.f32 %v515_v29, %v493_v22  ;;  %v524_v21 = vadd.f32 %v516_v44, %v494_v47  ;;  %v525_v16 = vadd.f32 %v517_v52, %v495_v5  ;;  %v1532_v5 = vld [vmem:[#allocation11_spill] sm:$0xff] }
  0x63   : > { %v540_v57 = vmul.f32 %v1227_v39, %v1254_v54  ;;  %v541_v27 = vmul.f32 %v1227_v39, %v1268_v61  ;;  %v542_v36 = vmul.f32 %v1227_v39, %v1282_v7  ;;  %v543_v33 = vmul.f32 %v1227_v39, %v1294_v23 }
  0x64   : > { %v544_v49 = vmul.f32 %v1227_v39, %v1306_v30  ;;  %v545_v9 = vmul.f32 %v1227_v39, %v1316_v46  ;;  %v546_v54 = vmul.f32 %v1227_v39, %v533_v18  ;;  %v555_v7 = vadd.f32 %v1246_v50, %v526_v59 }
  0x65   : > { %v548_v0 = vadd.f32 %v540_v57, %v519_v32  ;;  %v549_v61 = vadd.f32 %v541_v27, %v520_v17  ;;  %v550_v15 = vadd.f32 %v542_v36, %v521_v13  ;;  %v551_v26 = vadd.f32 %v543_v33, %v522_v3 }
  0x66   : > { %v552_v34 = vadd.f32 %v544_v49, %v523_v20  ;;  %v553_v37 = vadd.f32 %v545_v9, %v524_v21  ;;  %v554_v53 = vadd.f32 %v546_v54, %v525_v16  ;;  %v569_v23 = vmul.f32 %v1232_v40, %v1257_v56 }
  0x67   : > { %v570_v30 = vmul.f32 %v1232_v40, %v1272_v63  ;;  %v571_v46 = vmul.f32 %v1232_v40, %v1286_v10  ;;  %v572_v39 = vmul.f32 %v1232_v40, %v1298_v25  ;;  %v573_v50 = vmul.f32 %v1232_v40, %v1310_v35 }
  0x68   : > { %v574_v38 = vmul.f32 %v1232_v40, %v1320_v60  ;;  %v575_v4 = vmul.f32 %v1232_v40, %v475_v45  ;;  %v584_v56 = vadd.f32 %v1249_v51, %v555_v7  ;;  %v577_v55 = vadd.f32 %v569_v23, %v548_v0  ;;  %v1527_v51 = vld [vmem:[#allocation6_spill] sm:$0xff]  ;;  %v1528_v60 = vld [vmem:[#allocation7_spill] sm:$0xff] }
  0x69   : > { %v578_v63 = vadd.f32 %v570_v30, %v549_v61  ;;  %v579_v6 = vadd.f32 %v571_v46, %v550_v15  ;;  %v580_v31 = vadd.f32 %v572_v39, %v551_v26  ;;  %v581_v41 = vadd.f32 %v573_v50, %v552_v34 }
  0x6a   : > { %v582_v10 = vadd.f32 %v574_v38, %v553_v37  ;;  %v583_v12 = vadd.f32 %v575_v4, %v554_v53  ;;  %v1405_v25 = vadd.f32 %v584_v56, %v1175_v14  ;;  %v585_v40 = vadd.f32 %v577_v55, %v1140_v2  ;;  %v1531_v14 = vld [vmem:[#allocation10_spill] sm:$0xff] }
  0x6b   : > { %v586_v35 = vadd.f32 %v578_v63, %v1527_v51  ;;  %v587_v45 = vadd.f32 %v579_v6, %v1528_v60  ;;  %v588_v11 = vadd.f32 %v580_v31, %v1529_v48  ;;  %v589_v1 = vadd.f32 %v581_v41, %v1530_v58 }
  0x6c   : > { %v1420_v19 = vadd.f32 %v582_v10, %v1531_v14  ;;  %v600_v62 = vpack.c.bf16 %v1405_v25, %v1405_v25  ;;  %v593_v22 = vpack.c.bf16 %v585_v40, %v585_v40  ;;  %v1425_v42 = vadd.f32 %v583_v12, %v1532_v5 }
  0x6d   : > { %v595_v47 = vpack.c.bf16 %v587_v45, %v587_v45  ;;  %v596_v2 = vpack.c.bf16 %v588_v11, %v588_v11  ;;  %v597_v28 = vpack.c.bf16 %v589_v1, %v589_v1  ;;  %v610_v8 = vsel %vm295_vm0, %v585_v40, 0.0 }
  0x6e   : > { %609 = vst.msk [vmem:[%s1412_s17 + $0x1c] sm:$0xf] %vm601_vm3, %v600_v62  ;;  %v598_v43 = vpack.c.bf16 %v1420_v19, %v1420_v19  ;;  %v611_v24 = vsel %vm295_vm0, %v586_v35, 0.0  ;;  %v613_v29 = vsel %vm295_vm0, %v587_v45, 0.0  ;;  %v599_v44 = vpack.c.bf16 %v1425_v42, %v1425_v42 }
  0x6f   : > { %602 = vst.msk [vmem:[%s1412_s17] sm:$0xf] %vm601_vm3, %v593_v22  ;;  %v612_v52 = vadd.f32 %v611_v24, %v610_v8  ;;  %v615_v32 = vsel %vm295_vm0, %v588_v11, 0.0  ;;  %v594_v17 = vpack.c.bf16 %v586_v35, %v586_v35  ;;  %v617_v18 = vsel %vm295_vm0, %v589_v1, 0.0 }
  0x70   : > { %604 = vst.msk [vmem:[%s1412_s17 + $0x8] sm:$0xf] %vm601_vm3, %v595_v47  ;;  %v619_v3 = vsel %vm295_vm0, %v1420_v19, 0.0  ;;  %v621_v21 = vsel %vm295_vm0, %v1425_v42, 0.0  ;;  %v623_v57 = vsel %vm295_vm0, %v1405_v25, 0.0  ;;  %v1016_v33 = vmov 2048.0  }
  0x71   : > { %605 = vst.msk [vmem:[%s1412_s17 + $0xc] sm:$0xf] %vm601_vm3, %v596_v2  ;;  %v614_v59 = vadd.f32 %v613_v29, %v612_v52  ;;  %943 = vrcp.f32 %v1016_v33 }
  0x72   : > { %606 = vst.msk [vmem:[%s1412_s17 + $0x10] sm:$0xf] %vm601_vm3, %v597_v28 }
  0x73   : > { %607 = vst.msk [vmem:[%s1412_s17 + $0x14] sm:$0xf] %vm601_vm3, %v598_v43  ;;  %v616_v13 = vadd.f32 %v615_v32, %v614_v59 }
  0x74   : > { %608 = vst.msk [vmem:[%s1412_s17 + $0x18] sm:$0xf] %vm601_vm3, %v599_v44 }
  0x75   : > { %603 = vst.msk [vmem:[%s1412_s17 + $0x4] sm:$0xf] %vm601_vm3, %v594_v17  ;;  %v618_v20 = vadd.f32 %v617_v18, %v616_v13 }
  0x77   : > { %v620_v16 = vadd.f32 %v619_v3, %v618_v20  ;;  %v944_v49 = vpop.eup %943 }
  0x78   : > { %v635_v9 = vmul.f32 2048.0, %v944_v49  ;;  %vm639_vm4 = vweird.f32 %v944_v49 }
  0x79   : > { %v622_v27 = vadd.f32 %v621_v21, %v620_v16 }
  0x7a   : > { %v636_v54 = vsub.f32 1.0, %v635_v9 }
  0x7b   : > { %v624_v36 = vadd.f32 %v623_v57, %v622_v27  ;;  %v941_v57 = vld [vmem:[%s1508_s3] ss:$0 sm:$0xff] }
  0x7c   : > { %v637_v7 = vmul.f32 %v944_v49, %v636_v54  ;;  %v942_v54 = vld [vmem:[%s1509_s4] ss:$0 sm:$0xff] }
  0x7d   : > { %625 = vadd.xlane.f32.xlu0 %v624_v36 }
  0x7e   : > { %v638_v37 = vadd.f32 %v944_v49, %v637_v7 }
  0x80   : > { %v640_v30 = vsel %vm639_vm4, %v944_v49, %v638_v37 }
  0xf0   : > { %v626_v0 = vpop.xlane.xlu0 %625 }
  0xf1   : > { %v627_v61 = vrot.slane %v626_v0, 4 }
  0xf3   : > { %v628_v15 = vadd.f32 %v627_v61, %v626_v0 }
  0xf5   : > { %v629_v26 = vrot.slane %v628_v15, 2 }
  0xf7   : > { %v630_v34 = vadd.f32 %v629_v26, %v628_v15 }
  0xf9   : > { %v631_v53 = vrot.slane %v630_v34, 1 }
  0xfb   : > { %v632_v23 = vadd.f32 %v631_v53, %v630_v34 }
  0xfd   : > { %880 = vpush %v632_v23 }
  0xfe   : > { %882 = vpush %v640_v30 }
 0x12e   : > { %s881_s18 = spop %880 }
 0x12f   : > { %s1458_s19 = spop %882 }
 0x130   : > { %s642_s20 = smul.f32 %s1458_s19, %s881_s18 }
 0x132   : > { %v643_v46 = vstv %s642_s20 }
 0x133   : > { %v644_v39 = vsub.f32 %v585_v40, %v643_v46  ;;  %v645_v50 = vsub.f32 %v586_v35, %v643_v46  ;;  %v646_v38 = vsub.f32 %v587_v45, %v643_v46  ;;  %v647_v4 = vsub.f32 %v588_v11, %v643_v46 }
 0x134   : > { %v648_v56 = vsub.f32 %v589_v1, %v643_v46  ;;  %v649_v31 = vsub.f32 %v1420_v19, %v643_v46  ;;  %v650_v60 = vsub.f32 %v1425_v42, %v643_v46  ;;  %v651_v45 = vsub.f32 %v1405_v25, %v643_v46 }
 0x135   : > { %v652_v55 = vmul.f32 %v644_v39, %v644_v39  ;;  %v653_v63 = vmul.f32 %v645_v50, %v645_v50  ;;  %v654_v6 = vmul.f32 %v646_v38, %v646_v38  ;;  %v655_v41 = vmul.f32 %v647_v4, %v647_v4 }
 0x136   : > { %v656_v48 = vmul.f32 %v648_v56, %v648_v56  ;;  %v657_v11 = vmul.f32 %v649_v31, %v649_v31  ;;  %v658_v14 = vmul.f32 %v650_v60, %v650_v60  ;;  %v659_v22 = vmul.f32 %v651_v45, %v651_v45 }
 0x137   : > { %v660_v10 = vsel %vm295_vm0, %v652_v55, 0.0  ;;  %v661_v12 = vsel %vm295_vm0, %v653_v63, 0.0  ;;  %v663_v40 = vsel %vm295_vm0, %v654_v6, 0.0  ;;  %v665_v58 = vsel %vm295_vm0, %v655_v41, 0.0 }
 0x138   : > { %v662_v51 = vadd.f32 %v661_v12, %v660_v10  ;;  %v667_v19 = vsel %vm295_vm0, %v656_v48, 0.0  ;;  %v669_v47 = vsel %vm295_vm0, %v657_v11, 0.0  ;;  %v671_v5 = vsel %vm295_vm0, %v658_v14, 0.0 }
 0x139   : > { %v673_v28 = vsel %vm295_vm0, %v659_v22, 0.0 }
 0x13a   : > { %v664_v35 = vadd.f32 %v663_v40, %v662_v51 }
 0x13c   : > { %v666_v1 = vadd.f32 %v665_v58, %v664_v35 }
 0x13e   : > { %v668_v62 = vadd.f32 %v667_v19, %v666_v1 }
 0x140   : > { %v670_v2 = vadd.f32 %v669_v47, %v668_v62 }
 0x142   : > { %v672_v42 = vadd.f32 %v671_v5, %v670_v2 }
 0x144   : > { %v674_v8 = vadd.f32 %v673_v28, %v672_v42 }
 0x146   : > { %675 = vadd.xlane.f32.xlu0 %v674_v8 }
 0x1b9   : > { %v676_v25 = vpop.xlane.xlu0 %675 }
 0x1ba   : > { %v677_v43 = vrot.slane %v676_v25, 4 }
 0x1bc   : > { %v678_v24 = vadd.f32 %v677_v43, %v676_v25 }
 0x1be   : > { %v679_v29 = vrot.slane %v678_v24, 2 }
 0x1c0   : > { %v680_v44 = vadd.f32 %v679_v29, %v678_v24 }
 0x1c2   : > { %v681_v52 = vrot.slane %v680_v44, 1 }
 0x1c4   : > { %v682_v32 = vadd.f32 %v681_v52, %v680_v44 }
 0x1c6   : > { %884 = vpush %v682_v32 }
 0x1f7   : > { %s885_s21 = spop %884 }
 0x1f8   : > { %s692_s27 = smul.f32 %s885_s21, %s1458_s19 }
 0x1fa   : > { %s693_s28 = sadd.f32 1e-05, %s692_s27 }
 0x1fc   : > { %v694_v17 = vstv %s693_s28 }
 0x1fd   : > { %945 = vrsqrt.f32 %v694_v17  ;;  %vm701_vm6 = vweird.f32 %v694_v17 }
 0x203   : > { %v946_v59 = vpop.eup %945 }
 0x204   : > { %v696_v18 = vmul.f32 %v946_v59, %v694_v17  ;;  %vm702_vm5 = vweird.f32 %v946_v59 }
 0x205   : > { %vm703_vm7 = vmor %vm701_vm6, %vm702_vm5 }
 0x206   : > { %v697_v13 = vmul.f32 %v946_v59, %v696_v18 }
 0x208   : > { %v698_v3 = vmul.f32 0.5, %v697_v13 }
 0x20a   : > { %v699_v20 = vsub.f32 1.5, %v698_v3 }
 0x20c   : > { %v700_v21 = vmul.f32 %v946_v59, %v699_v20 }
 0x20e   : > { %v704_v16 = vsel %vm703_vm7, %v946_v59, %v700_v21 }
 0x20f   : > { %886 = vpush %v704_v16 }
 0x240   : > { %s887_s30 = spop %886 }
 0x241   : > { %v706_v27 = vstv %s887_s30 }
 0x242   : > { %v707_v36 = vmul.f32 %v706_v27, %v644_v39  ;;  %v708_v33 = vmul.f32 %v706_v27, %v645_v50  ;;  %v709_v49 = vmul.f32 %v706_v27, %v646_v38  ;;  %v710_v9 = vmul.f32 %v706_v27, %v647_v4 }
 0x243   : > { %v711_v0 = vmul.f32 %v706_v27, %v648_v56  ;;  %v712_v61 = vmul.f32 %v706_v27, %v649_v31  ;;  %v713_v15 = vmul.f32 %v706_v27, %v650_v60  ;;  %v714_v7 = vmul.f32 %v706_v27, %v651_v45 }
 0x244   : > { %v719_v26 = vmul.f32 %v941_v57, %v707_v36  ;;  %v720_v34 = vmul.f32 %v941_v57, %v708_v33  ;;  %v721_v37 = vmul.f32 %v941_v57, %v709_v49  ;;  %v722_v53 = vmul.f32 %v941_v57, %v710_v9 }
 0x245   : > { %v723_v23 = vmul.f32 %v941_v57, %v711_v0  ;;  %v724_v30 = vmul.f32 %v941_v57, %v712_v61  ;;  %v725_v46 = vmul.f32 %v941_v57, %v713_v15  ;;  %v726_v39 = vmul.f32 %v941_v57, %v714_v7 }
 0x246   : > { %v731_v50 = vadd.f32 %v942_v54, %v719_v26  ;;  %v732_v38 = vadd.f32 %v942_v54, %v720_v34  ;;  %v733_v4 = vadd.f32 %v942_v54, %v721_v37  ;;  %v734_v55 = vadd.f32 %v942_v54, %v722_v53 }
 0x247   : > { %v735_v56 = vadd.f32 %v942_v54, %v723_v23  ;;  %v736_v63 = vadd.f32 %v942_v54, %v724_v30  ;;  %v737_v6 = vadd.f32 %v942_v54, %v725_v46  ;;  %v738_v12 = vadd.f32 %v942_v54, %v726_v39 }
 0x248   : > { %v739_v31 = vpack.c.bf16 %v731_v50, %v731_v50  ;;  %v740_v41 = vpack.c.bf16 %v732_v38, %v732_v38  ;;  %v741_v10 = vpack.c.bf16 %v733_v4, %v733_v4  ;;  %v742_v51 = vpack.c.bf16 %v734_v55, %v734_v55 }
 0x249   : > { %v743_v60 = vpack.c.bf16 %v735_v56, %v735_v56  ;;  %v744_v48 = vpack.c.bf16 %v736_v63, %v736_v63  ;;  %v745_v40 = vpack.c.bf16 %v737_v6, %v737_v6  ;;  %v746_v35 = vpack.c.bf16 %v738_v12, %v738_v12 }
 0x24a   : > { %747 = vst.msk [vmem:[%s286_s14] sm:$0xf] %vm601_vm3, %v739_v31 }
 0x24b   : > { %748 = vst.msk [vmem:[%s286_s14 + $0x4] sm:$0xf] %vm601_vm3, %v740_v41 }
 0x24c   : > { %749 = vst.msk [vmem:[%s286_s14 + $0x8] sm:$0xf] %vm601_vm3, %v741_v10 }
 0x24d   : > { %750 = vst.msk [vmem:[%s286_s14 + $0xc] sm:$0xf] %vm601_vm3, %v742_v51 }
 0x24e   : > { %751 = vst.msk [vmem:[%s286_s14 + $0x10] sm:$0xf] %vm601_vm3, %v743_v60 }
 0x24f   : > { %752 = vst.msk [vmem:[%s286_s14 + $0x14] sm:$0xf] %vm601_vm3, %v744_v48 }
 0x250   : > { %753 = vst.msk [vmem:[%s286_s14 + $0x18] sm:$0xf] %vm601_vm3, %v745_v40 }
 0x251   : > { %754 = vst.msk [vmem:[%s286_s14 + $0x1c] sm:$0xf] %vm601_vm3, %v746_v35 }
 0x252 PF: > { %p17_p7 = scmp.ge.s32.totalorder %s1074_s26, 4   ;;  %s1533_s21 = smov %s1003_s22 }
 0x253   : > { %s1534_s22 = smov %s1007_s23  ;;  %s1535_s23 = smov %s1084_s29 }
 0x254   : > { %s1536_s24 = smov %s1074_s26  ;;  %19 = sbr.rel (!%p17_p7) target bundleno = 3 (0x3), region = 103 }
 0x259   :  { %792 = vsyncpa [#allocation4], 1 }
 0x25a   :  { %794 = vsyncpa [#allocation4 + $0x1], 1 }

// kernel: cmt_block_forward.5
= control target key start
LH: loop header
LB: loop body
LE: loop exit
PB: predicated region body
PF: predicated region fallthrough
CT: control target
= control target key end

     0   :  { %s2486_s29 = smov 0   ;;  %s3189_s0 = inlined_call_operand.vmem [shape: bf16[2,64,32], index: 0, kind: input, shape index: {}]   ;;  %s3190_s1 = inlined_call_operand.vmem [shape: bf16[2,4,2,4,64], index: 1, kind: input, shape index: {}]   ;;  %s3191_s2 = inlined_call_operand.vmem [shape: bf16[2,64,32], index: 2, kind: input, shape index: {}]   ;;  %s3192_s3 = inlined_call_operand.vmem [shape: f32[4,1,32], index: 3, kind: input, shape index: {}]   ;;  %s3193_s4 = inlined_call_operand.vmem [shape: f32[1,32], index: 4, kind: input, shape index: {}]   ;;  %s3194_s5 = inlined_call_operand.vmem [shape: bf16[32,32], index: 5, kind: input, shape index: {}]   ;;  %s3195_s6 = inlined_call_operand.vmem [shape: f32[1,32], index: 6, kind: input, shape index: {}]   ;;  %s3196_s7 = inlined_call_operand.vmem [shape: bf16[32,64], index: 7, kind: input, shape index: {}]   ;;  %s3197_s8 = inlined_call_operand.vmem [shape: f32[1,64], index: 8, kind: input, shape index: {}]   ;;  %s3198_s9 = inlined_call_operand.vmem [shape: bf16[32,32], index: 9, kind: input, shape index: {}]   ;;  %s3199_s10 = inlined_call_operand.vmem [shape: f32[1,32], index: 10, kind: input, shape index: {}]   ;;  %s3200_s11 = inlined_call_operand.vmem [shape: f32[1,32], index: 11, kind: input, shape index: {}]   ;;  %s3201_s12 = inlined_call_operand.vmem [shape: f32[1,32], index: 12, kind: input, shape index: {}]   ;;  %s3202_s13 = inlined_call_operand.vmem [shape: bf16[2,64,32], index: 13, kind: output, shape index: {0}]   ;;  %s3203_s14 = inlined_call_operand.vmem [shape: bf16[2,64,32], index: 14, kind: output, shape index: {1}]  }
   0x1 LB: > { %s2076_s30 = sadd.s32 4294967295, %s2397_s29   ;;  %p2080_p0 = scmp.ge.s32.totalorder %s2397_s29, 1  ;;  %s2397_s29 = sphi %s2486_s29, %s25_s29  }
   0x2   : > { %p435_p1 = scmp.lt.s32.totalorder %s2397_s29, 3 }
   0x4   : > { %p436_p2 = pnand %p2080_p0, %p435_p1 }
   0x5   : > { %s2399_s17 = smov (!%p436_p2), 32   ;;  %p496_p3 = scmp.lt.s32.totalorder (!%p436_p2), %s2076_s30, 1 }
   0x6   : > { %439 = sbr.rel (%p436_p2) target bundleno = 2256 (0x8d0), region = 72  ;;  %s2400_s24 = smov (!%p436_p2), 96  }
   0x7   : > { %s2401_s27 = smov (!%p436_p2), 120   ;;  %s2402_s28 = smov (!%p436_p2), 112  }
   0x8   : > { %s2405_s15 = smov (!%p436_p2), 72   ;;  %s2406_s16 = smov (!%p436_p2), 80  }
   0x9   : > { %s2408_s18 = smov (!%p436_p2), 24   ;;  %s2409_s19 = smov (!%p436_p2), 16  }
   0xb   : > { %v2246_v0 = vld [vmem:[%s3192_s3 + $0x1] ss:$0 sm:$0xff]  ;;  %v2247_v1 = vld [vmem:[%s3192_s3 + $0x3] ss:$0 sm:$0xff]  ;;  %s3205_s30 = smov (!%p496_p3, %s2076_s30), 1  ;;  %v2193_v40 = vld [vmem:[%s3196_s7 + $0x8] sm:$0xff] }
   0xc   : > { %546 = vrot.lane.b32.xlu0 %v2246_v0, %s2399_s17  ;;  %s2182_s20 = sshll.u32 %s3205_s30, 4  ;;  %v2248_v28 = vld [vmem:[%s3192_s3] ss:$0 sm:$0xff]  ;;  %v2249_v29 = vld [vmem:[%s3192_s3 + $0x2] ss:$0 sm:$0xff]  ;;  %v2191_v42 = vld [vmem:[%s3194_s5 + $0x8] sm:$0xff]  ;;  %773 = vmatpush.bf16.msra.mxu1 %v2193_v40 }
   0xd   : > { %s505_s23 = scalar_lea.vmem %s3190_s1, %s2182_s20  ;;  %v2250_v41 = vld [vmem:[%s3193_s4] ss:$0 sm:$0xff]  ;;  %s2541_s21 = sshll.u32 %s3205_s30, 5  ;;  %721 = vmatpush.bf16.msra.mxu0 %v2191_v42  ;;  %2215 = vmatpush.bf16.msra.mxu2 %v2191_v42  ;;  %vm631_vm0 = vcmask 257024   ;;  %vm702_vm1 = vcmask 261120   ;;  %vm786_vm2 = vcmask 64512  }
   0xe   : > { %v524_v2 = vld [vmem:[%s505_s23 + $0x8] sm:$0x3]  ;;  %v2506_v3 = vld [vmem:[%s505_s23] sm:$0x3]  ;;  %v2511_v9 = vld [vmem:[%s505_s23 + $0x2] sm:$0x3]  ;;  %s2553_s30 = scalar_lea.vmem %s3189_s0, %s2541_s21 }
   0xf   : > { %v528_v4 = vunpack.c.l.bf16 %v524_v2  ;;  %v526_v5 = vunpack.c.l.bf16 %v2506_v3  ;;  %v525_v10 = vld [vmem:[%s505_s23 + $0xc] sm:$0x3]  ;;  %v2515_v11 = vld [vmem:[%s505_s23 + $0x4] sm:$0x3]  ;;  %v578_v12 = vunpack.c.l.bf16 %v2511_v9  ;;  %v2095_v19 = vld [vmem:[%s505_s23 + $0xe] sm:$0x3] }
  0x10   : > { %v529_v13 = vunpack.c.l.bf16 %v525_v10  ;;  %v527_v14 = vunpack.c.l.bf16 %v2515_v11  ;;  %v2094_v20 = vld [vmem:[%s505_s23 + $0xa] sm:$0x3]  ;;  %v2093_v21 = vld [vmem:[%s505_s23 + $0x6] sm:$0x3]  ;;  %v581_v22 = vunpack.c.l.bf16 %v2095_v19  ;;  %v2251_v54 = vld [vmem:[%s3193_s4] ss:$0 sm:$0xff] }
  0x11   : > { %v580_v23 = vunpack.c.l.bf16 %v2094_v20  ;;  %v579_v24 = vunpack.c.l.bf16 %v2093_v21  ;;  %v536_v30 = vmul.f32 %v2248_v28, %v528_v4  ;;  %v2192_v44 = vld [vmem:[%s3196_s7] sm:$0xff]  ;;  %v534_v49 = vmul.f32 %v2248_v28, %v526_v5  ;;  %v2187_v51 = vld [vmem:[%s2553_s30 + $0x8] sm:$0xff]  ;;  %v2188_v63 = vld [vmem:[%s2553_s30 + $0x10] sm:$0xff] }
  0x12   : > { %v537_v35 = vmul.f32 %v2248_v28, %v529_v13  ;;  %v590_v36 = vmul.f32 %v2249_v29, %v581_v22  ;;  %v2190_v47 = vld [vmem:[%s3194_s5] sm:$0xff]  ;;  %774 = vmatpush.bf16.msra.mxu1 %v2192_v44  ;;  %v587_v53 = vmul.f32 %v2249_v29, %v578_v12  ;;  %v535_v57 = vmul.f32 %v2248_v28, %v527_v14 }
  0x13   : > { %v589_v31 = vmul.f32 %v2249_v29, %v580_v23  ;;  %722 = vmatpush.bf16.msra.mxu0 %v2190_v47  ;;  %2216 = vmatpush.bf16.msra.mxu2 %v2190_v47  ;;  %v2186_v48 = vld [vmem:[%s2553_s30] sm:$0xff]  ;;  %v588_v62 = vmul.f32 %v2249_v29, %v579_v24  ;;  %vm839_vm3 = vcmask 130048   ;;  %vm1219_vm4 = vcmask 130112  }
  0x14   : > { %599 = vrot.lane.b32.xlu0 %v2247_v1, %s2399_s17  ;;  %v2252_v0 = vld [vmem:[%s3193_s4] ss:$0 sm:$0xff]  ;;  %s2407_s17 = smov 8   ;;  %vm1458_vm5 = vcmask 195712   ;;  %vm1697_vm6 = vcmask 261312  }
  0x15   : > { %v2253_v3 = vld [vmem:[%s3193_s4] ss:$0 sm:$0xff] }
  0x16   : > { %2122 = vmatmul.msk.bf16.vlgmr.msra.gmra.mxu0 %vm702_vm1, %v2186_v48  ;;  %2123 = vmatmul.msk.bf16.vlgmr.msra.gmra.mxu2 %vm702_vm1, %v2187_v51  ;;  %v2255_v21 = vld [vmem:[%s3195_s6] ss:$0 sm:$0xff] }
  0x26   : > { %2124 = vmatmul.msk.bf16.gmra.mxu2 %vm702_vm1, %v2188_v63 }
  0x7e   : > { %v547_v6 = vpop.permute.xlu0 %546 }
  0x7f   : > { %v551_v7 = vmul.f32 %v547_v6, %v528_v4  ;;  %v549_v8 = vmul.f32 %v547_v6, %v526_v5  ;;  %v552_v17 = vmul.f32 %v547_v6, %v529_v13  ;;  %v550_v18 = vmul.f32 %v547_v6, %v527_v14 }
  0x81   : > { %561 = vrot.lane.b32.xlu2 %v551_v7, %s2400_s24  ;;  %557 = vrot.lane.b32.xlu1 %v549_v8, %s2400_s24 }
  0x86   : > { %v600_v15 = vpop.permute.xlu0 %599 }
  0x87   : > { %v602_v16 = vmul.f32 %v600_v15, %v578_v12  ;;  %v605_v25 = vmul.f32 %v600_v15, %v581_v22  ;;  %v604_v26 = vmul.f32 %v600_v15, %v580_v23  ;;  %v603_v27 = vmul.f32 %v600_v15, %v579_v24  ;;  %v2189_v12 = vld [vmem:[%s2553_s30 + $0x18] sm:$0xff]  ;;  %s2403_s30 = smov 104  }
  0x88   : > { %2125 = vmatmul.msk.bf16.gmra.mxu2 %vm702_vm1, %v2189_v12 }
  0x89   : > { %610 = vrot.lane.b32.xlu0 %v602_v16, %s2400_s24  ;;  %563 = vrot.lane.b32.xlu2 %v552_v17, %s2400_s24  ;;  %v2254_v16 = vld [vmem:[%s3197_s8] ss:$0 sm:$0xff] }
  0x8a   : > { %559 = vrot.lane.b32.xlu1 %v550_v18, %s2400_s24 }
  0x91   : > { %616 = vrot.lane.b32.xlu0 %v605_v25, %s2400_s24  ;;  %614 = vrot.lane.b32.xlu2 %v604_v26, %s2400_s24 }
  0x92   : > { %612 = vrot.lane.b32.xlu1 %v603_v27, %s2400_s24 }
  0x93   : > { %v724_v15 = vpop.f32.mrf.mxu0 }
  0x94   : > { %v725_v25 = vadd.f32 %v2255_v21, %v724_v15 }
  0x99   : > { %v729_v13 = vpop.f32.mrf.mxu2 }
  0x9a   : > { %v730_v29 = vadd.f32 %v2255_v21, %v729_v13 }
  0x9b   : > { %v726_v23 = vpop.f32.mrf.mxu0 }
  0x9c   : > { %v727_v26 = vadd.f32 %v2255_v21, %v726_v23 }
  0x9e   : > { %v781_v28 = vpack.c.bf16 %v727_v26, %v725_v25 }
  0xa1   : > { %v731_v17 = vpop.f32.mrf.mxu2 }
  0xa9   : > { %v734_v27 = vpop.f32.mrf.mxu2 }
  0xdb   : > { %v562_v32 = vpop.permute.xlu2 %561 }
  0xdc   : > { %v571_v33 = vadd.f32 %v562_v32, %v536_v30  ;;  %v732_v30 = vadd.f32 %v2255_v21, %v731_v17  ;;  %v736_v32 = vpop.f32.mrf.mxu2 }
  0xde   : > { %v593_v34 = vadd.f32 %v589_v31, %v571_v33  ;;  %v2593_v31 = vpack.c.bf16 %v732_v30, %v730_v29  ;;  %v735_v33 = vadd.f32 %v2255_v21, %v734_v27 }
  0xe3   : > { %v564_v37 = vpop.permute.xlu2 %563 }
  0xe4   : > { %v572_v38 = vadd.f32 %v564_v37, %v537_v35 }
  0xe6   : > { %v594_v39 = vadd.f32 %v590_v36, %v572_v38 }
  0xeb   : > { %v615_v43 = vpop.permute.xlu2 %614 }
  0xec   : > { %v624_v45 = vadd.f32 %v615_v43, %v593_v34  ;;  %v737_v34 = vadd.f32 %v2255_v21, %v736_v32 }
  0xee   : > { %v643_v46 = vadd.f32 %v2250_v41, %v624_v45  ;;  %v2597_v35 = vpack.c.bf16 %v737_v34, %v735_v33 }
  0xf0   : > { %644 = vst.msk [vmem:[#allocation3 + $0x8] sm:$0xf] %vm631_vm0, %v643_v46 }
  0xf3   : > { %v558_v50 = vpop.permute.xlu1 %557 }
  0xf4   : > { %v569_v52 = vadd.f32 %v558_v50, %v534_v49 }
  0xf6   : > { %v591_v55 = vadd.f32 %v587_v53, %v569_v52 }
  0xfb   : > { %v611_v56 = vpop.permute.xlu0 %610 }
  0xfc   : > { %v622_v58 = vadd.f32 %v611_v56, %v591_v55  ;;  %v560_v59 = vpop.permute.xlu1 %559 }
  0xfd   : > { %v570_v61 = vadd.f32 %v560_v59, %v535_v57 }
  0xfe   : > { %v630_v60 = vadd.f32 %v2251_v54, %v622_v58 }
  0xff   : > { %v592_v2 = vadd.f32 %v588_v62, %v570_v61 }
 0x100   : > { %632 = vst.msk [vmem:[#allocation3] sm:$0xf] %vm631_vm0, %v630_v60 }
 0x103   : > { %v617_v1 = vpop.permute.xlu0 %616 }
 0x104   : > { %v625_v4 = vadd.f32 %v617_v1, %v594_v39  ;;  %v613_v5 = vpop.permute.xlu1 %612 }
 0x105   : > { %v623_v6 = vadd.f32 %v613_v5, %v592_v2 }
 0x106   : > { %v649_v7 = vadd.f32 %v2252_v0, %v625_v4 }
 0x107   : > { %v637_v8 = vadd.f32 %v2253_v3, %v623_v6 }
 0x108   : > { %650 = vst.msk [vmem:[#allocation3 + $0xc] sm:$0xf] %vm631_vm0, %v649_v7 }
 0x109   : > { %638 = vst.msk [vmem:[#allocation3 + $0x4] sm:$0xf] %vm631_vm0, %v637_v8 }
 0x10b   : > { %v739_v36 = vpop.f32.mrf.mxu2 }
 0x10c   : > { %v740_v38 = vadd.f32 %v2255_v21, %v739_v36 }
 0x10f   : > { %v652_v9 = vld [vmem:[#allocation3 + $0x8] sm:$0xff] }
 0x110   : > { %v651_v10 = vld [vmem:[#allocation3] sm:$0xff] }
 0x111   : > { %v653_v11 = vpack.c.bf16 %v652_v9, %v651_v10 }
 0x113   : > { %2134 = vmatmul.msk.bf16.vlgmr.msra.gmra.mxu1 %vm702_vm1, %v653_v11  ;;  %v741_v37 = vpop.f32.mrf.mxu2 }
 0x114   : > { %v742_v39 = vadd.f32 %v2255_v21, %v741_v37 }
 0x116   : > { %v2605_v40 = vpack.c.bf16 %v742_v39, %v740_v38 }
 0x190   : > { %v776_v14 = vpop.f32.mrf.mxu1 }
 0x191   : > { %v777_v19 = vadd.f32 %v2254_v16, %v776_v14 }
 0x198   : > { %v778_v18 = vpop.f32.mrf.mxu1 }
 0x199   : > { %v779_v20 = vadd.f32 %v2254_v16, %v778_v18 }
 0x19b   : > { %v2585_v22 = vpack.c.bf16 %v779_v20, %v777_v19 }
 0x19d   : > { %997 = vrot.lane.b32.xlu0 %v2585_v22, %s2401_s27  ;;  %v800_v24 = vsel %vm786_vm2, %v2585_v22, 0 }
 0x19e   : > { %809 = vmatpush.bf16.xpose.msrb.mxu2 %v800_v24 }
 0x1a5   : > { %989 = vrot.lane.b32.xlu0 %v781_v28, %s2401_s27  ;;  %2135 = vmatmul.msk.bf16.vlgmr.msrb.gmra.mxu2 %vm786_vm2, %v781_v28 }
 0x1ad   : > { %991 = vrot.lane.b32.xlu0 %v2593_v31, %s2401_s27 }
 0x1b5   : > { %993 = vrot.lane.b32.xlu0 %v2597_v35, %s2401_s27  ;;  %2136 = vmatmul.msk.bf16.gmra.mxu2 %vm786_vm2, %v2593_v31 }
 0x1c5   : > { %2137 = vmatmul.msk.bf16.gmra.mxu2 %vm786_vm2, %v2597_v35 }
 0x1d5   : > { %2138 = vmatmul.msk.bf16.gmra.mxu2 %vm786_vm2, %v2605_v40 }
 0x20f   : > { %v998_v41 = vpop.permute.xlu0 %997 }
 0x210   : > { %v1012_v42 = vsel %vm786_vm2, %v998_v41, 0 }
 0x211   : > { %1021 = vmatpush.bf16.xpose.msrb.mxu1 %v1012_v42 }
 0x217   : > { %v990_v43 = vpop.permute.xlu0 %989 }
 0x218   : > { %2143 = vmatmul.msk.bf16.vlgmr.msrb.gmra.mxu1 %vm786_vm2, %v990_v43 }
 0x21f   : > { %v992_v44 = vpop.permute.xlu0 %991 }
 0x227   : > { %v994_v51 = vpop.permute.xlu0 %993 }
 0x228   : > { %v811_v45 = vpop.f32.mrf.mxu2  ;;  %2144 = vmatmul.msk.bf16.gmra.mxu1 %vm786_vm2, %v992_v44 }
 0x229   : > { %v831_v46 = vmul.f32 0.35355338, %v811_v45 }
 0x22b   : > { %v840_v47 = vsel %vm839_vm3, %v831_v46, -inf }
 0x22c   : > { %841 = vmax.xlane.f32.xlu1 %v840_v47 }
 0x230   : > { %v813_v48 = vpop.f32.mrf.mxu2 }
 0x231   : > { %v832_v49 = vmul.f32 0.35355338, %v813_v48 }
 0x233   : > { %v843_v50 = vsel %vm839_vm3, %v832_v49, -inf }
 0x234   : > { %844 = vmax.xlane.f32.xlu2 %v843_v50 }
 0x238   : > { %2145 = vmatmul.msk.bf16.gmra.mxu1 %vm786_vm2, %v994_v51  ;;  %v816_v52 = vpop.f32.mrf.mxu2 }
 0x240   : > { %v2626_v53 = vpop.f32.mrf.mxu2 }
 0x241   : > { %v2673_v34 = vmul.f32 0.35355338, %v2626_v53 }
 0x243   : > { %v849_v38 = vsel %vm839_vm3, %v2673_v34, -inf }
 0x245   : > { %933 = vrot.lane.b32.xlu1 %v2585_v22, %s2400_s24  ;;  %s2404_s24 = smov 88  }
 0x248   : > { %v821_v54 = vpop.f32.mrf.mxu2 }
 0x249   : > { %v2630_v57 = vmul.f32 0.35355338, %v821_v54 }
 0x24b   : > { %v852_v60 = vsel %vm839_vm3, %v2630_v57, -inf }
 0x24c   : > { %995 = vrot.lane.b32.xlu2 %v2605_v40, %s2401_s27 }
 0x24d   : > { %1236 = vrot.lane.b32.xlu1 %v2585_v22, %s2402_s28 }
 0x250   : > { %v823_v55 = vpop.f32.mrf.mxu2 }
 0x251   : > { %v836_v30 = vmul.f32 0.35355338, %v823_v55 }
 0x253   : > { %v855_v32 = vsel %vm839_vm3, %v836_v30, -inf }
 0x254   : > { %1475 = vrot.lane.b32.xlu2 %v2585_v22, %s2403_s30 }
 0x255   : > { %1228 = vrot.lane.b32.xlu1 %v781_v28, %s2402_s28 }
 0x258   : > { %v2628_v56 = vpop.f32.mrf.mxu2 }
 0x25c   : > { %1467 = vrot.lane.b32.xlu2 %v781_v28, %s2403_s30  ;;  %v833_v28 = vmul.f32 0.35355338, %v816_v52 }
 0x25d   : > { %1469 = vrot.lane.b32.xlu1 %v2593_v31, %s2403_s30 }
 0x25e   : > { %v846_v29 = vsel %vm839_vm3, %v833_v28, -inf }
 0x260   : > { %v828_v59 = vpop.f32.mrf.mxu2 }
 0x261   : > { %v2634_v61 = vmul.f32 0.35355338, %v828_v59 }
 0x263   : > { %v861_v62 = vsel %vm839_vm3, %v2634_v61, -inf }
 0x265   : > { %1471 = vrot.lane.b32.xlu1 %v2597_v35, %s2403_s30 }
 0x26d   : > { %1473 = vrot.lane.b32.xlu1 %v2605_v40, %s2403_s30 }
 0x295   : > { %v1023_v58 = vpop.f32.mrf.mxu1 }
 0x296   : > { %v2670_v33 = vmul.f32 0.35355338, %v1023_v58 }
 0x297   : > { %853 = vmax.xlane.f32.xlu1 %v852_v60 }
 0x298   : > { %v1051_v36 = vsel %vm839_vm3, %v2670_v33, -inf }
 0x29d   : > { %v2638_v63 = vpop.f32.mrf.mxu1 }
 0x29e   : > { %v2689_v42 = vmul.f32 0.35355338, %v2638_v63 }
 0x29f   : > { %v842_v0 = vpop.xlane.xlu1 %841  ;;  %862 = vmax.xlane.f32.xlu1 %v861_v62 }
 0x2a0   : > { %v864_v1 = vsub.f32 %v831_v46, %v842_v0  ;;  %v1054_v43 = vsel %vm839_vm3, %v2689_v42, -inf }
 0x2a2   : > { %v872_v2 = vmul.f32 1.442695, %v864_v1 }
 0x2a4   : > { %2259 = vpow2.f32 %v872_v2 }
 0x2a5   : > { %v2640_v3 = vpop.f32.mrf.mxu1 }
 0x2a6   : > { %v2694_v44 = vmul.f32 0.35355338, %v2640_v3 }
 0x2a7   : > { %v845_v4 = vpop.xlane.xlu2 %844 }
 0x2a8   : > { %v865_v5 = vsub.f32 %v832_v49, %v845_v4  ;;  %v1057_v45 = vsel %vm839_vm3, %v2694_v44, -inf }
 0x2aa   : > { %v2642_v6 = vpop.eup %2259  ;;  %v874_v7 = vmul.f32 1.442695, %v865_v5 }
 0x2ab   : > { %v888_v8 = vsel %vm839_vm3, %v2642_v6, 0.0 }
 0x2ac   : > { %2261 = vpow2.f32 %v874_v7  ;;  %889 = vadd.xlane.f32.xlu0 %v888_v8 }
 0x2ad   : > { %v1030_v9 = vpop.f32.mrf.mxu1 }
 0x2ae   : > { %v2646_v10 = vmul.f32 0.35355338, %v1030_v9 }
 0x2af   : > { %v996_v11 = vpop.permute.xlu2 %995 }
 0x2b0   : > { %2146 = vmatmul.msk.bf16.gmra.mxu1 %vm786_vm2, %v996_v11  ;;  %v1060_v12 = vsel %vm839_vm3, %v2646_v10, -inf }
 0x2b1   : > { %1061 = vmax.xlane.f32.xlu1 %v1060_v12 }
 0x2b2   : > { %v2262_v13 = vpop.eup %2261 }
 0x2b3   : > { %v891_v14 = vsel %vm839_vm3, %v2262_v13, 0.0 }
 0x2b4   : > { %892 = vadd.xlane.f32.xlu2 %v891_v14 }
 0x2b5   : > { %v1033_v15 = vpop.f32.mrf.mxu1 }
 0x2b6   : > { %v2652_v16 = vmul.f32 0.35355338, %v1033_v15 }
 0x2b7   : > { %v934_v17 = vpop.permute.xlu1 %933  ;;  %v1476_v18 = vpop.permute.xlu2 %1475 }
 0x2b8   : > { %v1490_v19 = vsel %vm786_vm2, %v1476_v18, 0  ;;  %955 = vmatpush.bf16.msrb.mxu0 %v934_v17  ;;  %2217 = vmatpush.bf16.msra.mxu3 %v934_v17  ;;  %v1063_v20 = vsel %vm839_vm3, %v2652_v16, -inf }
 0x2b9   : > { %1499 = vmatpush.bf16.xpose.msra.mxu1 %v1490_v19  ;;  %1064 = vmax.xlane.f32.xlu1 %v1063_v20 }
 0x2bf   : > { %v1237_v21 = vpop.permute.xlu1 %1236  ;;  %v1468_v23 = vpop.permute.xlu2 %1467 }
 0x2c0   : > { %v1251_v24 = vsel %vm786_vm2, %v1237_v21, 0  ;;  %1230 = vrot.lane.b32.xlu0 %v2593_v31, %s2402_s28  ;;  %2159 = vmatmul.msk.bf16.vlgmr.msra.gmra.mxu1 %vm786_vm2, %v1468_v23 }
 0x2c1   : > { %1260 = vmatpush.bf16.xpose.msra.mxu0 %v1251_v24 }
 0x2c7   : > { %v1229_v25 = vpop.permute.xlu1 %1228 }
 0x2cc   : > { %1232 = vrot.lane.b32.xlu2 %v2597_v35, %s2402_s28  ;;  %v1035_v35 = vpop.f32.mrf.mxu1 }
 0x2cd   : > { %v2677_v37 = vmul.f32 0.35355338, %v1035_v35 }
 0x2cf   : > { %v1470_v26 = vpop.permute.xlu1 %1469  ;;  %v1066_v39 = vsel %vm839_vm3, %v2677_v37, -inf }
 0x2d0   : > { %2160 = vmatmul.msk.bf16.gmra.mxu1 %vm786_vm2, %v1470_v26 }
 0x2d4   : > { %1234 = vrot.lane.b32.xlu2 %v2605_v40, %s2402_s28  ;;  %v2684_v40 = vmul.f32 0.35355338, %v2628_v56  ;;  %s3087_s28 = scalar_lea.vmem %s3191_s2, %s2541_s21 }
 0x2d6   : > { %v858_v41 = vsel %vm839_vm3, %v2684_v40, -inf }
 0x2d7   : > { %v1472_v27 = vpop.permute.xlu1 %1471 }
 0x2df   : > { %v1474_v31 = vpop.permute.xlu1 %1473 }
 0x2e0   : > { %2161 = vmatmul.msk.bf16.gmra.mxu1 %vm786_vm2, %v1472_v27 }
 0x2ea   : > { %847 = vmax.xlane.f32.xlu0 %v846_v29 }
 0x2f0   : > { %2162 = vmatmul.msk.bf16.gmra.mxu1 %vm786_vm2, %v1474_v31 }
 0x2f2   : > { %856 = vmax.xlane.f32.xlu0 %v855_v32 }
 0x2fa   : > { %1052 = vmax.xlane.f32.xlu0 %v1051_v36 }
 0x2fd   : > { %850 = vmax.xlane.f32.xlu2 %v849_v38 }
 0x302   : > { %1067 = vmax.xlane.f32.xlu0 %v1066_v39 }
 0x305   : > { %859 = vmax.xlane.f32.xlu2 %v858_v41 }
 0x30a   : > { %v854_v63 = vpop.xlane.xlu1 %853 }
 0x30b   : > { %v868_v29 = vsub.f32 %v2630_v57, %v854_v63 }
 0x30d   : > { %1055 = vmax.xlane.f32.xlu2 %v1054_v43  ;;  %v880_v32 = vmul.f32 1.442695, %v868_v29 }
 0x312   : > { %v863_v5 = vpop.xlane.xlu1 %862 }
 0x313   : > { %v871_v9 = vsub.f32 %v2634_v61, %v863_v5 }
 0x315   : > { %1058 = vmax.xlane.f32.xlu2 %v1057_v45  ;;  %v886_v14 = vmul.f32 1.442695, %v871_v9 }
 0x31f   : > { %v890_v46 = vpop.xlane.xlu0 %889 }
 0x320   : > { %2263 = vrcp.f32 %v890_v46 }
 0x326   : > { %v2264_v48 = vpop.eup %2263 }
 0x327   : > { %v893_v47 = vpop.xlane.xlu2 %892  ;;  %v920_v51 = vmul.f32 %v2264_v48, %v2642_v6 }
 0x328   : > { %2265 = vrcp.f32 %v893_v47 }
 0x32d   : > { %v1038_v49 = vpop.f32.mrf.mxu1 }
 0x32e   : > { %v2266_v50 = vpop.eup %2265 }
 0x32f   : > { %v921_v52 = vmul.f32 %v2266_v50, %v2262_v13  ;;  %v1233_v1 = vpop.permute.xlu2 %1232 }
 0x331   : > { %v928_v53 = vpack.c.bf16 %v921_v52, %v920_v51 }
 0x332   : > { %v1231_v60 = vpop.permute.xlu0 %1230 }
 0x333   : > { %2139 = vmatmul.msk.bf16.vlgmr.msrb.gmra.mxu0 %vm839_vm3, %v928_v53 }
 0x335   : > { %v1040_v54 = vpop.f32.mrf.mxu1 }
 0x336   : > { %v2700_v55 = vmul.f32 0.35355338, %v1040_v54 }
 0x337   : > { %v1235_v11 = vpop.permute.xlu2 %1234 }
 0x338   : > { %v1072_v56 = vsel %vm839_vm3, %v2700_v55, -inf }
 0x339   : > { %1073 = vmax.xlane.f32.xlu2 %v1072_v56 }
 0x33d   : > { %v1501_v58 = vpop.f32.mrf.mxu1 }
 0x33e   : > { %v2718_v17 = vmul.f32 0.35355338, %v1501_v58 }
 0x340   : > { %v1529_v21 = vsel %vm839_vm3, %v2718_v17, -inf }
 0x343   : > { %2151 = vmatmul.msk.bf16.vlgmr.msra.gmra.mxu0 %vm786_vm2, %v1229_v25 }
 0x345   : > { %v2705_v59 = vpop.f32.mrf.mxu1 }
 0x34d   : > { %v2708_v62 = vpop.f32.mrf.mxu1 }
 0x34e   : > { %v2770_v63 = vmul.f32 0.35355338, %v2708_v62 }
 0x353   : > { %2152 = vmatmul.msk.bf16.gmra.mxu0 %vm786_vm2, %v1231_v60 }
 0x355   : > { %v1508_v4 = vpop.f32.mrf.mxu1 }
 0x356   : > { %v2737_v31 = vmul.f32 0.35355338, %v1508_v4  ;;  %v1062_v4 = vpop.xlane.xlu1 %1061 }
 0x358   : > { %v1538_v36 = vsel %vm839_vm3, %v2737_v31, -inf }
 0x35d   : > { %v848_v0 = vpop.xlane.xlu0 %847  ;;  %v2716_v15 = vpop.f32.mrf.mxu1 }
 0x35e   : > { %v866_v2 = vsub.f32 %v833_v28, %v848_v0  ;;  %v2781_v62 = vmul.f32 0.35355338, %v2716_v15 }
 0x360   : > { %v876_v3 = vmul.f32 1.442695, %v866_v2  ;;  %v1535_v2 = vsel %vm839_vm3, %v2770_v63, -inf }
 0x362   : > { %2267 = vpow2.f32 %v876_v3 }
 0x363   : > { %2153 = vmatmul.msk.bf16.gmra.mxu0 %vm786_vm2, %v1233_v1 }
 0x365   : > { %v857_v6 = vpop.xlane.xlu0 %856  ;;  %v1513_v25 = vpop.f32.mrf.mxu1 }
 0x366   : > { %v869_v7 = vsub.f32 %v836_v30, %v857_v6  ;;  %v2747_v39 = vmul.f32 0.35355338, %v1513_v25 }
 0x368   : > { %v2711_v8 = vpop.eup %2267  ;;  %v882_v12 = vmul.f32 1.442695, %v869_v7  ;;  %v1544_v46 = vsel %vm839_vm3, %v2747_v39, -inf  ;;  %v1541_v7 = vsel %vm839_vm3, %v2781_v62, -inf }
 0x369   : > { %v894_v13 = vsel %vm839_vm3, %v2711_v8, 0.0 }
 0x36a   : > { %2269 = vpow2.f32 %v882_v12  ;;  %895 = vadd.xlane.f32.xlu1 %v894_v13  ;;  %v1065_v13 = vpop.xlane.xlu1 %1064 }
 0x36b   : > { %2271 = vpow2.f32 %v886_v14 }
 0x36d   : > { %v2741_v35 = vpop.f32.mrf.mxu1  ;;  %v1053_v41 = vpop.xlane.xlu0 %1052 }
 0x36e   : > { %v1075_v43 = vsub.f32 %v2670_v33, %v1053_v41  ;;  %v2760_v33 = vmul.f32 0.35355338, %v2705_v59  ;;  %v2809_v29 = vmul.f32 0.35355338, %v2741_v35 }
 0x370   : > { %v2720_v18 = vpop.eup %2269  ;;  %v851_v19 = vpop.xlane.xlu2 %850  ;;  %v1083_v48 = vmul.f32 1.442695, %v1075_v43  ;;  %v1532_v56 = vsel %vm839_vm3, %v2760_v33, -inf }
 0x371   : > { %v867_v20 = vsub.f32 %v2673_v34, %v851_v19  ;;  %v903_v61 = vsel %vm839_vm3, %v2720_v18, 0.0  ;;  %v2728_v24 = vpop.eup %2271  ;;  %v2739_v34 = vmul.f32 0.35355338, %v1038_v49 }
 0x372   : > { %904 = vadd.xlane.f32.xlu2 %v903_v61  ;;  %1530 = vmax.xlane.f32.xlu1 %v1529_v21  ;;  %v909_v27 = vsel %vm839_vm3, %v2728_v24, 0.0 }
 0x373   : > { %v878_v23 = vmul.f32 1.442695, %v867_v20  ;;  %2154 = vmatmul.msk.bf16.gmra.mxu0 %vm786_vm2, %v1235_v11  ;;  %v1069_v57 = vsel %vm839_vm3, %v2739_v34, -inf }
 0x375   : > { %2273 = vpow2.f32 %v878_v23  ;;  %v1518_v47 = vpop.f32.mrf.mxu1  ;;  %v1068_v58 = vpop.xlane.xlu0 %1067 }
 0x376   : > { %2275 = vpow2.f32 %v880_v32  ;;  %v2757_v50 = vmul.f32 0.35355338, %v1518_v47  ;;  %v1080_v59 = vsub.f32 %v2677_v37, %v1068_v58 }
 0x377   : > { %2277 = vpow2.f32 %v1083_v48 }
 0x378   : > { %v860_v26 = vpop.xlane.xlu2 %859  ;;  %v1550_v53 = vsel %vm839_vm3, %v2757_v50, -inf  ;;  %v1093_v1 = vmul.f32 1.442695, %v1080_v59 }
 0x379   : > { %v870_v37 = vsub.f32 %v2684_v40, %v860_v26 }
 0x37a   : > { %910 = vadd.xlane.f32.xlu1 %v909_v27 }
 0x37b   : > { %v2732_v28 = vpop.eup %2273  ;;  %v884_v9 = vmul.f32 1.442695, %v870_v37 }
 0x37c   : > { %v897_v30 = vsel %vm839_vm3, %v2732_v28, 0.0  ;;  %v2750_v45 = vpop.eup %2275 }
 0x37d   : > { %898 = vadd.xlane.f32.xlu0 %v897_v30  ;;  %v900_v49 = vsel %vm839_vm3, %v2750_v45, 0.0  ;;  %v2767_v60 = vpop.eup %2277 }
 0x380   : > { %v1056_v38 = vpop.xlane.xlu2 %1055 }
 0x381   : > { %v1076_v0 = vsub.f32 %v2689_v42, %v1056_v38  ;;  %v1078_v42 = vsub.f32 %v2646_v10, %v1062_v4  ;;  %v1079_v10 = vsub.f32 %v2652_v16, %v1065_v13 }
 0x382   : > { %1539 = vmax.xlane.f32.xlu1 %v1538_v36 }
 0x383   : > { %v1085_v5 = vmul.f32 1.442695, %v1076_v0  ;;  %v1089_v12 = vmul.f32 1.442695, %v1078_v42  ;;  %v1091_v61 = vmul.f32 1.442695, %v1079_v10 }
 0x385   : > { %1070 = vmax.xlane.f32.xlu0 %v1069_v57 }
 0x388   : > { %v1059_v51 = vpop.xlane.xlu2 %1058 }
 0x389   : > { %v1077_v52 = vsub.f32 %v2694_v44, %v1059_v51  ;;  %v1099_v44 = vsel %vm839_vm3, %v2767_v60, 0.0 }
 0x38a   : > { %1143 = vrot.lane.b32.xlu2 %v2585_v22, %s2404_s24  ;;  %1545 = vmax.xlane.f32.xlu1 %v1544_v46 }
 0x38b   : > { %v1087_v54 = vmul.f32 1.442695, %v1077_v52 }
 0x38d   : > { %901 = vadd.xlane.f32.xlu0 %v900_v49  ;;  %2279 = vpow2.f32 %v1087_v54 }
 0x38e   : > { %2281 = vpow2.f32 %v1093_v1 }
 0x38f   : > { %2283 = vpow2.f32 %v1085_v5 }
 0x390   : > { %2285 = vpow2.f32 %v884_v9 }
 0x391   : > { %2287 = vpow2.f32 %v1089_v12 }
 0x392   : > { %1551 = vmax.xlane.f32.xlu1 %v1550_v53  ;;  %2289 = vpow2.f32 %v1091_v61 }
 0x393   : > { %v2778_v3 = vpop.eup %2279 }
 0x394   : > { %v1105_v6 = vsel %vm839_vm3, %v2778_v3, 0.0  ;;  %v2789_v11 = vpop.eup %2281 }
 0x395   : > { %1533 = vmax.xlane.f32.xlu0 %v1532_v56  ;;  %v2791_v14 = vpop.eup %2283  ;;  %v1114_v40 = vsel %vm839_vm3, %v2789_v11, 0.0 }
 0x396   : > { %v1102_v15 = vsel %vm839_vm3, %v2791_v14, 0.0  ;;  %v2798_v20 = vpop.eup %2285 }
 0x397   : > { %v2800_v23 = vpop.eup %2287  ;;  %v906_v26 = vsel %vm839_vm3, %v2798_v20, 0.0 }
 0x398   : > { %v1108_v16 = vsel %vm839_vm3, %v2800_v23, 0.0  ;;  %v2811_v32 = vpop.eup %2289 }
 0x399   : > { %v1111_v36 = vsel %vm839_vm3, %v2811_v32, 0.0 }
 0x39a   : > { %1100 = vadd.xlane.f32.xlu1 %v1099_v44 }
 0x39d   : > { %1536 = vmax.xlane.f32.xlu0 %v1535_v2 }
 0x3a2   : > { %1106 = vadd.xlane.f32.xlu1 %v1105_v6 }
 0x3a5   : > { %1542 = vmax.xlane.f32.xlu0 %v1541_v7 }
 0x3aa   : > { %1115 = vadd.xlane.f32.xlu1 %v1114_v40 }
 0x3ac   : > { %v1074_v19 = vpop.xlane.xlu2 %1073 }
 0x3ad   : > { %1103 = vadd.xlane.f32.xlu0 %v1102_v15  ;;  %v1082_v25 = vsub.f32 %v2700_v55, %v1074_v19  ;;  %v1547_v55 = vsel %vm839_vm3, %v2809_v29, -inf }
 0x3af   : > { %v1097_v27 = vmul.f32 1.442695, %v1082_v25 }
 0x3b0   : > { %v957_v21 = vpop.f32.mrf.mxu0 }
 0x3b1   : > { %977 = vst.msk [vmem:[#allocation2] sm:$0xff] %vm786_vm2, %v957_v21  ;;  %2291 = vpow2.f32 %v1097_v27 }
 0x3b3   : > { %907 = vadd.xlane.f32.xlu2 %v906_v26 }
 0x3b5   : > { %1109 = vadd.xlane.f32.xlu0 %v1108_v16 }
 0x3b7   : > { %v2818_v38 = vpop.eup %2291 }
 0x3b8   : > { %v959_v30 = vpop.f32.mrf.mxu0  ;;  %v1120_v35 = vsel %vm839_vm3, %v2818_v38, 0.0 }
 0x3b9   : > { %978 = vst.msk [vmem:[#allocation2 + $0x8] sm:$0xff] %vm786_vm2, %v959_v30 }
 0x3bb   : > { %1548 = vmax.xlane.f32.xlu2 %v1547_v55 }
 0x3bd   : > { %1112 = vadd.xlane.f32.xlu0 %v1111_v36 }
 0x3c0   : > { %v1262_v57 = vpop.f32.mrf.mxu0 }
 0x3c1   : > { %v2831_v1 = vmul.f32 0.35355338, %v1262_v57 }
 0x3c3   : > { %1121 = vadd.xlane.f32.xlu2 %v1120_v35  ;;  %v1290_v42 = vsel %vm839_vm3, %v2831_v1, -inf }
 0x3c8   : > { %v1264_v41 = vpop.f32.mrf.mxu0 }
 0x3c9   : > { %v2849_v61 = vmul.f32 0.35355338, %v1264_v41 }
 0x3cb   : > { %v1293_v35 = vsel %vm839_vm3, %v2849_v61, -inf }
 0x3d0   : > { %v1267_v43 = vpop.f32.mrf.mxu0 }
 0x3d1   : > { %v2822_v46 = vmul.f32 0.35355338, %v1267_v43 }
 0x3d3   : > { %v1296_v47 = vsel %vm839_vm3, %v2822_v46, -inf }
 0x3d4   : > { %1297 = vmax.xlane.f32.xlu2 %v1296_v47 }
 0x3d8   : > { %v1269_v54 = vpop.f32.mrf.mxu0 }
 0x3d9   : > { %v2839_v12 = vmul.f32 0.35355338, %v1269_v54 }
 0x3dd   : > { %v896_v48 = vpop.xlane.xlu1 %895 }
 0x3e0   : > { %v1272_v2 = vpop.f32.mrf.mxu0 }
 0x3e1   : > { %v2869_v47 = vmul.f32 0.35355338, %v1272_v2 }
 0x3e5   : > { %v905_v49 = vpop.xlane.xlu2 %904  ;;  %v1531_v51 = vpop.xlane.xlu1 %1530 }
 0x3e6   : > { %v1553_v52 = vsub.f32 %v2718_v17, %v1531_v51 }
 0x3e8   : > { %v1561_v53 = vmul.f32 1.442695, %v1553_v52  ;;  %v1274_v13 = vpop.f32.mrf.mxu0 }
 0x3e9   : > { %v2847_v15 = vmul.f32 0.35355338, %v1274_v13 }
 0x3ea   : > { %2293 = vpow2.f32 %v1561_v53 }
 0x3eb   : > { %2295 = vrcp.f32 %v896_v48  ;;  %v1305_v27 = vsel %vm839_vm3, %v2847_v15, -inf }
 0x3ed   : > { %v1144_v56 = vpop.permute.xlu2 %1143  ;;  %v911_v30 = vpop.xlane.xlu1 %910 }
 0x3ee   : > { %1165 = vmatpush.bf16.msrb.mxu3 %v1144_v56 }
 0x3f0   : > { %v2827_v58 = vpop.eup %2293  ;;  %v899_v59 = vpop.xlane.xlu0 %898 }
 0x3f1   : > { %2297 = vrcp.f32 %v899_v59  ;;  %v1577_v44 = vsel %vm839_vm3, %v2827_v58, 0.0  ;;  %v2296_v0 = vpop.eup %2295  ;;  %v1277_v55 = vpop.f32.mrf.mxu0 }
 0x3f2   : > { %1578 = vadd.xlane.f32.xlu1 %v1577_v44  ;;  %v922_v5 = vmul.f32 %v2296_v0, %v2711_v8  ;;  %v1299_v8 = vsel %vm839_vm3, %v2839_v12, -inf  ;;  %v2859_v41 = vmul.f32 0.35355338, %v1277_v55 }
 0x3f7   : > { %v2298_v4 = vpop.eup %2297 }
 0x3f8   : > { %v1071_v17 = vpop.xlane.xlu0 %1070  ;;  %v923_v37 = vmul.f32 %v2298_v4, %v2732_v28 }
 0x3f9   : > { %v1081_v6 = vsub.f32 %v2739_v34, %v1071_v17  ;;  %v1279_v51 = vpop.f32.mrf.mxu0 }
 0x3fa   : > { %1291 = vmax.xlane.f32.xlu1 %v1290_v42  ;;  %v929_v7 = vpack.c.bf16 %v923_v37, %v922_v5  ;;  %v2875_v53 = vmul.f32 0.35355338, %v1279_v51 }
 0x3fb   : > { %v1095_v9 = vmul.f32 1.442695, %v1081_v6 }
 0x3fc   : > { %2140 = vmatmul.msk.bf16.vlgmr.msra.gmra.mxu3 %vm839_vm3, %v929_v7  ;;  %v1311_v54 = vsel %vm839_vm3, %v2875_v53, -inf }
 0x3fd   : > { %2299 = vpow2.f32 %v1095_v9 }
 0x3fe   : > { %2301 = vrcp.f32 %v905_v49  ;;  %v1302_v49 = vsel %vm839_vm3, %v2869_v47, -inf }
 0x400   : > { %v902_v40 = vpop.xlane.xlu0 %901 }
 0x401   : > { %2303 = vrcp.f32 %v902_v40 }
 0x402   : > { %1300 = vmax.xlane.f32.xlu1 %v1299_v8 }
 0x403   : > { %v2843_v28 = vpop.eup %2299 }
 0x404   : > { %v1117_v34 = vsel %vm839_vm3, %v2843_v28, 0.0  ;;  %v2302_v10 = vpop.eup %2301 }
 0x405   : > { %1118 = vadd.xlane.f32.xlu0 %v1117_v34  ;;  %v925_v26 = vmul.f32 %v2302_v10, %v2720_v18  ;;  %v1308_v18 = vsel %vm839_vm3, %v2859_v41, -inf }
 0x407   : > { %v2304_v19 = vpop.eup %2303 }
 0x408   : > { %v1534_v21 = vpop.xlane.xlu0 %1533  ;;  %v924_v25 = vmul.f32 %v2304_v19, %v2750_v45 }
 0x409   : > { %v1554_v16 = vsub.f32 %v2760_v33, %v1534_v21  ;;  %v2865_v33 = vpop.xlane.xlu1 %1539 }
 0x40a   : > { %1306 = vmax.xlane.f32.xlu1 %v1305_v27  ;;  %v930_v36 = vpack.c.bf16 %v925_v26, %v924_v25 }
 0x40b   : > { %v1563_v57 = vmul.f32 1.442695, %v1554_v16 }
 0x40c   : > { %2141 = vmatmul.msk.bf16.gmra.mxu3 %vm839_vm3, %v930_v36 }
 0x40d   : > { %2305 = vpow2.f32 %v1563_v57  ;;  %1294 = vmax.xlane.f32.xlu0 %v1293_v35 }
 0x40e   : > { %2307 = vrcp.f32 %v911_v30 }
 0x410   : > { %v1537_v48 = vpop.xlane.xlu0 %1536 }
 0x411   : > { %v2873_v52 = vpop.xlane.xlu1 %1545  ;;  %v1555_v35 = vsub.f32 %v2770_v63, %v1537_v48 }
 0x412   : > { %1309 = vmax.xlane.f32.xlu1 %v1308_v18 }
 0x413   : > { %v2863_v45 = vpop.eup %2305 }
 0x414   : > { %v1580_v43 = vsel %vm839_vm3, %v2863_v45, 0.0  ;;  %v2308_v0 = vpop.eup %2307 }
 0x415   : > { %1581 = vadd.xlane.f32.xlu0 %v1580_v43  ;;  %v927_v17 = vmul.f32 %v2308_v0, %v2728_v24  ;;  %v1565_v43 = vmul.f32 1.442695, %v1555_v35 }
 0x418   : > { %v2879_v56 = vpop.xlane.xlu0 %1542 }
 0x419   : > { %v2881_v44 = vpop.xlane.xlu1 %1551 }
 0x41d   : > { %1303 = vmax.xlane.f32.xlu0 %v1302_v49 }
 0x420   : > { %v1104_v5 = vpop.xlane.xlu0 %1103 }
 0x421   : > { %v1101_v6 = vpop.xlane.xlu1 %1100 }
 0x425   : > { %1312 = vmax.xlane.f32.xlu0 %v1311_v54 }
 0x426   : > { %v908_v59 = vpop.xlane.xlu2 %907 }
 0x427   : > { %2309 = vrcp.f32 %v908_v59 }
 0x428   : > { %2311 = vrcp.f32 %v1104_v5  ;;  %v1110_v40 = vpop.xlane.xlu0 %1109 }
 0x429   : > { %2313 = vrcp.f32 %v1101_v6  ;;  %v1107_v34 = vpop.xlane.xlu1 %1106 }
 0x42a   : > { %2315 = vrcp.f32 %v1110_v40 }
 0x42b   : > { %1621 = vrot.lane.b32.xlu1 %v2585_v22, %s2405_s15  ;;  %2317 = vrcp.f32 %v1107_v34 }
 0x42d   : > { %v2310_v2 = vpop.eup %2309 }
 0x42e   : > { %v926_v4 = vmul.f32 %v2310_v2, %v2798_v20  ;;  %v2312_v42 = vpop.eup %2311  ;;  %v2896_v55 = vpop.xlane.xlu2 %1548 }
 0x42f   : > { %v2314_v7 = vpop.eup %2313  ;;  %v1132_v9 = vmul.f32 %v2312_v42, %v2791_v14 }
 0x430   : > { %v931_v37 = vpack.c.bf16 %v927_v17, %v926_v4  ;;  %v1131_v13 = vmul.f32 %v2314_v7, %v2767_v60  ;;  %v2316_v24 = vpop.eup %2315  ;;  %v1113_v21 = vpop.xlane.xlu0 %1112 }
 0x431   : > { %v2318_v20 = vpop.eup %2317  ;;  %v1134_v10 = vmul.f32 %v2316_v24, %v2800_v23  ;;  %v1116_v26 = vpop.xlane.xlu1 %1115  ;;  %2319 = vrcp.f32 %v1113_v21 }
 0x432   : > { %2142 = vmatmul.msk.bf16.gmra.mxu3 %vm839_vm3, %v931_v37  ;;  %v1139_v8 = vpack.c.bf16 %v1132_v9, %v1131_v13  ;;  %v1133_v19 = vmul.f32 %v2318_v20, %v2778_v3  ;;  %2321 = vrcp.f32 %v1116_v26 }
 0x434   : > { %v1140_v25 = vpack.c.bf16 %v1134_v10, %v1133_v19 }
 0x436   : > { %v1122_v3 = vpop.xlane.xlu2 %1121 }
 0x437   : > { %v2320_v60 = vpop.eup %2319 }
 0x438   : > { %v2322_v14 = vpop.eup %2321  ;;  %v1135_v16 = vmul.f32 %v2320_v60, %v2811_v32 }
 0x439   : > { %v1136_v27 = vmul.f32 %v2322_v14, %v2789_v11 }
 0x43b   : > { %v1141_v30 = vpack.c.bf16 %v1136_v27, %v1135_v16 }
 0x442   : > { %2147 = vmatmul.msk.bf16.vlgmr.msrb.gmra.mxu3 %vm839_vm3, %v1139_v8 }
 0x447   : > { %v1298_v49 = vpop.xlane.xlu2 %1297 }
 0x448   : > { %v1316_v11 = vsub.f32 %v2822_v46, %v1298_v49 }
 0x44a   : > { %v1326_v59 = vmul.f32 1.442695, %v1316_v11 }
 0x452   : > { %2148 = vmatmul.msk.bf16.gmra.mxu3 %vm839_vm3, %v1140_v25 }
 0x462   : > { %2149 = vmatmul.msk.bf16.gmra.mxu3 %vm839_vm3, %v1141_v30 }
 0x465   : > { %v1579_v23 = vpop.xlane.xlu1 %1578 }
 0x46d   : > { %v1292_v36 = vpop.xlane.xlu1 %1291 }
 0x46e   : > { %v1314_v57 = vsub.f32 %v2831_v1, %v1292_v36 }
 0x470   : > { %v1322_v18 = vmul.f32 1.442695, %v1314_v57 }
 0x472   : > { %2323 = vpow2.f32 %v1322_v18 }
 0x473   : > { %2325 = vrcp.f32 %v1122_v3 }
 0x474   : > { %2327 = vpow2.f32 %v1565_v43 }
 0x475   : > { %v1301_v0 = vpop.xlane.xlu1 %1300 }
 0x476   : > { %v1317_v4 = vsub.f32 %v2839_v12, %v1301_v0 }
 0x478   : > { %v2900_v32 = vpop.eup %2323  ;;  %v1119_v51 = vpop.xlane.xlu0 %1118  ;;  %v1328_v9 = vmul.f32 1.442695, %v1317_v4  ;;  %v1556_v4 = vsub.f32 %v2737_v31, %v2865_v33 }
 0x479   : > { %2329 = vrcp.f32 %v1119_v51  ;;  %v1338_v54 = vsel %vm839_vm3, %v2900_v32, 0.0  ;;  %v2326_v1 = vpop.eup %2325 }
 0x47a   : > { %1339 = vadd.xlane.f32.xlu0 %v1338_v54  ;;  %v2905_v63 = vpop.eup %2327  ;;  %2331 = vpow2.f32 %v1326_v59  ;;  %v1138_v5 = vmul.f32 %v2326_v1, %v2818_v38  ;;  %v1560_v1 = vsub.f32 %v2757_v50, %v2881_v44 }
 0x47b   : > { %v1583_v6 = vsel %vm839_vm3, %v2905_v63, 0.0 }
 0x47d   : > { %v1307_v8 = vpop.xlane.xlu1 %1306 }
 0x47f   : > { %v2330_v48 = vpop.eup %2329  ;;  %v962_v2 = vpop.f32.mrf.mxu3 }
 0x480   : > { %979 = vst.msk [vmem:[#allocation2 + $0x10] sm:$0xff] %vm786_vm2, %v962_v2  ;;  %v1295_v17 = vpop.xlane.xlu0 %1294  ;;  %v1137_v46 = vmul.f32 %v2330_v48, %v2843_v28  ;;  %v2915_v12 = vpop.eup %2331  ;;  %v1557_v28 = vsub.f32 %v2781_v62, %v2879_v56  ;;  %v1558_v62 = vsub.f32 %v2747_v39, %v2873_v52  ;;  %v1319_v52 = vsub.f32 %v2847_v15, %v1307_v8 }
 0x481   : > { %v1315_v37 = vsub.f32 %v2849_v61, %v1295_v17  ;;  %v1344_v61 = vsel %vm839_vm3, %v2915_v12, 0.0  ;;  %v1567_v17 = vmul.f32 1.442695, %v1556_v4 }
 0x482   : > { %1584 = vadd.xlane.f32.xlu0 %v1583_v6  ;;  %v1142_v42 = vpack.c.bf16 %v1138_v5, %v1137_v46  ;;  %v1569_v34 = vmul.f32 1.442695, %v1557_v28  ;;  %v1571_v26 = vmul.f32 1.442695, %v1558_v62  ;;  %v1332_v3 = vmul.f32 1.442695, %v1319_v52 }
 0x483   : > { %v1324_v7 = vmul.f32 1.442695, %v1315_v37  ;;  %v1559_v5 = vsub.f32 %v2809_v29, %v2896_v55 }
 0x484   : > { %2150 = vmatmul.msk.bf16.gmra.mxu3 %vm839_vm3, %v1142_v42 }
 0x485   : > { %2333 = vpow2.f32 %v1324_v7  ;;  %v1310_v60 = vpop.xlane.xlu1 %1309  ;;  %v1573_v6 = vmul.f32 1.442695, %v1559_v5 }
 0x486   : > { %2335 = vpow2.f32 %v1328_v9  ;;  %v1320_v43 = vsub.f32 %v2859_v41, %v1310_v60 }
 0x487   : > { %v964_v13 = vpop.f32.mrf.mxu3  ;;  %2337 = vpow2.f32 %v1569_v34 }
 0x488   : > { %980 = vst.msk [vmem:[#allocation2 + $0x18] sm:$0xff] %vm786_vm2, %v964_v13  ;;  %v1582_v38 = vpop.xlane.xlu0 %1581  ;;  %v1334_v49 = vmul.f32 1.442695, %v1320_v43 }
 0x489   : > { %2339 = vrcp.f32 %v1582_v38 }
 0x48a   : > { %1345 = vadd.xlane.f32.xlu0 %v1344_v61  ;;  %2341 = vrcp.f32 %v1579_v23 }
 0x48b   : > { %v2922_v40 = vpop.eup %2333 }
 0x48c   : > { %v1341_v24 = vsel %vm839_vm3, %v2922_v40, 0.0  ;;  %v2926_v20 = vpop.eup %2335 }
 0x48d   : > { %1342 = vadd.xlane.f32.xlu2 %v1341_v24  ;;  %v1347_v21 = vsel %vm839_vm3, %v2926_v20, 0.0  ;;  %v2934_v14 = vpop.eup %2337 }
 0x48f   : > { %v967_v10 = vpop.f32.mrf.mxu3  ;;  %v2340_v39 = vpop.eup %2339 }
 0x490   : > { %981 = vst.msk [vmem:[#allocation2 + $0x20] sm:$0xff] %vm786_vm2, %v967_v10  ;;  %v1304_v56 = vpop.xlane.xlu0 %1303  ;;  %v2342_v27 = vpop.eup %2341  ;;  %v1610_v23 = vmul.f32 %v2340_v39, %v2863_v45 }
 0x491   : > { %v1318_v19 = vsub.f32 %v2869_v47, %v1304_v56  ;;  %v1589_v47 = vsel %vm839_vm3, %v2934_v14, 0.0  ;;  %v1609_v57 = vmul.f32 %v2342_v27, %v2827_v58 }
 0x492   : > { %1348 = vadd.xlane.f32.xlu0 %v1347_v21 }
 0x493   : > { %v1330_v25 = vmul.f32 1.442695, %v1318_v19  ;;  %v1617_v18 = vpack.c.bf16 %v1610_v23, %v1609_v57 }
 0x495   : > { %2343 = vpow2.f32 %v1330_v25 }
 0x496   : > { %2345 = vpow2.f32 %v1571_v26 }
 0x497   : > { %v969_v16 = vpop.f32.mrf.mxu3  ;;  %2347 = vpow2.f32 %v1332_v3 }
 0x498   : > { %982 = vst.msk [vmem:[#allocation2 + $0x28] sm:$0xff] %vm786_vm2, %v969_v16  ;;  %v1313_v11 = vpop.xlane.xlu0 %1312  ;;  %2349 = vpow2.f32 %v1334_v49 }
 0x499   : > { %v1321_v51 = vsub.f32 %v2875_v53, %v1313_v11 }
 0x49a   : > { %1590 = vadd.xlane.f32.xlu0 %v1589_v47 }
 0x49b   : > { %v2940_v30 = vpop.eup %2343  ;;  %v1336_v41 = vmul.f32 1.442695, %v1321_v51 }
 0x49c   : > { %v1350_v36 = vsel %vm839_vm3, %v2940_v30, 0.0  ;;  %v2946_v15 = vpop.eup %2345 }
 0x49d   : > { %1351 = vadd.xlane.f32.xlu1 %v1350_v36  ;;  %v1622_v35 = vpop.permute.xlu1 %1621  ;;  %v1592_v45 = vsel %vm839_vm3, %v2946_v15, 0.0  ;;  %v2953_v58 = vpop.eup %2347  ;;  %2351 = vpow2.f32 %v1336_v41 }
 0x49e   : > { %1643 = vmatpush.bf16.msra.mxu3 %v1622_v35  ;;  %v1353_v54 = vsel %vm839_vm3, %v2953_v58, 0.0  ;;  %v2958_v59 = vpop.eup %2349 }
 0x49f   : > { %v1356_v0 = vsel %vm839_vm3, %v2958_v59, 0.0 }
 0x4a1   : > { %2163 = vmatmul.msk.bf16.vlgmr.msra.gmra.mxu3 %vm839_vm3, %v1617_v18 }
 0x4a2   : > { %1593 = vadd.xlane.f32.xlu0 %v1592_v45 }
 0x4a3   : > { %v2964_v2 = vpop.eup %2351 }
 0x4a4   : > { %v1359_v53 = vsel %vm839_vm3, %v2964_v2, 0.0 }
 0x4a5   : > { %1382 = vrot.lane.b32.xlu2 %v2585_v22, %s2406_s16  ;;  %v1575_v22 = vmul.f32 1.442695, %v1560_v1 }
 0x4a7   : > { %2353 = vpow2.f32 %v1575_v22 }
 0x4a8   : > { %2355 = vpow2.f32 %v1567_v17 }
 0x4a9   : > { %2357 = vpow2.f32 %v1573_v6 }
 0x4aa   : > { %1354 = vadd.xlane.f32.xlu0 %v1353_v54 }
 0x4ad   : > { %v2971_v44 = vpop.eup %2353 }
 0x4ae   : > { %v1598_v46 = vsel %vm839_vm3, %v2971_v44, 0.0  ;;  %v2979_v31 = vpop.eup %2355 }
 0x4af   : > { %v1586_v33 = vsel %vm839_vm3, %v2979_v31, 0.0  ;;  %v2983_v42 = vpop.eup %2357 }
 0x4b0   : > { %v1595_v7 = vsel %vm839_vm3, %v2983_v42, 0.0 }
 0x4b2   : > { %1357 = vadd.xlane.f32.xlu0 %v1356_v0 }
 0x4b5   : > { %v972_v48 = vpop.f32.mrf.mxu3 }
 0x4b6   : > { %983 = vst.msk [vmem:[#allocation2 + $0x30] sm:$0xff] %vm786_vm2, %v972_v48 }
 0x4ba   : > { %1360 = vadd.xlane.f32.xlu0 %v1359_v53 }
 0x4bd   : > { %v974_v50 = vpop.f32.mrf.mxu3 }
 0x4be   : > { %984 = vst.msk [vmem:[#allocation2 + $0x38] sm:$0xff] %vm786_vm2, %v974_v50 }
 0x4c2   : > { %1599 = vadd.xlane.f32.xlu0 %v1598_v46 }
 0x4c5   : > { %v1167_v37 = vpop.f32.mrf.mxu3 }
 0x4c6   : > { %1195 = vrot.lane.b32.xlu1 %v1167_v37, %s2407_s17 }
 0x4cd   : > { %v1169_v9 = vpop.f32.mrf.mxu3 }
 0x4ce   : > { %1587 = vadd.xlane.f32.xlu2 %v1586_v33 }
 0x4d5   : > { %v2987_v29 = vpop.f32.mrf.mxu3 }
 0x4d6   : > { %1596 = vadd.xlane.f32.xlu2 %v1595_v7 }
 0x4dd   : > { %v2990_v28 = vpop.f32.mrf.mxu3 }
 0x4e5   : > { %v2992_v61 = vpop.f32.mrf.mxu3 }
 0x4ed   : > { %v1340_v55 = vpop.xlane.xlu0 %1339  ;;  %v2996_v21 = vpop.f32.mrf.mxu3 }
 0x4ee   : > { %1197 = vrot.lane.b32.xlu2 %v1169_v9, %s2407_s17  ;;  %2359 = vrcp.f32 %v1340_v55 }
 0x4f4   : > { %v2360_v34 = vpop.eup %2359 }
 0x4f5   : > { %v1585_v13 = vpop.xlane.xlu0 %1584  ;;  %v1370_v62 = vmul.f32 %v2360_v34, %v2900_v32 }
 0x4fd   : > { %v1346_v38 = vpop.xlane.xlu0 %1345 }
 0x500   : > { %v1343_v8 = vpop.xlane.xlu2 %1342 }
 0x501   : > { %2361 = vrcp.f32 %v1343_v8 }
 0x505   : > { %v1349_v24 = vpop.xlane.xlu0 %1348 }
 0x506   : > { %2363 = vrcp.f32 %v1349_v24  ;;  %v2195_v24 = vld [vmem:[%s3198_s9 + $0x8] sm:$0xff] }
 0x507   : > { %v2362_v10 = vpop.eup %2361  ;;  %2365 = vrcp.f32 %v1346_v38  ;;  %v2999_v60 = vpop.f32.mrf.mxu3  ;;  %1756 = vmatpush.bf16.msrb.mxu0 %v2195_v24 }
 0x508   : > { %v1371_v56 = vmul.f32 %v2362_v10, %v2922_v40  ;;  %v1383_v19 = vpop.permute.xlu2 %1382 }
 0x509   : > { %1404 = vmatpush.bf16.msra.mxu2 %v1383_v19 }
 0x50a   : > { %v1378_v25 = vpack.c.bf16 %v1371_v56, %v1370_v62  ;;  %v2194_v62 = vld [vmem:[%s3198_s9] sm:$0xff] }
 0x50b   : > { %1757 = vmatpush.bf16.msrb.mxu0 %v2194_v62 }
 0x50c   : > { %2155 = vmatmul.msk.bf16.vlgmr.msra.gmra.mxu2 %vm839_vm3, %v1378_v25  ;;  %v2364_v16 = vpop.eup %2363 }
 0x50d   : > { %v1591_v26 = vpop.xlane.xlu0 %1590  ;;  %v2366_v39 = vpop.eup %2365  ;;  %v1373_v47 = vmul.f32 %v2364_v16, %v2926_v20 }
 0x50e   : > { %v1372_v32 = vmul.f32 %v2366_v39, %v2915_v12 }
 0x50f   : > { %v3003_v27 = vpop.f32.mrf.mxu3 }
 0x510   : > { %v1379_v40 = vpack.c.bf16 %v1373_v47, %v1372_v32  ;;  %v1352_v23 = vpop.xlane.xlu1 %1351 }
 0x515   : > { %v1594_v52 = vpop.xlane.xlu0 %1593 }
 0x51c   : > { %2156 = vmatmul.msk.bf16.gmra.mxu2 %vm839_vm3, %v1379_v40 }
 0x51d   : > { %v1355_v3 = vpop.xlane.xlu0 %1354 }
 0x51e   : > { %2367 = vrcp.f32 %v1355_v3 }
 0x51f   : > { %2369 = vrcp.f32 %v1352_v23 }
 0x524   : > { %v2368_v36 = vpop.eup %2367  ;;  %v1645_v57 = vpop.f32.mrf.mxu3 }
 0x525   : > { %v2370_v35 = vpop.eup %2369  ;;  %v1358_v18 = vpop.xlane.xlu0 %1357  ;;  %v1375_v43 = vmul.f32 %v2368_v36, %v2953_v58 }
 0x526   : > { %v1374_v45 = vmul.f32 %v2370_v35, %v2940_v30 }
 0x528   : > { %v1380_v20 = vpack.c.bf16 %v1375_v43, %v1374_v45 }
 0x52c   : > { %2157 = vmatmul.msk.bf16.gmra.mxu2 %vm839_vm3, %v1380_v20  ;;  %v1647_v12 = vpop.f32.mrf.mxu3 }
 0x52d   : > { %v1361_v49 = vpop.xlane.xlu0 %1360  ;;  %1675 = vrot.lane.b32.xlu2 %v1647_v12, %s2408_s18 }
 0x52e   : > { %2371 = vrcp.f32 %v1361_v49 }
 0x52f   : > { %2373 = vrcp.f32 %v1358_v18 }
 0x530   : > { %2375 = vrcp.f32 %v1585_v13 }
 0x534   : > { %v2372_v11 = vpop.eup %2371 }
 0x535   : > { %v2374_v51 = vpop.eup %2373  ;;  %v1377_v54 = vmul.f32 %v2372_v11, %v2964_v2  ;;  %v1600_v6 = vpop.xlane.xlu0 %1599 }
 0x536   : > { %v1376_v58 = vmul.f32 %v2374_v51, %v2958_v59  ;;  %v2376_v0 = vpop.eup %2375 }
 0x537   : > { %v1611_v53 = vmul.f32 %v2376_v0, %v2905_v63 }
 0x538   : > { %v1196_v41 = vpop.permute.xlu1 %1195  ;;  %v1381_v30 = vpack.c.bf16 %v1377_v54, %v1376_v58 }
 0x539   : > { %1220 = vst.msk [vmem:[#allocation2] sm:$0xff] %vm1219_vm4, %v1196_v41 }
 0x53c   : > { %2158 = vmatmul.msk.bf16.gmra.mxu2 %vm839_vm3, %v1381_v30 }
 0x541   : > { %v1588_v1 = vpop.xlane.xlu2 %1587 }
 0x542   : > { %2377 = vrcp.f32 %v1588_v1 }
 0x543   : > { %2379 = vrcp.f32 %v1594_v52 }
 0x544   : > { %2381 = vrcp.f32 %v1591_v26 }
 0x548   : > { %v2378_v22 = vpop.eup %2377 }
 0x549   : > { %v1597_v48 = vpop.xlane.xlu2 %1596  ;;  %v1612_v4 = vmul.f32 %v2378_v22, %v2979_v31  ;;  %v2380_v2 = vpop.eup %2379 }
 0x54a   : > { %v2382_v17 = vpop.eup %2381  ;;  %v1614_v46 = vmul.f32 %v2380_v2, %v2946_v15  ;;  %2383 = vrcp.f32 %v1597_v48 }
 0x54b   : > { %v1618_v50 = vpack.c.bf16 %v1612_v4, %v1611_v53  ;;  %v1613_v5 = vmul.f32 %v2382_v17, %v2934_v14  ;;  %2385 = vrcp.f32 %v1600_v6  ;;  %v2197_v4 = vld [vmem:[%s3087_s28] sm:$0xff]  }
 0x54d   : > { %2164 = vmatmul.msk.bf16.gmra.mxu3 %vm839_vm3, %v1618_v50  ;;  %v1619_v37 = vpack.c.bf16 %v1614_v46, %v1613_v5  ;;  %v2256_v50 = vld [vmem:[%s3199_s10] ss:$0 sm:$0xff] }
 0x550   : > { %v2384_v63 = vpop.eup %2383 }
 0x551   : > { %v1198_v59 = vpop.permute.xlu2 %1197  ;;  %v2386_v31 = vpop.eup %2385  ;;  %v1615_v33 = vmul.f32 %v2384_v63, %v2983_v42 }
 0x552   : > { %1221 = vst.msk [vmem:[#allocation2 + $0x8] sm:$0xff] %vm1219_vm4, %v1198_v59  ;;  %v1616_v7 = vmul.f32 %v2386_v31, %v2971_v44  ;;  %v2198_v59 = vunpack.c.l.bf16 %v2197_v4 }
 0x554   : > { %v1620_v9 = vpack.c.bf16 %v1616_v7, %v1615_v33  ;;  %v2212_v7 = vld [vmem:[%s3087_s28 + $0x8] sm:$0xff]  }
 0x55d   : > { %2165 = vmatmul.msk.bf16.gmra.mxu3 %vm839_vm3, %v1619_v37  ;;  %v2199_v37 = vunpack.c.h.bf16 %v2197_v4 }
 0x56d   : > { %2166 = vmatmul.msk.bf16.gmra.mxu3 %vm839_vm3, %v1620_v9  ;;  %v2202_v9 = vunpack.c.l.bf16 %v2212_v7 }
 0x587   : > { %v1676_v26 = vpop.permute.xlu2 %1675 }
 0x58f   : > { %v1406_v55 = vpop.f32.mrf.mxu2 }
 0x590   : > { %1434 = vrot.lane.b32.xlu0 %v1406_v55, %s2409_s19 }
 0x597   : > { %v1408_v14 = vpop.f32.mrf.mxu2 }
 0x598   : > { %1436 = vrot.lane.b32.xlu1 %v1408_v14, %s2409_s19  ;;  %1673 = vrot.lane.b32.xlu0 %v1645_v57, %s2408_s18 }
 0x59f   : > { %v1411_v15 = vpop.f32.mrf.mxu2 }
 0x5a0   : > { %1199 = vrot.lane.b32.xlu1 %v2987_v29, %s2407_s17  ;;  %1201 = vrot.lane.b32.xlu0 %v2990_v28, %s2407_s17 }
 0x5a1   : > { %1438 = vrot.lane.b32.xlu2 %v1411_v15, %s2409_s19 }
 0x5a7   : > { %v1413_v44 = vpop.f32.mrf.mxu2 }
 0x5a8   : > { %1440 = vrot.lane.b32.xlu1 %v1413_v44, %s2409_s19 }
 0x5af   : > { %v1416_v42 = vpop.f32.mrf.mxu2 }
 0x5b0   : > { %1203 = vrot.lane.b32.xlu1 %v2992_v61, %s2407_s17 }
 0x5b7   : > { %v1418_v13 = vpop.f32.mrf.mxu2 }
 0x5b8   : > { %1444 = vrot.lane.b32.xlu1 %v1418_v13, %s2409_s19 }
 0x5bf   : > { %v1421_v38 = vpop.f32.mrf.mxu2 }
 0x5c0   : > { %1207 = vrot.lane.b32.xlu1 %v2999_v60, %s2407_s17 }
 0x5c7   : > { %v1423_v29 = vpop.f32.mrf.mxu2 }
 0x5c8   : > { %1448 = vrot.lane.b32.xlu1 %v1423_v29, %s2409_s19 }
 0x5d0   : > { %v1650_v28 = vpop.f32.mrf.mxu3 }
 0x5d1   : > { %1677 = vrot.lane.b32.xlu0 %v1650_v28, %s2408_s18  ;;  %v2213_v28 = vld [vmem:[%s3087_s28 + $0x10] sm:$0xff]  }
 0x5d8   : > { %v1652_v8 = vpop.f32.mrf.mxu3 }
 0x5d9   : > { %1205 = vrot.lane.b32.xlu0 %v2996_v21, %s2407_s17  ;;  %1679 = vrot.lane.b32.xlu2 %v1652_v8, %s2408_s18 }
 0x5e0   : > { %v1655_v61 = vpop.f32.mrf.mxu3 }
 0x5e1   : > { %1681 = vrot.lane.b32.xlu0 %v1655_v61, %s2408_s18  ;;  %1442 = vrot.lane.b32.xlu2 %v1416_v42, %s2409_s19  ;;  %v2203_v42 = vunpack.c.h.bf16 %v2212_v7  ;;  %v2206_v61 = vunpack.c.l.bf16 %v2213_v28 }
 0x5e8   : > { %v1657_v34 = vpop.f32.mrf.mxu3 }
 0x5e9   : > { %1209 = vrot.lane.b32.xlu0 %v3003_v27, %s2407_s17  ;;  %1683 = vrot.lane.b32.xlu2 %v1657_v34, %s2408_s18  ;;  %s3099_s17 = scalar_lea.vmem %s3202_s13, %s2541_s21 }
 0x5f0   : > { %v1660_v10 = vpop.f32.mrf.mxu3 }
 0x5f1   : > { %1685 = vrot.lane.b32.xlu0 %v1660_v10, %s2408_s18  ;;  %1446 = vrot.lane.b32.xlu2 %v1421_v38, %s2409_s19 }
 0x5f8   : > { %v1662_v56 = vpop.f32.mrf.mxu3 }
 0x5f9   : > { %1687 = vrot.lane.b32.xlu2 %v1662_v56, %s2408_s18  ;;  %v2207_v56 = vunpack.c.h.bf16 %v2213_v28 }
 0x5fb   : > { %v1439_v52 = vpop.permute.xlu2 %1438 }
 0x602   : > { %v1435_v19 = vpop.permute.xlu0 %1434 }
 0x603   : > { %1459 = vst.msk [vmem:[#allocation2] sm:$0xff] %vm1458_vm5, %v1435_v19 }
 0x60a   : > { %v1674_v21 = vpop.permute.xlu0 %1673  ;;  %v1437_v25 = vpop.permute.xlu1 %1436 }
 0x60b   : > { %1698 = vst.msk [vmem:[#allocation2] sm:$0xff] %vm1697_vm6, %v1674_v21 }
 0x60c   : > { %1460 = vst.msk [vmem:[#allocation2 + $0x8] sm:$0xff] %vm1458_vm5, %v1437_v25 }
 0x60d   : > { %1699 = vst.msk [vmem:[#allocation2 + $0x8] sm:$0xff] %vm1697_vm6, %v1676_v26  ;;  %v2214_v26 = vld [vmem:[%s3087_s28 + $0x18] sm:$0xff]  }
 0x612   : > { %v1202_v60 = vpop.permute.xlu0 %1201  ;;  %v1200_v16 = vpop.permute.xlu1 %1199  ;;  %v1706_v39 = vld [vmem:[#allocation2] sm:$0xff] }
 0x613   : > { %1223 = vst.msk [vmem:[#allocation2 + $0x18] sm:$0xff] %vm1219_vm4, %v1202_v60 }
 0x614   : > { %1222 = vst.msk [vmem:[#allocation2 + $0x10] sm:$0xff] %vm1219_vm4, %v1200_v16  ;;  %v1707_v47 = vld [vmem:[#allocation2 + $0x8] sm:$0xff] }
 0x615   : > { %1461 = vst.msk [vmem:[#allocation2 + $0x10] sm:$0xff] %vm1458_vm5, %v1439_v52  ;;  %v1714_v32 = vpack.c.bf16 %v1707_v47, %v1706_v39  ;;  %v2210_v39 = vunpack.c.l.bf16 %v2214_v26 }
 0x617   : > { %2175 = vmatmul.msk.bf16.vlgmr.msrb.gmra.mxu0 %vm702_vm1, %v1714_v32 }
 0x61a   : > { %v1441_v40 = vpop.permute.xlu1 %1440 }
 0x61b   : > { %1462 = vst.msk [vmem:[#allocation2 + $0x18] sm:$0xff] %vm1458_vm5, %v1441_v40 }
 0x622   : > { %v1204_v27 = vpop.permute.xlu1 %1203 }
 0x623   : > { %1224 = vst.msk [vmem:[#allocation2 + $0x20] sm:$0xff] %vm1219_vm4, %v1204_v27 }
 0x62a   : > { %v1445_v23 = vpop.permute.xlu1 %1444 }
 0x632   : > { %v1208_v3 = vpop.permute.xlu1 %1207 }
 0x633   : > { %1226 = vst.msk [vmem:[#allocation2 + $0x30] sm:$0xff] %vm1219_vm4, %v1208_v3  ;;  %v1680_v36 = vpop.permute.xlu2 %1679 }
 0x634   : > { %1701 = vst.msk [vmem:[#allocation2 + $0x18] sm:$0xff] %vm1697_vm6, %v1680_v36 }
 0x63a   : > { %v1449_v58 = vpop.permute.xlu1 %1448 }
 0x63b   : > { %v1443_v57 = vpop.permute.xlu2 %1442  ;;  %v1709_v20 = vld [vmem:[#allocation2 + $0x18] sm:$0xff] }
 0x63c   : > { %1463 = vst.msk [vmem:[#allocation2 + $0x20] sm:$0xff] %vm1458_vm5, %v1443_v57 }
 0x643   : > { %v1678_v35 = vpop.permute.xlu0 %1677  ;;  %v1684_v18 = vpop.permute.xlu2 %1683 }
 0x644   : > { %1700 = vst.msk [vmem:[#allocation2 + $0x10] sm:$0xff] %vm1697_vm6, %v1678_v35 }
 0x64b   : > { %v1206_v43 = vpop.permute.xlu0 %1205  ;;  %v1708_v45 = vld [vmem:[#allocation2 + $0x10] sm:$0xff]  ;;  %v1447_v12 = vpop.permute.xlu2 %1446 }
 0x64c   : > { %1225 = vst.msk [vmem:[#allocation2 + $0x28] sm:$0xff] %vm1219_vm4, %v1206_v43  ;;  %v1715_v49 = vpack.c.bf16 %v1709_v20, %v1708_v45  ;;  %v2211_v43 = vunpack.c.h.bf16 %v2214_v26 }
 0x64d   : > { %1464 = vst.msk [vmem:[#allocation2 + $0x28] sm:$0xff] %vm1458_vm5, %v1445_v23 }
 0x64e   : > { %1703 = vst.msk [vmem:[#allocation2 + $0x28] sm:$0xff] %vm1697_vm6, %v1684_v18  ;;  %2176 = vmatmul.msk.bf16.gmra.mxu0 %vm702_vm1, %v1715_v49 }
 0x64f   : > { %1465 = vst.msk [vmem:[#allocation2 + $0x30] sm:$0xff] %vm1458_vm5, %v1447_v12 }
 0x653   : > { %v1682_v11 = vpop.permute.xlu0 %1681  ;;  %v1688_v1 = vpop.permute.xlu2 %1687 }
 0x654   : > { %1702 = vst.msk [vmem:[#allocation2 + $0x20] sm:$0xff] %vm1697_vm6, %v1682_v11 }
 0x655   : > { %v1711_v41 = vld [vmem:[#allocation2 + $0x28] sm:$0xff] }
 0x65b   : > { %v1210_v51 = vpop.permute.xlu0 %1209  ;;  %v1710_v54 = vld [vmem:[#allocation2 + $0x20] sm:$0xff] }
 0x65c   : > { %1227 = vst.msk [vmem:[#allocation2 + $0x38] sm:$0xff] %vm1219_vm4, %v1210_v51  ;;  %v1716_v30 = vpack.c.bf16 %v1711_v41, %v1710_v54 }
 0x65d   : > { %1466 = vst.msk [vmem:[#allocation2 + $0x38] sm:$0xff] %vm1458_vm5, %v1449_v58 }
 0x65e   : > { %1705 = vst.msk [vmem:[#allocation2 + $0x38] sm:$0xff] %vm1697_vm6, %v1688_v1  ;;  %2177 = vmatmul.msk.bf16.gmra.mxu0 %vm702_vm1, %v1716_v30 }
 0x663   : > { %v1686_v0 = vpop.permute.xlu0 %1685 }
 0x664   : > { %1704 = vst.msk [vmem:[#allocation2 + $0x30] sm:$0xff] %vm1697_vm6, %v1686_v0  ;;  %v2410_v0 = vmov 2048.0  }
 0x665   : > { %v1713_v48 = vld [vmem:[#allocation2 + $0x38] sm:$0xff]  ;;  %2387 = vrcp.f32 %v2410_v0 }
 0x66b   : > { %v1712_v22 = vld [vmem:[#allocation2 + $0x30] sm:$0xff] }
 0x66c   : > { %v1717_v53 = vpack.c.bf16 %v1713_v48, %v1712_v22  ;;  %v2388_v22 = vpop.eup %2387 }
 0x66d   : > { %v1844_v48 = vmul.f32 2048.0, %v2388_v22  ;;  %vm1848_vm7 = vweird.f32 %v2388_v22 }
 0x66e   : > { %2178 = vmatmul.msk.bf16.gmra.mxu0 %vm702_vm1, %v1717_v53 }
 0x66f   : > { %v1845_v53 = vsub.f32 1.0, %v1844_v48 }
 0x694   : > { %v1759_v2 = vpop.f32.mrf.mxu0 }
 0x695   : > { %v1760_v17 = vadd.f32 %v2256_v50, %v1759_v2  ;;  %v1846_v2 = vmul.f32 %v2388_v22, %v1845_v53  ;;  %v2258_v53 = vld [vmem:[%s3201_s12] ss:$0 sm:$0xff] }
 0x697   : > { %v3093_v46 = vadd.f32 %v2198_v59, %v1760_v17 }
 0x699   : > { %v1803_v5 = vpack.c.bf16 %v3093_v46, %v3093_v46  ;;  %v1819_v47 = vsel %vm702_vm1, %v3093_v46, 0.0 }
 0x69b   : > { %1811 = vst.msk [vmem:[%s3099_s17] sm:$0xf] %vm631_vm0, %v1803_v5 }
 0x69c   : > { %v1761_v6 = vpop.f32.mrf.mxu0 }
 0x69d   : > { %v1762_v63 = vadd.f32 %v2256_v50, %v1761_v6 }
 0x69f   : > { %v3105_v31 = vadd.f32 %v2199_v37, %v1762_v63  ;;  %v1847_v37 = vadd.f32 %v2388_v22, %v1846_v2 }
 0x6a1   : > { %v1804_v33 = vpack.c.bf16 %v3105_v31, %v3105_v31  ;;  %v1820_v16 = vsel %vm702_vm1, %v3105_v31, 0.0 }
 0x6a2   : > { %v1821_v27 = vadd.f32 %v1820_v16, %v1819_v47 }
 0x6a3   : > { %1812 = vst.msk [vmem:[%s3099_s17 + $0x4] sm:$0xf] %vm631_vm0, %v1804_v33  ;;  %v1849_v33 = vsel %vm1848_vm7, %v2388_v22, %v1847_v37 }
 0x6cb   : > { %v1764_v55 = vpop.f32.mrf.mxu0 }
 0x6cc   : > { %v1765_v14 = vadd.f32 %v2256_v50, %v1764_v55 }
 0x6ce   : > { %v3112_v15 = vadd.f32 %v2202_v9, %v1765_v14 }
 0x6d0   : > { %v1805_v44 = vpack.c.bf16 %v3112_v15, %v3112_v15  ;;  %v1822_v32 = vsel %vm702_vm1, %v3112_v15, 0.0 }
 0x6d1   : > { %v1823_v36 = vadd.f32 %v1822_v32, %v1821_v27 }
 0x6d2   : > { %1813 = vst.msk [vmem:[%s3099_s17 + $0x8] sm:$0xf] %vm631_vm0, %v1805_v44 }
 0x6d3   : > { %v1766_v13 = vpop.f32.mrf.mxu0 }
 0x6d4   : > { %v1767_v38 = vadd.f32 %v2256_v50, %v1766_v13 }
 0x6d6   : > { %v3118_v29 = vadd.f32 %v2203_v42, %v1767_v38 }
 0x6d8   : > { %v1806_v8 = vpack.c.bf16 %v3118_v29, %v3118_v29  ;;  %v1824_v23 = vsel %vm702_vm1, %v3118_v29, 0.0 }
 0x6d9   : > { %v1825_v18 = vadd.f32 %v1824_v23, %v1823_v36 }
 0x6da   : > { %1814 = vst.msk [vmem:[%s3099_s17 + $0xc] sm:$0xf] %vm631_vm0, %v1806_v8 }
 0x6db   : > { %v1769_v34 = vpop.f32.mrf.mxu0 }
 0x6dc   : > { %v1770_v24 = vadd.f32 %v2256_v50, %v1769_v34 }
 0x6de   : > { %v3125_v10 = vadd.f32 %v2206_v61, %v1770_v24 }
 0x6e0   : > { %v1807_v62 = vpack.c.bf16 %v3125_v10, %v3125_v10  ;;  %v1826_v57 = vsel %vm702_vm1, %v3125_v10, 0.0 }
 0x6e1   : > { %v1827_v12 = vadd.f32 %v1826_v57, %v1825_v18 }
 0x6e2   : > { %1815 = vst.msk [vmem:[%s3099_s17 + $0x10] sm:$0xf] %vm631_vm0, %v1807_v62 }
 0x6e3   : > { %v1771_v19 = vpop.f32.mrf.mxu0 }
 0x6e4   : > { %v1772_v21 = vadd.f32 %v2256_v50, %v1771_v19 }
 0x6e6   : > { %v1800_v25 = vadd.f32 %v2207_v56, %v1772_v21 }
 0x6e8   : > { %v1808_v60 = vpack.c.bf16 %v1800_v25, %v1800_v25  ;;  %v1828_v45 = vsel %vm702_vm1, %v1800_v25, 0.0 }
 0x6e9   : > { %v1829_v51 = vadd.f32 %v1828_v45, %v1827_v12 }
 0x6ea   : > { %1816 = vst.msk [vmem:[%s3099_s17 + $0x14] sm:$0xf] %vm631_vm0, %v1808_v60 }
 0x6eb   : > { %v1774_v52 = vpop.f32.mrf.mxu0 }
 0x6ec   : > { %v1775_v40 = vadd.f32 %v2256_v50, %v1774_v52 }
 0x6ee   : > { %v1801_v3 = vadd.f32 %v2210_v39, %v1775_v40 }
 0x6f0   : > { %v1809_v35 = vpack.c.bf16 %v1801_v3, %v1801_v3  ;;  %v1830_v11 = vsel %vm702_vm1, %v1801_v3, 0.0 }
 0x6f1   : > { %v1831_v41 = vadd.f32 %v1830_v11, %v1829_v51 }
 0x6f2   : > { %1817 = vst.msk [vmem:[%s3099_s17 + $0x18] sm:$0xf] %vm631_vm0, %v1809_v35 }
 0x6f3   : > { %v1776_v20 = vpop.f32.mrf.mxu0 }
 0x6f4   : > { %v1777_v49 = vadd.f32 %v2256_v50, %v1776_v20 }
 0x6f6   : > { %v1802_v54 = vadd.f32 %v2211_v43, %v1777_v49 }
 0x6f8   : > { %v1810_v58 = vpack.c.bf16 %v1802_v54, %v1802_v54  ;;  %v1832_v30 = vsel %vm702_vm1, %v1802_v54, 0.0 }
 0x6f9   : > { %v1833_v1 = vadd.f32 %v1832_v30, %v1831_v41 }
 0x6fa   : > { %1818 = vst.msk [vmem:[%s3099_s17 + $0x1c] sm:$0xf] %vm631_vm0, %v1810_v58  ;;  %v2257_v58 = vld [vmem:[%s3200_s11] ss:$0 sm:$0xff]  ;;  %s520_s17 = scalar_lea.vmem %s3203_s14, %s2541_s21 }
 0x6fb   : > { %1834 = vadd.xlane.f32.xlu1 %v1833_v1 }
 0x76e   : > { %v1835_v4 = vpop.xlane.xlu1 %1834 }
 0x76f   : > { %v1836_v59 = vrot.slane %v1835_v4, 4 }
 0x771   : > { %v1837_v50 = vadd.f32 %v1836_v59, %v1835_v4 }
 0x773   : > { %v1838_v17 = vrot.slane %v1837_v50, 2 }
 0x775   : > { %v1839_v5 = vadd.f32 %v1838_v17, %v1837_v50 }
 0x777   : > { %v1840_v6 = vrot.slane %v1839_v5, 1 }
 0x779   : > { %v1841_v63 = vadd.f32 %v1840_v6, %v1839_v5 }
 0x77b   : > { %2218 = vpush %v1841_v63 }
 0x77c   : > { %2220 = vpush %v1849_v33 }
 0x7ac   : > { %s2219_s18 = spop %2218 }
 0x7ad   : > { %s3151_s19 = spop %2220 }
 0x7ae   : > { %s1851_s20 = smul.f32 %s3151_s19, %s2219_s18 }
 0x7b0   : > { %v1852_v7 = vstv %s1851_s20 }
 0x7b1   : > { %v1853_v9 = vsub.f32 %v3093_v46, %v1852_v7  ;;  %v1854_v55 = vsub.f32 %v3105_v31, %v1852_v7  ;;  %v1855_v14 = vsub.f32 %v3112_v15, %v1852_v7  ;;  %v1856_v44 = vsub.f32 %v3118_v29, %v1852_v7 }
 0x7b2   : > { %v1857_v42 = vsub.f32 %v3125_v10, %v1852_v7  ;;  %v1858_v8 = vsub.f32 %v1800_v25, %v1852_v7  ;;  %v1859_v56 = vsub.f32 %v1801_v3, %v1852_v7  ;;  %v1860_v15 = vsub.f32 %v1802_v54, %v1852_v7 }
 0x7b3   : > { %v1861_v13 = vmul.f32 %v1853_v9, %v1853_v9  ;;  %v1862_v38 = vmul.f32 %v1854_v55, %v1854_v55  ;;  %v1863_v28 = vmul.f32 %v1855_v14, %v1855_v14  ;;  %v1864_v61 = vmul.f32 %v1856_v44, %v1856_v44 }
 0x7b4   : > { %v1865_v46 = vmul.f32 %v1857_v42, %v1857_v42  ;;  %v1866_v21 = vmul.f32 %v1858_v8, %v1858_v8  ;;  %v1867_v26 = vmul.f32 %v1859_v56, %v1859_v56  ;;  %v1868_v16 = vmul.f32 %v1860_v15, %v1860_v15 }
 0x7b5   : > { %v1869_v34 = vsel %vm702_vm1, %v1861_v13, 0.0  ;;  %v1870_v24 = vsel %vm702_vm1, %v1862_v38, 0.0  ;;  %v1872_v31 = vsel %vm702_vm1, %v1863_v28, 0.0  ;;  %v1874_v29 = vsel %vm702_vm1, %v1864_v61, 0.0 }
 0x7b6   : > { %v1871_v62 = vadd.f32 %v1870_v24, %v1869_v34  ;;  %v1876_v60 = vsel %vm702_vm1, %v1865_v46, 0.0  ;;  %v1878_v39 = vsel %vm702_vm1, %v1866_v21, 0.0  ;;  %v1880_v47 = vsel %vm702_vm1, %v1867_v26, 0.0 }
 0x7b7   : > { %v1882_v40 = vsel %vm702_vm1, %v1868_v16, 0.0 }
 0x7b8   : > { %v1873_v19 = vadd.f32 %v1872_v31, %v1871_v62 }
 0x7ba   : > { %v1875_v10 = vadd.f32 %v1874_v29, %v1873_v19 }
 0x7bc   : > { %v1877_v25 = vadd.f32 %v1876_v60, %v1875_v10 }
 0x7be   : > { %v1879_v52 = vadd.f32 %v1878_v39, %v1877_v25 }
 0x7c0   : > { %v1881_v32 = vadd.f32 %v1880_v47, %v1879_v52 }
 0x7c2   : > { %v1883_v27 = vadd.f32 %v1882_v40, %v1881_v32 }
 0x7c4   : > { %1884 = vadd.xlane.f32.xlu0 %v1883_v27 }
 0x837   : > { %v1885_v23 = vpop.xlane.xlu0 %1884 }
 0x838   : > { %v1886_v3 = vrot.slane %v1885_v23, 4 }
 0x83a   : > { %v1887_v36 = vadd.f32 %v1886_v3, %v1885_v23 }
 0x83c   : > { %v1888_v57 = vrot.slane %v1887_v36, 2 }
 0x83e   : > { %v1889_v35 = vadd.f32 %v1888_v57, %v1887_v36 }
 0x840   : > { %v1890_v18 = vrot.slane %v1889_v35, 1 }
 0x842   : > { %v1891_v43 = vadd.f32 %v1890_v18, %v1889_v35 }
 0x844   : > { %2222 = vpush %v1891_v43 }
 0x875   : > { %s2223_s22 = spop %2222 }
 0x876   : > { %s1901_s23 = smul.f32 %s2223_s22, %s3151_s19 }
 0x878   : > { %s1902_s25 = sadd.f32 1e-05, %s1901_s23 }
 0x87a   : > { %v1903_v45 = vstv %s1902_s25 }
 0x87b   : > { %2389 = vrsqrt.f32 %v1903_v45  ;;  %vm1910_vm9 = vweird.f32 %v1903_v45 }
 0x881   : > { %v2390_v20 = vpop.eup %2389 }
 0x882   : > { %v1905_v12 = vmul.f32 %v2390_v20, %v1903_v45  ;;  %vm1911_vm8 = vweird.f32 %v2390_v20 }
 0x883   : > { %vm1912_vm10 = vmor %vm1910_vm9, %vm1911_vm8 }
 0x884   : > { %v1906_v49 = vmul.f32 %v2390_v20, %v1905_v12 }
 0x886   : > { %v1907_v11 = vmul.f32 0.5, %v1906_v49 }
 0x888   : > { %v1908_v51 = vsub.f32 1.5, %v1907_v11 }
 0x88a   : > { %v1909_v54 = vmul.f32 %v2390_v20, %v1908_v51 }
 0x88c   : > { %v1913_v41 = vsel %vm1912_vm10, %v2390_v20, %v1909_v54 }
 0x88d   : > { %2224 = vpush %v1913_v41 }
 0x8be   : > { %s2225_s26 = spop %2224 }
 0x8bf   : > { %v1915_v30 = vstv %s2225_s26 }
 0x8c0   : > { %v1916_v1 = vmul.f32 %v1915_v30, %v1853_v9  ;;  %v1917_v0 = vmul.f32 %v1915_v30, %v1854_v55  ;;  %v1918_v22 = vmul.f32 %v1915_v30, %v1855_v14  ;;  %v1919_v48 = vmul.f32 %v1915_v30, %v1856_v44 }
 0x8c1   : > { %v1920_v4 = vmul.f32 %v1915_v30, %v1857_v42  ;;  %v1921_v59 = vmul.f32 %v1915_v30, %v1858_v8  ;;  %v1922_v50 = vmul.f32 %v1915_v30, %v1859_v56  ;;  %v1923_v2 = vmul.f32 %v1915_v30, %v1860_v15 }
 0x8c2   : > { %v1928_v17 = vmul.f32 %v2257_v58, %v1916_v1  ;;  %v1929_v5 = vmul.f32 %v2257_v58, %v1917_v0  ;;  %v1930_v37 = vmul.f32 %v2257_v58, %v1918_v22  ;;  %v1931_v6 = vmul.f32 %v2257_v58, %v1919_v48 }
 0x8c3   : > { %v1932_v63 = vmul.f32 %v2257_v58, %v1920_v4  ;;  %v1933_v33 = vmul.f32 %v2257_v58, %v1921_v59  ;;  %v1934_v7 = vmul.f32 %v2257_v58, %v1922_v50  ;;  %v1935_v9 = vmul.f32 %v2257_v58, %v1923_v2 }
 0x8c4   : > { %v1940_v55 = vadd.f32 %v2258_v53, %v1928_v17  ;;  %v1941_v14 = vadd.f32 %v2258_v53, %v1929_v5  ;;  %v1942_v44 = vadd.f32 %v2258_v53, %v1930_v37  ;;  %v1943_v13 = vadd.f32 %v2258_v53, %v1931_v6 }
 0x8c5   : > { %v1944_v42 = vadd.f32 %v2258_v53, %v1932_v63  ;;  %v1945_v38 = vadd.f32 %v2258_v53, %v1933_v33  ;;  %v1946_v28 = vadd.f32 %v2258_v53, %v1934_v7  ;;  %v1947_v24 = vadd.f32 %v2258_v53, %v1935_v9 }
 0x8c6   : > { %v1948_v8 = vpack.c.bf16 %v1940_v55, %v1940_v55  ;;  %v1949_v61 = vpack.c.bf16 %v1941_v14, %v1941_v14  ;;  %v1950_v34 = vpack.c.bf16 %v1942_v44, %v1942_v44  ;;  %v1951_v62 = vpack.c.bf16 %v1943_v13, %v1943_v13 }
 0x8c7   : > { %v1952_v56 = vpack.c.bf16 %v1944_v42, %v1944_v42  ;;  %v1953_v46 = vpack.c.bf16 %v1945_v38, %v1945_v38  ;;  %v1954_v31 = vpack.c.bf16 %v1946_v28, %v1946_v28  ;;  %v1955_v19 = vpack.c.bf16 %v1947_v24, %v1947_v24 }
 0x8c8   : > { %1956 = vst.msk [vmem:[%s520_s17] sm:$0xf] %vm631_vm0, %v1948_v8 }
 0x8c9   : > { %1957 = vst.msk [vmem:[%s520_s17 + $0x4] sm:$0xf] %vm631_vm0, %v1949_v61 }
 0x8ca   : > { %1958 = vst.msk [vmem:[%s520_s17 + $0x8] sm:$0xf] %vm631_vm0, %v1950_v34 }
 0x8cb   : > { %1959 = vst.msk [vmem:[%s520_s17 + $0xc] sm:$0xf] %vm631_vm0, %v1951_v62 }
 0x8cc   : > { %1960 = vst.msk [vmem:[%s520_s17 + $0x10] sm:$0xf] %vm631_vm0, %v1952_v56 }
 0x8cd   : > { %1961 = vst.msk [vmem:[%s520_s17 + $0x14] sm:$0xf] %vm631_vm0, %v1953_v46 }
 0x8ce   : > { %1962 = vst.msk [vmem:[%s520_s17 + $0x18] sm:$0xf] %vm631_vm0, %v1954_v31 }
 0x8cf   : > { %1963 = vst.msk [vmem:[%s520_s17 + $0x1c] sm:$0xf] %vm631_vm0, %v1955_v19 }
 0x8d0 PF: > { %s25_s29 = sadd.s32 1, %s2397_s29  }
 0x8d1   : > { %p22_p4 = scmp.ge.s32.totalorder %s25_s29, 4  }
 0x8d3   :  { %24 = sbr.rel (!%p22_p4) target bundleno = 1 (0x1), region = 124 }

</bundles_post_ra>
